<compile_context>
chip_gen: v7x
topology: tpu7x:2x2x1
jax: 0.10.0
libtpu: 0.0.40
codegen_flags: <defaults>
</compile_context>

<pallas_src>
import functools

import jax
import jax.numpy as jnp
from jax.experimental import pallas as pl
from jax.experimental.pallas import tpu as pltpu


def lstm_fc_kernel(x_ref, wih0_ref, b0_ref, wcomb_ref, b1_ref, wfc_ref,
                   bfc_ref, out_ref, xp_ref, *, T, B, H):
    # Layer-0 input projection hoisted out of the recurrence: one
    # (T*B, I) @ (I, 4H) MXU matmul (bias b0 folded in), stored to VMEM.
    x_flat = x_ref[...].reshape(T * B, -1)
    xp_ref[...] = (jnp.dot(x_flat, wih0_ref[...],
                           preferred_element_type=jnp.float32)
                   + b0_ref[...])

    # Loop-invariant loads/broadcasts hoisted: JAX does not CSE
    # broadcast_in_dim, so the unrolled loop would otherwise emit T copies.
    wcomb = wcomb_ref[...]
    b1 = jnp.broadcast_to(b1_ref[...], (B, 4 * H))

    def gates_to_hc(gates, c):
        # Gate order is [i, f, o, g] (permuted at init): sigmoid only on the
        # contiguous first 3H lanes, tanh only on the last H lanes.
        sig = jax.nn.sigmoid(gates[:, :3 * H])
        i = sig[:, 0 * H:1 * H]
        f = sig[:, 1 * H:2 * H]
        o = sig[:, 2 * H:3 * H]
        g = jnp.tanh(gates[:, 3 * H:])
        c_new = f * c + i * g
        h_new = o * jnp.tanh(c_new)
        return h_new, c_new

    zeros = jnp.zeros((B, H), jnp.float32)
    # Step 0, layer 0: h0(-1) == 0 so the recurrent contribution vanishes.
    h0, c0 = gates_to_hc(xp_ref[0:B, :], zeros)
    h1, c1 = zeros, zeros

    # TODO(synk): nn.LSTM inter-layer dropout (p=0.2) is training-only; the
    # eval-mode forward is identity, so no dropout is applied here.
    # T is small and static -> fully unrolled, h/c carried as values (no
    # per-step VMEM round-trips).  Switch to lax.fori_loop with pl.ds-indexed
    # xp if T grows past ~16-32 (vreg pressure).  Recurrent operands could
    # optionally be cast to bf16 (f32 accum) for v5e; kept f32 for fidelity.
    for t in range(T):
        # Single fused recurrent matmul per step:
        #   [h0(t) | h1(t-1)] @ (2H, 8H)
        #     cols  :4H  (+ b1)       -> layer-1 gates g1(t)
        #     cols 4H:   (+ xp(t+1))  -> layer-0 gates g0(t+1)
        z = jnp.concatenate([h0, h1], axis=1)
        big = jnp.dot(z, wcomb, preferred_element_type=jnp.float32)
        h1, c1 = gates_to_hc(big[:, :4 * H] + b1, c1)
        if t + 1 < T:
            g0 = big[:, 4 * H:] + xp_ref[(t + 1) * B:(t + 2) * B, :]
            h0, c0 = gates_to_hc(g0, c0)

    # fc head: VPU multiply + lane reduction.
    out_ref[...] = (jnp.sum(h1 * wfc_ref[...], axis=-1, keepdims=True)
                    + bfc_ref[...])


def player_rating_lstm_forward(x, kp, *, batch_tile=256):
    """x: (B, T, input_size) float32, returns (B, 1) float32."""
    B, T, I = x.shape
    H = kp["wfc"].shape[-1]

    # Pad batch to a sublane multiple (8) as the floor; tile the batch over a
    # parallel grid axis so large serving batches use both v7x TensorCores
    # and the xp scratch stays per-tile (bounded VMEM).
    B_pad = max(8, -(-B // 8) * 8)
    TB = min(batch_tile, B_pad)
    B_pad = -(-B_pad // TB) * TB
    num_tiles = B_pad // TB

    x_tm = jnp.transpose(x, (1, 0, 2))                 # (T, B, I) time-major
    if B_pad != B:
        x_tm = jnp.pad(x_tm, ((0, 0), (0, B_pad - B), (0, 0)))

    kernel = pl.pallas_call(
        functools.partial(lstm_fc_kernel, T=T, B=TB, H=H),
        out_shape=jax.ShapeDtypeStruct((B_pad, 1), jnp.float32),
        grid=(num_tiles,),
        in_specs=[
            pl.BlockSpec((T, TB, I), lambda b: (0, b, 0)),      # x batch tile
            pl.BlockSpec((I, 4 * H), lambda b: (0, 0)),         # wih0_t
            pl.BlockSpec((1, 4 * H), lambda b: (0, 0)),         # b0
            pl.BlockSpec((2 * H, 8 * H), lambda b: (0, 0)),     # W_comb
            pl.BlockSpec((1, 4 * H), lambda b: (0, 0)),         # b1
            pl.BlockSpec((1, H), lambda b: (0, 0)),             # wfc
            pl.BlockSpec((1, 1), lambda b: (0, 0)),             # bfc
        ],
        out_specs=pl.BlockSpec((TB, 1), lambda b: (b, 0)),
        scratch_shapes=[
            pltpu.VMEM((T * TB, 4 * H), jnp.float32),           # hoisted x@Wih0
        ],
        compiler_params=pltpu.CompilerParams(
            dimension_semantics=("parallel",),
            vmem_limit_bytes=32 * 1024 * 1024),
    )
    out = kernel(x_tm, kp["wih0_t"], kp["b0"], kp["w_comb"], kp["b1"],
                 kp["wfc"], kp["bfc"])
    return out[:B]


def init_torch_params(key, input_size, hidden_size):
    """Deterministic init mirroring PyTorch LSTM/Linear shapes, uniform(-k, k)."""
    H = hidden_size
    k = 1.0 / jnp.sqrt(H)
    keys = jax.random.split(key, 10)

    def u(kk, shape):
        return jax.random.uniform(kk, shape, jnp.float32, -k, k)

    return {
        "weight_ih_l0": u(keys[0], (4 * H, input_size)),
        "weight_hh_l0": u(keys[1], (4 * H, H)),
        "bias_ih_l0": u(keys[2], (4 * H,)),
        "bias_hh_l0": u(keys[3], (4 * H,)),
        "weight_ih_l1": u(keys[4], (4 * H, H)),
        "weight_hh_l1": u(keys[5], (4 * H, H)),
        "bias_ih_l1": u(keys[6], (4 * H,)),
        "bias_hh_l1": u(keys[7], (4 * H,)),
        "weight_fc": u(keys[8], (1, H)),
        "bias_fc": u(keys[9], (1,)),
    }


def _permute_gates_cols(w):
    """Reorder gate blocks along the last dim: PyTorch [i,f,g,o] -> [i,f,o,g]."""
    H = w.shape[-1] // 4
    i, f, g, o = (w[..., k * H:(k + 1) * H] for k in range(4))
    return jnp.concatenate([i, f, o, g], axis=-1)


def prepare_kernel_params(raw):
    """Repack PyTorch-layout weights for the kernel (transpose, gate permute,
    bias folding, fused recurrent weight)."""
    H = raw["weight_hh_l0"].shape[1]
    wih0_t = _permute_gates_cols(raw["weight_ih_l0"].T)              # (I, 4H)
    whh0_t = _permute_gates_cols(raw["weight_hh_l0"].T)              # (H, 4H)
    b0 = _permute_gates_cols(
        (raw["bias_ih_l0"] + raw["bias_hh_l0"]).reshape(1, -1))      # (1, 4H)
    w1_cat = _permute_gates_cols(jnp.concatenate(
        [raw["weight_ih_l1"].T, raw["weight_hh_l1"].T], axis=0))     # (2H, 4H)
    b1 = _permute_gates_cols(
        (raw["bias_ih_l1"] + raw["bias_hh_l1"]).reshape(1, -1))      # (1, 4H)
    # Fused recurrent weight: cols :4H -> g1(t); cols 4H: -> h0(t) @ whh0
    # (zero rows for the h1 half of z so h1 does not leak into g0).
    whh0_padded = jnp.concatenate([whh0_t, jnp.zeros_like(whh0_t)], axis=0)
    w_comb = jnp.concatenate([w1_cat, whh0_padded], axis=1)          # (2H, 8H)
    return {
        "wih0_t": wih0_t,
        "b0": b0,
        "w_comb": w_comb,
        "b1": b1,
        "wfc": raw["weight_fc"],                                     # (1, H)
        "bfc": raw["bias_fc"].reshape(1, 1),                         # (1, 1)
    }


def reference_forward(x, raw):
    """Pure-JAX reference of the PyTorch forward (eval mode, PyTorch layout)."""
    B, T, _ = x.shape
    H = raw["weight_hh_l0"].shape[1]

    def cell(xt, h, c, wih, whh, bih, bhh):
        g = xt @ wih.T + h @ whh.T + bih + bhh
        i = jax.nn.sigmoid(g[:, 0 * H:1 * H])
        f = jax.nn.sigmoid(g[:, 1 * H:2 * H])
        gg = jnp.tanh(g[:, 2 * H:3 * H])
        o = jax.nn.sigmoid(g[:, 3 * H:4 * H])
        c = f * c + i * gg
        h = o * jnp.tanh(c)
        return h, c

    h0 = jnp.zeros((B, H), jnp.float32)
    c0 = jnp.zeros((B, H), jnp.float32)
    h1 = jnp.zeros((B, H), jnp.float32)
    c1 = jnp.zeros((B, H), jnp.float32)
    for t in range(T):
        h0, c0 = cell(x[:, t, :], h0, c0, raw["weight_ih_l0"],
                      raw["weight_hh_l0"], raw["bias_ih_l0"],
                      raw["bias_hh_l0"])
        h1, c1 = cell(h0, h1, c1, raw["weight_ih_l1"],
                      raw["weight_hh_l1"], raw["bias_ih_l1"],
                      raw["bias_hh_l1"])
    return h1 @ raw["weight_fc"].T + raw["bias_fc"]


if __name__ == "__main__":
    B, T, INPUT_SIZE, HIDDEN = 2, 8, 16, 128   # module default hidden_size=128

    key = jax.random.PRNGKey(0)
    kx, kparams = jax.random.split(key)
    x = jax.random.normal(kx, (B, T, INPUT_SIZE), jnp.float32)

    raw = init_torch_params(kparams, INPUT_SIZE, HIDDEN)
    kp = prepare_kernel_params(raw)

    out = player_rating_lstm_forward(x, kp)
    out = jax.block_until_ready(out)

    ref = reference_forward(x, raw)
    assert out.shape == (B, 1), out.shape
    assert jnp.allclose(out, ref, atol=5e-4, rtol=5e-4), (out, ref)

    print("KERNEL_OK")
</pallas_src>

<mosaic_0001>
module attributes {stable_mosaic.version = 11 : i64} {
  func.func @lstm_fc_kernel(%arg0: i32, %arg1: memref<8x8x16xf32, #tpu.memory_space<vmem>>, %arg2: memref<16x512xf32, #tpu.memory_space<vmem>>, %arg3: memref<1x512xf32, #tpu.memory_space<vmem>>, %arg4: memref<256x1024xf32, #tpu.memory_space<vmem>>, %arg5: memref<1x512xf32, #tpu.memory_space<vmem>>, %arg6: memref<1x128xf32, #tpu.memory_space<vmem>>, %arg7: memref<1x1xf32, #tpu.memory_space<vmem>>, %arg8: memref<8x1xf32, #tpu.memory_space<vmem>>, %arg9: memref<64x512xf32, #tpu.memory_space<vmem>>) attributes {dimension_semantics = [#tpu.dimension_semantics<parallel>], iteration_bounds = array<i64: 1>, scalar_prefetch = 0 : i64, scratch_operands = 1 : i64, tpu.core_type = #tpu.core_type<tc>, window_params = [{transform_indices = @transform_0, window_bounds = array<i64: 8, 8, 16>}, {pipeline_mode = #tpu.pipeline_mode<synchronous>, transform_indices = @transform_1, window_bounds = array<i64: 16, 512>}, {pipeline_mode = #tpu.pipeline_mode<synchronous>, transform_indices = @transform_2, window_bounds = array<i64: 1, 512>}, {pipeline_mode = #tpu.pipeline_mode<synchronous>, transform_indices = @transform_3, window_bounds = array<i64: 256, 1024>}, {pipeline_mode = #tpu.pipeline_mode<synchronous>, transform_indices = @transform_4, window_bounds = array<i64: 1, 512>}, {pipeline_mode = #tpu.pipeline_mode<synchronous>, transform_indices = @transform_5, window_bounds = array<i64: 1, 128>}, {pipeline_mode = #tpu.pipeline_mode<synchronous>, transform_indices = @transform_6, window_bounds = array<i64: 1, 1>}, {transform_indices = @transform_7, window_bounds = array<i64: 8, 1>}]} {
    %c0 = arith.constant 0 : index
    %c0_0 = arith.constant 0 : index
    %c0_1 = arith.constant 0 : index
    %0 = vector.load %arg1[%c0, %c0_0, %c0_1] : memref<8x8x16xf32, #tpu.memory_space<vmem>>, vector<8x8x16xf32>
    %1 = vector.shape_cast %0 : vector<8x8x16xf32> to vector<64x16xf32>
    %c0_2 = arith.constant 0 : index
    %c0_3 = arith.constant 0 : index
    %2 = vector.load %arg2[%c0_2, %c0_3] : memref<16x512xf32, #tpu.memory_space<vmem>>, vector<16x512xf32>
    %cst = arith.constant dense<0.000000e+00> : vector<64x512xf32>
    %3 = tpu.matmul %1, %2, %cst {dimension_numbers = #tpu.dot_dimension_numbers<[1], [0], [0], [1], [0, 0, 1, 1], [], []>} : vector<64x16xf32>, vector<16x512xf32>, vector<64x512xf32> -> vector<64x512xf32>
    %c0_4 = arith.constant 0 : index
    %c0_5 = arith.constant 0 : index
    %4 = vector.load %arg3[%c0_4, %c0_5] : memref<1x512xf32, #tpu.memory_space<vmem>>, vector<1x512xf32>
    %5 = vector.broadcast %4 : vector<1x512xf32> to vector<64x512xf32>
    %6 = arith.addf %3, %5 : vector<64x512xf32>
    %c0_6 = arith.constant 0 : index
    %c0_7 = arith.constant 0 : index
    %7 = vector.load %arg9[%c0_6, %c0_7] : memref<64x512xf32, #tpu.memory_space<vmem>>, vector<64x512xf32>
    tpu.vector_store %arg9[%c0_6, %c0_7], %6 {strides = array<i32>} : memref<64x512xf32, #tpu.memory_space<vmem>>, vector<64x512xf32>,
    %c0_8 = arith.constant 0 : index
    %c0_9 = arith.constant 0 : index
    %8 = vector.load %arg4[%c0_8, %c0_9] : memref<256x1024xf32, #tpu.memory_space<vmem>>, vector<256x1024xf32>
    %c0_10 = arith.constant 0 : index
    %c0_11 = arith.constant 0 : index
    %9 = vector.load %arg5[%c0_10, %c0_11] : memref<1x512xf32, #tpu.memory_space<vmem>>, vector<1x512xf32>
    %10 = vector.shape_cast %9 : vector<1x512xf32> to vector<1x512xf32>
    %11 = vector.broadcast %10 : vector<1x512xf32> to vector<8x512xf32>
    %cst_12 = arith.constant 0.000000e+00 : f32
    %12 = vector.broadcast %cst_12 : f32 to vector<8x128xf32>
    %c0_13 = arith.constant 0 : index
    %c0_14 = arith.constant 0 : index
    %13 = vector.load %arg9[%c0_13, %c0_14] : memref<64x512xf32, #tpu.memory_space<vmem>>, vector<8x512xf32>
    %14 = vector.extract_strided_slice %13 {offsets = [0, 0], sizes = [8, 384], strides = [1, 1]} : vector<8x512xf32> to vector<8x384xf32>
    %15 = arith.negf %14 : vector<8x384xf32>
    %16 = math.exp %15 : vector<8x384xf32>
    %cst_15 = arith.constant 1.000000e+00 : f32
    %17 = vector.broadcast %cst_15 : f32 to vector<8x384xf32>
    %18 = arith.addf %17, %16 : vector<8x384xf32>
    %19 = arith.divf %17, %18 : vector<8x384xf32>
    %20 = vector.extract_strided_slice %19 {offsets = [0, 0], sizes = [8, 128], strides = [1, 1]} : vector<8x384xf32> to vector<8x128xf32>
    %21 = vector.extract_strided_slice %19 {offsets = [0, 128], sizes = [8, 128], strides = [1, 1]} : vector<8x384xf32> to vector<8x128xf32>
    %22 = vector.extract_strided_slice %19 {offsets = [0, 256], sizes = [8, 128], strides = [1, 1]} : vector<8x384xf32> to vector<8x128xf32>
    %23 = vector.extract_strided_slice %13 {offsets = [0, 384], sizes = [8, 128], strides = [1, 1]} : vector<8x512xf32> to vector<8x128xf32>
    %24 = math.tanh %23 : vector<8x128xf32>
    %25 = arith.mulf %21, %12 : vector<8x128xf32>
    %26 = arith.mulf %20, %24 : vector<8x128xf32>
    %27 = arith.addf %25, %26 : vector<8x128xf32>
    %28 = math.tanh %27 : vector<8x128xf32>
    %29 = arith.mulf %22, %28 : vector<8x128xf32>
    %30 = tpu.concatenate %29, %12 in 1 : vector<8x128xf32>, vector<8x128xf32> -> vector<8x256xf32>
    %cst_16 = arith.constant dense<0.000000e+00> : vector<8x1024xf32>
    %31 = tpu.matmul %30, %8, %cst_16 {dimension_numbers = #tpu.dot_dimension_numbers<[1], [0], [0], [1], [0, 0, 1, 1], [], []>} : vector<8x256xf32>, vector<256x1024xf32>, vector<8x1024xf32> -> vector<8x1024xf32>
    %32 = vector.extract_strided_slice %31 {offsets = [0, 0], sizes = [8, 512], strides = [1, 1]} : vector<8x1024xf32> to vector<8x512xf32>
    %33 = arith.addf %32, %11 : vector<8x512xf32>
    %34 = vector.extract_strided_slice %33 {offsets = [0, 0], sizes = [8, 384], strides = [1, 1]} : vector<8x512xf32> to vector<8x384xf32>
    %35 = arith.negf %34 : vector<8x384xf32>
    %36 = math.exp %35 : vector<8x384xf32>
    %cst_17 = arith.constant 1.000000e+00 : f32
    %37 = vector.broadcast %cst_17 : f32 to vector<8x384xf32>
    %38 = arith.addf %37, %36 : vector<8x384xf32>
    %39 = arith.divf %37, %38 : vector<8x384xf32>
    %40 = vector.extract_strided_slice %39 {offsets = [0, 0], sizes = [8, 128], strides = [1, 1]} : vector<8x384xf32> to vector<8x128xf32>
    %41 = vector.extract_strided_slice %39 {offsets = [0, 128], sizes = [8, 128], strides = [1, 1]} : vector<8x384xf32> to vector<8x128xf32>
    %42 = vector.extract_strided_slice %39 {offsets = [0, 256], sizes = [8, 128], strides = [1, 1]} : vector<8x384xf32> to vector<8x128xf32>
    %43 = vector.extract_strided_slice %33 {offsets = [0, 384], sizes = [8, 128], strides = [1, 1]} : vector<8x512xf32> to vector<8x128xf32>
    %44 = math.tanh %43 : vector<8x128xf32>
    %45 = arith.mulf %41, %12 : vector<8x128xf32>
    %46 = arith.mulf %40, %44 : vector<8x128xf32>
    %47 = arith.addf %45, %46 : vector<8x128xf32>
    %48 = math.tanh %47 : vector<8x128xf32>
    %49 = arith.mulf %42, %48 : vector<8x128xf32>
    %50 = vector.extract_strided_slice %31 {offsets = [0, 512], sizes = [8, 512], strides = [1, 1]} : vector<8x1024xf32> to vector<8x512xf32>
    %c8 = arith.constant 8 : index
    %c0_18 = arith.constant 0 : index
    %51 = vector.load %arg9[%c8, %c0_18] : memref<64x512xf32, #tpu.memory_space<vmem>>, vector<8x512xf32>
    %52 = arith.addf %50, %51 : vector<8x512xf32>
    %53 = vector.extract_strided_slice %52 {offsets = [0, 0], sizes = [8, 384], strides = [1, 1]} : vector<8x512xf32> to vector<8x384xf32>
    %54 = arith.negf %53 : vector<8x384xf32>
    %55 = math.exp %54 : vector<8x384xf32>
    %cst_19 = arith.constant 1.000000e+00 : f32
    %56 = vector.broadcast %cst_19 : f32 to vector<8x384xf32>
    %57 = arith.addf %56, %55 : vector<8x384xf32>
    %58 = arith.divf %56, %57 : vector<8x384xf32>
    %59 = vector.extract_strided_slice %58 {offsets = [0, 0], sizes = [8, 128], strides = [1, 1]} : vector<8x384xf32> to vector<8x128xf32>
    %60 = vector.extract_strided_slice %58 {offsets = [0, 128], sizes = [8, 128], strides = [1, 1]} : vector<8x384xf32> to vector<8x128xf32>
    %61 = vector.extract_strided_slice %58 {offsets = [0, 256], sizes = [8, 128], strides = [1, 1]} : vector<8x384xf32> to vector<8x128xf32>
    %62 = vector.extract_strided_slice %52 {offsets = [0, 384], sizes = [8, 128], strides = [1, 1]} : vector<8x512xf32> to vector<8x128xf32>
    %63 = math.tanh %62 : vector<8x128xf32>
    %64 = arith.mulf %60, %27 : vector<8x128xf32>
    %65 = arith.mulf %59, %63 : vector<8x128xf32>
    %66 = arith.addf %64, %65 : vector<8x128xf32>
    %67 = math.tanh %66 : vector<8x128xf32>
    %68 = arith.mulf %61, %67 : vector<8x128xf32>
    %69 = tpu.concatenate %68, %49 in 1 : vector<8x128xf32>, vector<8x128xf32> -> vector<8x256xf32>
    %cst_20 = arith.constant dense<0.000000e+00> : vector<8x1024xf32>
    %70 = tpu.matmul %69, %8, %cst_20 {dimension_numbers = #tpu.dot_dimension_numbers<[1], [0], [0], [1], [0, 0, 1, 1], [], []>} : vector<8x256xf32>, vector<256x1024xf32>, vector<8x1024xf32> -> vector<8x1024xf32>
    %71 = vector.extract_strided_slice %70 {offsets = [0, 0], sizes = [8, 512], strides = [1, 1]} : vector<8x1024xf32> to vector<8x512xf32>
    %72 = arith.addf %71, %11 : vector<8x512xf32>
    %73 = vector.extract_strided_slice %72 {offsets = [0, 0], sizes = [8, 384], strides = [1, 1]} : vector<8x512xf32> to vector<8x384xf32>
    %74 = arith.negf %73 : vector<8x384xf32>
    %75 = math.exp %74 : vector<8x384xf32>
    %cst_21 = arith.constant 1.000000e+00 : f32
    %76 = vector.broadcast %cst_21 : f32 to vector<8x384xf32>
    %77 = arith.addf %76, %75 : vector<8x384xf32>
    %78 = arith.divf %76, %77 : vector<8x384xf32>
    %79 = vector.extract_strided_slice %78 {offsets = [0, 0], sizes = [8, 128], strides = [1, 1]} : vector<8x384xf32> to vector<8x128xf32>
    %80 = vector.extract_strided_slice %78 {offsets = [0, 128], sizes = [8, 128], strides = [1, 1]} : vector<8x384xf32> to vector<8x128xf32>
    %81 = vector.extract_strided_slice %78 {offsets = [0, 256], sizes = [8, 128], strides = [1, 1]} : vector<8x384xf32> to vector<8x128xf32>
    %82 = vector.extract_strided_slice %72 {offsets = [0, 384], sizes = [8, 128], strides = [1, 1]} : vector<8x512xf32> to vector<8x128xf32>
    %83 = math.tanh %82 : vector<8x128xf32>
    %84 = arith.mulf %80, %47 : vector<8x128xf32>
    %85 = arith.mulf %79, %83 : vector<8x128xf32>
    %86 = arith.addf %84, %85 : vector<8x128xf32>
    %87 = math.tanh %86 : vector<8x128xf32>
    %88 = arith.mulf %81, %87 : vector<8x128xf32>
    %89 = vector.extract_strided_slice %70 {offsets = [0, 512], sizes = [8, 512], strides = [1, 1]} : vector<8x1024xf32> to vector<8x512xf32>
    %c16 = arith.constant 16 : index
    %c0_22 = arith.constant 0 : index
    %90 = vector.load %arg9[%c16, %c0_22] : memref<64x512xf32, #tpu.memory_space<vmem>>, vector<8x512xf32>
    %91 = arith.addf %89, %90 : vector<8x512xf32>
    %92 = vector.extract_strided_slice %91 {offsets = [0, 0], sizes = [8, 384], strides = [1, 1]} : vector<8x512xf32> to vector<8x384xf32>
    %93 = arith.negf %92 : vector<8x384xf32>
    %94 = math.exp %93 : vector<8x384xf32>
    %cst_23 = arith.constant 1.000000e+00 : f32
    %95 = vector.broadcast %cst_23 : f32 to vector<8x384xf32>
    %96 = arith.addf %95, %94 : vector<8x384xf32>
    %97 = arith.divf %95, %96 : vector<8x384xf32>
    %98 = vector.extract_strided_slice %97 {offsets = [0, 0], sizes = [8, 128], strides = [1, 1]} : vector<8x384xf32> to vector<8x128xf32>
    %99 = vector.extract_strided_slice %97 {offsets = [0, 128], sizes = [8, 128], strides = [1, 1]} : vector<8x384xf32> to vector<8x128xf32>
    %100 = vector.extract_strided_slice %97 {offsets = [0, 256], sizes = [8, 128], strides = [1, 1]} : vector<8x384xf32> to vector<8x128xf32>
    %101 = vector.extract_strided_slice %91 {offsets = [0, 384], sizes = [8, 128], strides = [1, 1]} : vector<8x512xf32> to vector<8x128xf32>
    %102 = math.tanh %101 : vector<8x128xf32>
    %103 = arith.mulf %99, %66 : vector<8x128xf32>
    %104 = arith.mulf %98, %102 : vector<8x128xf32>
    %105 = arith.addf %103, %104 : vector<8x128xf32>
    %106 = math.tanh %105 : vector<8x128xf32>
    %107 = arith.mulf %100, %106 : vector<8x128xf32>
    %108 = tpu.concatenate %107, %88 in 1 : vector<8x128xf32>, vector<8x128xf32> -> vector<8x256xf32>
    %cst_24 = arith.constant dense<0.000000e+00> : vector<8x1024xf32>
    %109 = tpu.matmul %108, %8, %cst_24 {dimension_numbers = #tpu.dot_dimension_numbers<[1], [0], [0], [1], [0, 0, 1, 1], [], []>} : vector<8x256xf32>, vector<256x1024xf32>, vector<8x1024xf32> -> vector<8x1024xf32>
    %110 = vector.extract_strided_slice %109 {offsets = [0, 0], sizes = [8, 512], strides = [1, 1]} : vector<8x1024xf32> to vector<8x512xf32>
    %111 = arith.addf %110, %11 : vector<8x512xf32>
    %112 = vector.extract_strided_slice %111 {offsets = [0, 0], sizes = [8, 384], strides = [1, 1]} : vector<8x512xf32> to vector<8x384xf32>
    %113 = arith.negf %112 : vector<8x384xf32>
    %114 = math.exp %113 : vector<8x384xf32>
    %cst_25 = arith.constant 1.000000e+00 : f32
    %115 = vector.broadcast %cst_25 : f32 to vector<8x384xf32>
    %116 = arith.addf %115, %114 : vector<8x384xf32>
    %117 = arith.divf %115, %116 : vector<8x384xf32>
    %118 = vector.extract_strided_slice %117 {offsets = [0, 0], sizes = [8, 128], strides = [1, 1]} : vector<8x384xf32> to vector<8x128xf32>
    %119 = vector.extract_strided_slice %117 {offsets = [0, 128], sizes = [8, 128], strides = [1, 1]} : vector<8x384xf32> to vector<8x128xf32>
    %120 = vector.extract_strided_slice %117 {offsets = [0, 256], sizes = [8, 128], strides = [1, 1]} : vector<8x384xf32> to vector<8x128xf32>
    %121 = vector.extract_strided_slice %111 {offsets = [0, 384], sizes = [8, 128], strides = [1, 1]} : vector<8x512xf32> to vector<8x128xf32>
    %122 = math.tanh %121 : vector<8x128xf32>
    %123 = arith.mulf %119, %86 : vector<8x128xf32>
    %124 = arith.mulf %118, %122 : vector<8x128xf32>
    %125 = arith.addf %123, %124 : vector<8x128xf32>
    %126 = math.tanh %125 : vector<8x128xf32>
    %127 = arith.mulf %120, %126 : vector<8x128xf32>
    %128 = vector.extract_strided_slice %109 {offsets = [0, 512], sizes = [8, 512], strides = [1, 1]} : vector<8x1024xf32> to vector<8x512xf32>
    %c24 = arith.constant 24 : index
    %c0_26 = arith.constant 0 : index
    %129 = vector.load %arg9[%c24, %c0_26] : memref<64x512xf32, #tpu.memory_space<vmem>>, vector<8x512xf32>
    %130 = arith.addf %128, %129 : vector<8x512xf32>
    %131 = vector.extract_strided_slice %130 {offsets = [0, 0], sizes = [8, 384], strides = [1, 1]} : vector<8x512xf32> to vector<8x384xf32>
    %132 = arith.negf %131 : vector<8x384xf32>
    %133 = math.exp %132 : vector<8x384xf32>
    %cst_27 = arith.constant 1.000000e+00 : f32
    %134 = vector.broadcast %cst_27 : f32 to vector<8x384xf32>
    %135 = arith.addf %134, %133 : vector<8x384xf32>
    %136 = arith.divf %134, %135 : vector<8x384xf32>
    %137 = vector.extract_strided_slice %136 {offsets = [0, 0], sizes = [8, 128], strides = [1, 1]} : vector<8x384xf32> to vector<8x128xf32>
    %138 = vector.extract_strided_slice %136 {offsets = [0, 128], sizes = [8, 128], strides = [1, 1]} : vector<8x384xf32> to vector<8x128xf32>
    %139 = vector.extract_strided_slice %136 {offsets = [0, 256], sizes = [8, 128], strides = [1, 1]} : vector<8x384xf32> to vector<8x128xf32>
    %140 = vector.extract_strided_slice %130 {offsets = [0, 384], sizes = [8, 128], strides = [1, 1]} : vector<8x512xf32> to vector<8x128xf32>
    %141 = math.tanh %140 : vector<8x128xf32>
    %142 = arith.mulf %138, %105 : vector<8x128xf32>
    %143 = arith.mulf %137, %141 : vector<8x128xf32>
    %144 = arith.addf %142, %143 : vector<8x128xf32>
    %145 = math.tanh %144 : vector<8x128xf32>
    %146 = arith.mulf %139, %145 : vector<8x128xf32>
    %147 = tpu.concatenate %146, %127 in 1 : vector<8x128xf32>, vector<8x128xf32> -> vector<8x256xf32>
    %cst_28 = arith.constant dense<0.000000e+00> : vector<8x1024xf32>
    %148 = tpu.matmul %147, %8, %cst_28 {dimension_numbers = #tpu.dot_dimension_numbers<[1], [0], [0], [1], [0, 0, 1, 1], [], []>} : vector<8x256xf32>, vector<256x1024xf32>, vector<8x1024xf32> -> vector<8x1024xf32>
    %149 = vector.extract_strided_slice %148 {offsets = [0, 0], sizes = [8, 512], strides = [1, 1]} : vector<8x1024xf32> to vector<8x512xf32>
    %150 = arith.addf %149, %11 : vector<8x512xf32>
    %151 = vector.extract_strided_slice %150 {offsets = [0, 0], sizes = [8, 384], strides = [1, 1]} : vector<8x512xf32> to vector<8x384xf32>
    %152 = arith.negf %151 : vector<8x384xf32>
    %153 = math.exp %152 : vector<8x384xf32>
    %cst_29 = arith.constant 1.000000e+00 : f32
    %154 = vector.broadcast %cst_29 : f32 to vector<8x384xf32>
    %155 = arith.addf %154, %153 : vector<8x384xf32>
    %156 = arith.divf %154, %155 : vector<8x384xf32>
    %157 = vector.extract_strided_slice %156 {offsets = [0, 0], sizes = [8, 128], strides = [1, 1]} : vector<8x384xf32> to vector<8x128xf32>
    %158 = vector.extract_strided_slice %156 {offsets = [0, 128], sizes = [8, 128], strides = [1, 1]} : vector<8x384xf32> to vector<8x128xf32>
    %159 = vector.extract_strided_slice %156 {offsets = [0, 256], sizes = [8, 128], strides = [1, 1]} : vector<8x384xf32> to vector<8x128xf32>
    %160 = vector.extract_strided_slice %150 {offsets = [0, 384], sizes = [8, 128], strides = [1, 1]} : vector<8x512xf32> to vector<8x128xf32>
    %161 = math.tanh %160 : vector<8x128xf32>
    %162 = arith.mulf %158, %125 : vector<8x128xf32>
    %163 = arith.mulf %157, %161 : vector<8x128xf32>
    %164 = arith.addf %162, %163 : vector<8x128xf32>
    %165 = math.tanh %164 : vector<8x128xf32>
    %166 = arith.mulf %159, %165 : vector<8x128xf32>
    %167 = vector.extract_strided_slice %148 {offsets = [0, 512], sizes = [8, 512], strides = [1, 1]} : vector<8x1024xf32> to vector<8x512xf32>
    %c32 = arith.constant 32 : index
    %c0_30 = arith.constant 0 : index
    %168 = vector.load %arg9[%c32, %c0_30] : memref<64x512xf32, #tpu.memory_space<vmem>>, vector<8x512xf32>
    %169 = arith.addf %167, %168 : vector<8x512xf32>
    %170 = vector.extract_strided_slice %169 {offsets = [0, 0], sizes = [8, 384], strides = [1, 1]} : vector<8x512xf32> to vector<8x384xf32>
    %171 = arith.negf %170 : vector<8x384xf32>
    %172 = math.exp %171 : vector<8x384xf32>
    %cst_31 = arith.constant 1.000000e+00 : f32
    %173 = vector.broadcast %cst_31 : f32 to vector<8x384xf32>
    %174 = arith.addf %173, %172 : vector<8x384xf32>
    %175 = arith.divf %173, %174 : vector<8x384xf32>
    %176 = vector.extract_strided_slice %175 {offsets = [0, 0], sizes = [8, 128], strides = [1, 1]} : vector<8x384xf32> to vector<8x128xf32>
    %177 = vector.extract_strided_slice %175 {offsets = [0, 128], sizes = [8, 128], strides = [1, 1]} : vector<8x384xf32> to vector<8x128xf32>
    %178 = vector.extract_strided_slice %175 {offsets = [0, 256], sizes = [8, 128], strides = [1, 1]} : vector<8x384xf32> to vector<8x128xf32>
    %179 = vector.extract_strided_slice %169 {offsets = [0, 384], sizes = [8, 128], strides = [1, 1]} : vector<8x512xf32> to vector<8x128xf32>
    %180 = math.tanh %179 : vector<8x128xf32>
    %181 = arith.mulf %177, %144 : vector<8x128xf32>
    %182 = arith.mulf %176, %180 : vector<8x128xf32>
    %183 = arith.addf %181, %182 : vector<8x128xf32>
    %184 = math.tanh %183 : vector<8x128xf32>
    %185 = arith.mulf %178, %184 : vector<8x128xf32>
    %186 = tpu.concatenate %185, %166 in 1 : vector<8x128xf32>, vector<8x128xf32> -> vector<8x256xf32>
    %cst_32 = arith.constant dense<0.000000e+00> : vector<8x1024xf32>
    %187 = tpu.matmul %186, %8, %cst_32 {dimension_numbers = #tpu.dot_dimension_numbers<[1], [0], [0], [1], [0, 0, 1, 1], [], []>} : vector<8x256xf32>, vector<256x1024xf32>, vector<8x1024xf32> -> vector<8x1024xf32>
    %188 = vector.extract_strided_slice %187 {offsets = [0, 0], sizes = [8, 512], strides = [1, 1]} : vector<8x1024xf32> to vector<8x512xf32>
    %189 = arith.addf %188, %11 : vector<8x512xf32>
    %190 = vector.extract_strided_slice %189 {offsets = [0, 0], sizes = [8, 384], strides = [1, 1]} : vector<8x512xf32> to vector<8x384xf32>
    %191 = arith.negf %190 : vector<8x384xf32>
    %192 = math.exp %191 : vector<8x384xf32>
    %cst_33 = arith.constant 1.000000e+00 : f32
    %193 = vector.broadcast %cst_33 : f32 to vector<8x384xf32>
    %194 = arith.addf %193, %192 : vector<8x384xf32>
    %195 = arith.divf %193, %194 : vector<8x384xf32>
    %196 = vector.extract_strided_slice %195 {offsets = [0, 0], sizes = [8, 128], strides = [1, 1]} : vector<8x384xf32> to vector<8x128xf32>
    %197 = vector.extract_strided_slice %195 {offsets = [0, 128], sizes = [8, 128], strides = [1, 1]} : vector<8x384xf32> to vector<8x128xf32>
    %198 = vector.extract_strided_slice %195 {offsets = [0, 256], sizes = [8, 128], strides = [1, 1]} : vector<8x384xf32> to vector<8x128xf32>
    %199 = vector.extract_strided_slice %189 {offsets = [0, 384], sizes = [8, 128], strides = [1, 1]} : vector<8x512xf32> to vector<8x128xf32>
    %200 = math.tanh %199 : vector<8x128xf32>
    %201 = arith.mulf %197, %164 : vector<8x128xf32>
    %202 = arith.mulf %196, %200 : vector<8x128xf32>
    %203 = arith.addf %201, %202 : vector<8x128xf32>
    %204 = math.tanh %203 : vector<8x128xf32>
    %205 = arith.mulf %198, %204 : vector<8x128xf32>
    %206 = vector.extract_strided_slice %187 {offsets = [0, 512], sizes = [8, 512], strides = [1, 1]} : vector<8x1024xf32> to vector<8x512xf32>
    %c40 = arith.constant 40 : index
    %c0_34 = arith.constant 0 : index
    %207 = vector.load %arg9[%c40, %c0_34] : memref<64x512xf32, #tpu.memory_space<vmem>>, vector<8x512xf32>
    %208 = arith.addf %206, %207 : vector<8x512xf32>
    %209 = vector.extract_strided_slice %208 {offsets = [0, 0], sizes = [8, 384], strides = [1, 1]} : vector<8x512xf32> to vector<8x384xf32>
    %210 = arith.negf %209 : vector<8x384xf32>
    %211 = math.exp %210 : vector<8x384xf32>
    %cst_35 = arith.constant 1.000000e+00 : f32
    %212 = vector.broadcast %cst_35 : f32 to vector<8x384xf32>
    %213 = arith.addf %212, %211 : vector<8x384xf32>
    %214 = arith.divf %212, %213 : vector<8x384xf32>
    %215 = vector.extract_strided_slice %214 {offsets = [0, 0], sizes = [8, 128], strides = [1, 1]} : vector<8x384xf32> to vector<8x128xf32>
    %216 = vector.extract_strided_slice %214 {offsets = [0, 128], sizes = [8, 128], strides = [1, 1]} : vector<8x384xf32> to vector<8x128xf32>
    %217 = vector.extract_strided_slice %214 {offsets = [0, 256], sizes = [8, 128], strides = [1, 1]} : vector<8x384xf32> to vector<8x128xf32>
    %218 = vector.extract_strided_slice %208 {offsets = [0, 384], sizes = [8, 128], strides = [1, 1]} : vector<8x512xf32> to vector<8x128xf32>
    %219 = math.tanh %218 : vector<8x128xf32>
    %220 = arith.mulf %216, %183 : vector<8x128xf32>
    %221 = arith.mulf %215, %219 : vector<8x128xf32>
    %222 = arith.addf %220, %221 : vector<8x128xf32>
    %223 = math.tanh %222 : vector<8x128xf32>
    %224 = arith.mulf %217, %223 : vector<8x128xf32>
    %225 = tpu.concatenate %224, %205 in 1 : vector<8x128xf32>, vector<8x128xf32> -> vector<8x256xf32>
    %cst_36 = arith.constant dense<0.000000e+00> : vector<8x1024xf32>
    %226 = tpu.matmul %225, %8, %cst_36 {dimension_numbers = #tpu.dot_dimension_numbers<[1], [0], [0], [1], [0, 0, 1, 1], [], []>} : vector<8x256xf32>, vector<256x1024xf32>, vector<8x1024xf32> -> vector<8x1024xf32>
    %227 = vector.extract_strided_slice %226 {offsets = [0, 0], sizes = [8, 512], strides = [1, 1]} : vector<8x1024xf32> to vector<8x512xf32>
    %228 = arith.addf %227, %11 : vector<8x512xf32>
    %229 = vector.extract_strided_slice %228 {offsets = [0, 0], sizes = [8, 384], strides = [1, 1]} : vector<8x512xf32> to vector<8x384xf32>
    %230 = arith.negf %229 : vector<8x384xf32>
    %231 = math.exp %230 : vector<8x384xf32>
    %cst_37 = arith.constant 1.000000e+00 : f32
    %232 = vector.broadcast %cst_37 : f32 to vector<8x384xf32>
    %233 = arith.addf %232, %231 : vector<8x384xf32>
    %234 = arith.divf %232, %233 : vector<8x384xf32>
    %235 = vector.extract_strided_slice %234 {offsets = [0, 0], sizes = [8, 128], strides = [1, 1]} : vector<8x384xf32> to vector<8x128xf32>
    %236 = vector.extract_strided_slice %234 {offsets = [0, 128], sizes = [8, 128], strides = [1, 1]} : vector<8x384xf32> to vector<8x128xf32>
    %237 = vector.extract_strided_slice %234 {offsets = [0, 256], sizes = [8, 128], strides = [1, 1]} : vector<8x384xf32> to vector<8x128xf32>
    %238 = vector.extract_strided_slice %228 {offsets = [0, 384], sizes = [8, 128], strides = [1, 1]} : vector<8x512xf32> to vector<8x128xf32>
    %239 = math.tanh %238 : vector<8x128xf32>
    %240 = arith.mulf %236, %203 : vector<8x128xf32>
    %241 = arith.mulf %235, %239 : vector<8x128xf32>
    %242 = arith.addf %240, %241 : vector<8x128xf32>
    %243 = math.tanh %242 : vector<8x128xf32>
    %244 = arith.mulf %237, %243 : vector<8x128xf32>
    %245 = vector.extract_strided_slice %226 {offsets = [0, 512], sizes = [8, 512], strides = [1, 1]} : vector<8x1024xf32> to vector<8x512xf32>
    %c48 = arith.constant 48 : index
    %c0_38 = arith.constant 0 : index
    %246 = vector.load %arg9[%c48, %c0_38] : memref<64x512xf32, #tpu.memory_space<vmem>>, vector<8x512xf32>
    %247 = arith.addf %245, %246 : vector<8x512xf32>
    %248 = vector.extract_strided_slice %247 {offsets = [0, 0], sizes = [8, 384], strides = [1, 1]} : vector<8x512xf32> to vector<8x384xf32>
    %249 = arith.negf %248 : vector<8x384xf32>
    %250 = math.exp %249 : vector<8x384xf32>
    %cst_39 = arith.constant 1.000000e+00 : f32
    %251 = vector.broadcast %cst_39 : f32 to vector<8x384xf32>
    %252 = arith.addf %251, %250 : vector<8x384xf32>
    %253 = arith.divf %251, %252 : vector<8x384xf32>
    %254 = vector.extract_strided_slice %253 {offsets = [0, 0], sizes = [8, 128], strides = [1, 1]} : vector<8x384xf32> to vector<8x128xf32>
    %255 = vector.extract_strided_slice %253 {offsets = [0, 128], sizes = [8, 128], strides = [1, 1]} : vector<8x384xf32> to vector<8x128xf32>
    %256 = vector.extract_strided_slice %253 {offsets = [0, 256], sizes = [8, 128], strides = [1, 1]} : vector<8x384xf32> to vector<8x128xf32>
    %257 = vector.extract_strided_slice %247 {offsets = [0, 384], sizes = [8, 128], strides = [1, 1]} : vector<8x512xf32> to vector<8x128xf32>
    %258 = math.tanh %257 : vector<8x128xf32>
    %259 = arith.mulf %255, %222 : vector<8x128xf32>
    %260 = arith.mulf %254, %258 : vector<8x128xf32>
    %261 = arith.addf %259, %260 : vector<8x128xf32>
    %262 = math.tanh %261 : vector<8x128xf32>
    %263 = arith.mulf %256, %262 : vector<8x128xf32>
    %264 = tpu.concatenate %263, %244 in 1 : vector<8x128xf32>, vector<8x128xf32> -> vector<8x256xf32>
    %cst_40 = arith.constant dense<0.000000e+00> : vector<8x1024xf32>
    %265 = tpu.matmul %264, %8, %cst_40 {dimension_numbers = #tpu.dot_dimension_numbers<[1], [0], [0], [1], [0, 0, 1, 1], [], []>} : vector<8x256xf32>, vector<256x1024xf32>, vector<8x1024xf32> -> vector<8x1024xf32>
    %266 = vector.extract_strided_slice %265 {offsets = [0, 0], sizes = [8, 512], strides = [1, 1]} : vector<8x1024xf32> to vector<8x512xf32>
    %267 = arith.addf %266, %11 : vector<8x512xf32>
    %268 = vector.extract_strided_slice %267 {offsets = [0, 0], sizes = [8, 384], strides = [1, 1]} : vector<8x512xf32> to vector<8x384xf32>
    %269 = arith.negf %268 : vector<8x384xf32>
    %270 = math.exp %269 : vector<8x384xf32>
    %cst_41 = arith.constant 1.000000e+00 : f32
    %271 = vector.broadcast %cst_41 : f32 to vector<8x384xf32>
    %272 = arith.addf %271, %270 : vector<8x384xf32>
    %273 = arith.divf %271, %272 : vector<8x384xf32>
    %274 = vector.extract_strided_slice %273 {offsets = [0, 0], sizes = [8, 128], strides = [1, 1]} : vector<8x384xf32> to vector<8x128xf32>
    %275 = vector.extract_strided_slice %273 {offsets = [0, 128], sizes = [8, 128], strides = [1, 1]} : vector<8x384xf32> to vector<8x128xf32>
    %276 = vector.extract_strided_slice %273 {offsets = [0, 256], sizes = [8, 128], strides = [1, 1]} : vector<8x384xf32> to vector<8x128xf32>
    %277 = vector.extract_strided_slice %267 {offsets = [0, 384], sizes = [8, 128], strides = [1, 1]} : vector<8x512xf32> to vector<8x128xf32>
    %278 = math.tanh %277 : vector<8x128xf32>
    %279 = arith.mulf %275, %242 : vector<8x128xf32>
    %280 = arith.mulf %274, %278 : vector<8x128xf32>
    %281 = arith.addf %279, %280 : vector<8x128xf32>
    %282 = math.tanh %281 : vector<8x128xf32>
    %283 = arith.mulf %276, %282 : vector<8x128xf32>
    %284 = vector.extract_strided_slice %265 {offsets = [0, 512], sizes = [8, 512], strides = [1, 1]} : vector<8x1024xf32> to vector<8x512xf32>
    %c56 = arith.constant 56 : index
    %c0_42 = arith.constant 0 : index
    %285 = vector.load %arg9[%c56, %c0_42] : memref<64x512xf32, #tpu.memory_space<vmem>>, vector<8x512xf32>
    %286 = arith.addf %284, %285 : vector<8x512xf32>
    %287 = vector.extract_strided_slice %286 {offsets = [0, 0], sizes = [8, 384], strides = [1, 1]} : vector<8x512xf32> to vector<8x384xf32>
    %288 = arith.negf %287 : vector<8x384xf32>
    %289 = math.exp %288 : vector<8x384xf32>
    %cst_43 = arith.constant 1.000000e+00 : f32
    %290 = vector.broadcast %cst_43 : f32 to vector<8x384xf32>
    %291 = arith.addf %290, %289 : vector<8x384xf32>
    %292 = arith.divf %290, %291 : vector<8x384xf32>
    %293 = vector.extract_strided_slice %292 {offsets = [0, 0], sizes = [8, 128], strides = [1, 1]} : vector<8x384xf32> to vector<8x128xf32>
    %294 = vector.extract_strided_slice %292 {offsets = [0, 128], sizes = [8, 128], strides = [1, 1]} : vector<8x384xf32> to vector<8x128xf32>
    %295 = vector.extract_strided_slice %292 {offsets = [0, 256], sizes = [8, 128], strides = [1, 1]} : vector<8x384xf32> to vector<8x128xf32>
    %296 = vector.extract_strided_slice %286 {offsets = [0, 384], sizes = [8, 128], strides = [1, 1]} : vector<8x512xf32> to vector<8x128xf32>
    %297 = math.tanh %296 : vector<8x128xf32>
    %298 = arith.mulf %294, %261 : vector<8x128xf32>
    %299 = arith.mulf %293, %297 : vector<8x128xf32>
    %300 = arith.addf %298, %299 : vector<8x128xf32>
    %301 = math.tanh %300 : vector<8x128xf32>
    %302 = arith.mulf %295, %301 : vector<8x128xf32>
    %303 = tpu.concatenate %302, %283 in 1 : vector<8x128xf32>, vector<8x128xf32> -> vector<8x256xf32>
    %cst_44 = arith.constant dense<0.000000e+00> : vector<8x1024xf32>
    %304 = tpu.matmul %303, %8, %cst_44 {dimension_numbers = #tpu.dot_dimension_numbers<[1], [0], [0], [1], [0, 0, 1, 1], [], []>} : vector<8x256xf32>, vector<256x1024xf32>, vector<8x1024xf32> -> vector<8x1024xf32>
    %305 = vector.extract_strided_slice %304 {offsets = [0, 0], sizes = [8, 512], strides = [1, 1]} : vector<8x1024xf32> to vector<8x512xf32>
    %306 = arith.addf %305, %11 : vector<8x512xf32>
    %307 = vector.extract_strided_slice %306 {offsets = [0, 0], sizes = [8, 384], strides = [1, 1]} : vector<8x512xf32> to vector<8x384xf32>
    %308 = arith.negf %307 : vector<8x384xf32>
    %309 = math.exp %308 : vector<8x384xf32>
    %cst_45 = arith.constant 1.000000e+00 : f32
    %310 = vector.broadcast %cst_45 : f32 to vector<8x384xf32>
    %311 = arith.addf %310, %309 : vector<8x384xf32>
    %312 = arith.divf %310, %311 : vector<8x384xf32>
    %313 = vector.extract_strided_slice %312 {offsets = [0, 0], sizes = [8, 128], strides = [1, 1]} : vector<8x384xf32> to vector<8x128xf32>
    %314 = vector.extract_strided_slice %312 {offsets = [0, 128], sizes = [8, 128], strides = [1, 1]} : vector<8x384xf32> to vector<8x128xf32>
    %315 = vector.extract_strided_slice %312 {offsets = [0, 256], sizes = [8, 128], strides = [1, 1]} : vector<8x384xf32> to vector<8x128xf32>
    %316 = vector.extract_strided_slice %306 {offsets = [0, 384], sizes = [8, 128], strides = [1, 1]} : vector<8x512xf32> to vector<8x128xf32>
    %317 = math.tanh %316 : vector<8x128xf32>
    %318 = arith.mulf %314, %281 : vector<8x128xf32>
    %319 = arith.mulf %313, %317 : vector<8x128xf32>
    %320 = arith.addf %318, %319 : vector<8x128xf32>
    %321 = math.tanh %320 : vector<8x128xf32>
    %322 = arith.mulf %315, %321 : vector<8x128xf32>
    %c0_46 = arith.constant 0 : index
    %c0_47 = arith.constant 0 : index
    %323 = vector.load %arg6[%c0_46, %c0_47] : memref<1x128xf32, #tpu.memory_space<vmem>>, vector<1x128xf32>
    %324 = vector.broadcast %323 : vector<1x128xf32> to vector<8x128xf32>
    %325 = arith.mulf %322, %324 : vector<8x128xf32>
    %cst_48 = arith.constant dense<0.000000e+00> : vector<8xf32>
    %326 = vector.multi_reduction <add>, %325, %cst_48 [1] : vector<8x128xf32> to vector<8xf32>
    %327 = vector.shape_cast %326 : vector<8xf32> to vector<8x1xf32>
    %c0_49 = arith.constant 0 : index
    %c0_50 = arith.constant 0 : index
    %328 = vector.load %arg7[%c0_49, %c0_50] : memref<1x1xf32, #tpu.memory_space<vmem>>, vector<1x1xf32>
    %329 = vector.broadcast %328 : vector<1x1xf32> to vector<8x1xf32>
    %330 = arith.addf %327, %329 : vector<8x1xf32>
    %c0_51 = arith.constant 0 : index
    %c0_52 = arith.constant 0 : index
    %331 = vector.load %arg8[%c0_51, %c0_52] : memref<8x1xf32, #tpu.memory_space<vmem>>, vector<8x1xf32>
    tpu.vector_store %arg8[%c0_51, %c0_52], %330 {strides = array<i32>} : memref<8x1xf32, #tpu.memory_space<vmem>>, vector<8x1xf32>,
    return
  }
  func.func @transform_0(%arg0: i32) -> (i32, i32, i32) {
    %c0_i32 = arith.constant 0 : i32
    %c0_i32_0 = arith.constant 0 : i32
    %c0_i32_1 = arith.constant 0 : i32
    return %c0_i32, %arg0, %c0_i32_0 : i32, i32, i32
  }
  func.func @transform_1(%arg0: i32) -> (i32, i32) {
    %c0_i32 = arith.constant 0 : i32
    %c0_i32_0 = arith.constant 0 : i32
    %c0_i32_1 = arith.constant 0 : i32
    return %c0_i32, %c0_i32_0 : i32, i32
  }
  func.func @transform_2(%arg0: i32) -> (i32, i32) {
    %c0_i32 = arith.constant 0 : i32
    %c0_i32_0 = arith.constant 0 : i32
    %c0_i32_1 = arith.constant 0 : i32
    return %c0_i32, %c0_i32_0 : i32, i32
  }
  func.func @transform_3(%arg0: i32) -> (i32, i32) {
    %c0_i32 = arith.constant 0 : i32
    %c0_i32_0 = arith.constant 0 : i32
    %c0_i32_1 = arith.constant 0 : i32
    return %c0_i32, %c0_i32_0 : i32, i32
  }
  func.func @transform_4(%arg0: i32) -> (i32, i32) {
    %c0_i32 = arith.constant 0 : i32
    %c0_i32_0 = arith.constant 0 : i32
    %c0_i32_1 = arith.constant 0 : i32
    return %c0_i32, %c0_i32_0 : i32, i32
  }
  func.func @transform_5(%arg0: i32) -> (i32, i32) {
    %c0_i32 = arith.constant 0 : i32
    %c0_i32_0 = arith.constant 0 : i32
    %c0_i32_1 = arith.constant 0 : i32
    return %c0_i32, %c0_i32_0 : i32, i32
  }
  func.func @transform_6(%arg0: i32) -> (i32, i32) {
    %c0_i32 = arith.constant 0 : i32
    %c0_i32_0 = arith.constant 0 : i32
    %c0_i32_1 = arith.constant 0 : i32
    return %c0_i32, %c0_i32_0 : i32, i32
  }
  func.func @transform_7(%arg0: i32) -> (i32, i32) {
    %c0_i32 = arith.constant 0 : i32
    %c0_i32_0 = arith.constant 0 : i32
    return %arg0, %c0_i32 : i32, i32
  }
}

</mosaic_0001>

<bundles_post_ra>
// kernel: tpu_custom_call.1
= control target key start
LH: loop header
LB: loop body
LE: loop exit
PB: predicated region body
PF: predicated region fallthrough
CT: control target
= control target key end

     0   :  { %s7239_s0 = inlined_call_operand.hbm [shape: f32[8,8,16], index: 0, kind: input, shape index: {}]   ;;  %s7240_s1 = inlined_call_operand.hbm [shape: f32[16,512], index: 1, kind: input, shape index: {}]   ;;  %s7241_s2 = inlined_call_operand.vmem [shape: f32[1,512], index: 2, kind: input, shape index: {}]   ;;  %s7242_s3 = inlined_call_operand.hbm [shape: f32[256,1024], index: 3, kind: input, shape index: {}]   ;;  %s7243_s4 = inlined_call_operand.vmem [shape: f32[1,512], index: 4, kind: input, shape index: {}]   ;;  %s7244_s5 = inlined_call_operand.vmem [shape: f32[1,128], index: 5, kind: input, shape index: {}]   ;;  %s7245_s6 = inlined_call_operand.<no memory space> [shape: f32[1,1], index: 6, kind: input, shape index: {}]   ;;  %s7246_s7 = inlined_call_operand.vmem [shape: f32[8,1], index: 7, kind: output, shape index: {}]  }
   0x1   :  { %v12_v0 = vstv %s7245_s6 }
   0x2   :  { %13 = vst [vmem:[#allocation3] sm:$0x1] %v12_v0 }
   0x3   :  { %14 = vsyncpa [#allocation5], 0 }
   0x4   :  { %15 = vsyncpa [#allocation7], 0  ;;  %s5686_s26 = smov [#allocation6]   ;;  %s5616_s30 = scalar_lea.hbm %s7240_s1, 1024 }
   0x5   :  { %s33_s27 = sshll.u32 %s5686_s26, 4  ;;  %p5617_p0 = scmp.ne.s32.totalorder %s7240_s1, %s5616_s30  ;;  %s34_s27 = int_to_ptr.vmem [resolvable:$true] %s33_s27 }
   0x6   :  { %p5620_p1 = scmp.lt.u32.totalorder %s5616_s30, %s7240_s1 }
   0x8   :  { %p5622_p2 = pnand %p5620_p1, %p5617_p0 }
   0xa   :  { %5625 = shalt.err (!%p5622_p2)
}
   0xb   :  { %s5626_s6 = scalar_lea.vmem %s34_s27, 1024  ;;  %p5631_p4 = scmp.lt.s32.totalorder %s34_s27, %s34_s27 }
   0xc   :  { %p5627_p3 = scmp.ne.s32.totalorder %s34_s27, %s5626_s6  ;;  %p5632_p5 = scmp.lt.s32.totalorder %s5626_s6, %s5626_s6 }
   0xe   :  { %p5633_p6 = por %p5632_p5, %p5631_p4 }
  0x10   :  { %p5634_p7 = pnand %p5633_p6, %p5627_p3 }
  0x12   :  { %5637 = shalt.err (!%p5634_p7)
}
  0x13   :  { %s5687_s12 = smov 512   ;;  %s5688_s13 = smov 32  }
  0x14   :  { %39 = dma.hbm_to_vmem [thread:$0]  %s7240_s1, 1024, %s34_s27, [#allocation7], %s5687_s12, %s5687_s12, %s5688_s13  }
  0x15   :  { %s5689_s16 = smov [#allocation4]   ;;  %s5638_s20 = scalar_lea.hbm %s7239_s0, 1024 }
  0x16   :  { %s21_s17 = sshll.u32 %s5689_s16, 4  ;;  %p5639_p8 = scmp.ne.s32.totalorder %s7239_s0, %s5638_s20  ;;  %s22_s17 = int_to_ptr.vmem [resolvable:$true] %s21_s17 }
  0x17   :  { %p5642_p9 = scmp.lt.u32.totalorder %s5638_s20, %s7239_s0 }
  0x19   :  { %p5644_p10 = pnand %p5642_p9, %p5639_p8 }
  0x1b   :  { %5647 = shalt.err (!%p5644_p10)
}
  0x1c   :  { %s5648_s25 = scalar_lea.vmem %s22_s17, 1024  ;;  %p5653_p12 = scmp.lt.s32.totalorder %s22_s17, %s22_s17 }
  0x1d   :  { %p5649_p11 = scmp.ne.s32.totalorder %s22_s17, %s5648_s25  ;;  %p5654_p13 = scmp.lt.s32.totalorder %s5648_s25, %s5648_s25 }
  0x1f   :  { %p5655_p0 = por %p5654_p13, %p5653_p12 }
  0x21   :  { %p5656_p1 = pnand %p5655_p0, %p5649_p11 }
  0x23   :  { %5659 = shalt.err (!%p5656_p1)
}
  0x24   :  { %s5690_s1 = smov 128   ;;  %s5691_s26 = smov 8  }
  0x25   :  { %27 = dma.hbm_to_vmem [thread:$0]  %s7239_s0, 1024, %s22_s17, [#allocation5], %s5690_s1, %s5690_s1, %s5691_s26  }
  0x26   :  { %s5692_s29 = smov [#allocation8]   ;;  %s5660_s10 = scalar_lea.hbm %s7242_s3, 32768 }
  0x27   :  { %s47_s30 = sshll.u32 %s5692_s29, 4  ;;  %p5661_p2 = scmp.ne.s32.totalorder %s7242_s3, %s5660_s10  ;;  %s48_s30 = int_to_ptr.vmem [resolvable:$true] %s47_s30 }
  0x28   :  { %p5664_p3 = scmp.lt.u32.totalorder %s5660_s10, %s7242_s3 }
  0x2a   :  { %p5666_p4 = pnand %p5664_p3, %p5661_p2 }
  0x2c   :  { %5669 = shalt.err (!%p5666_p4)
}
  0x2d   :  { %s5670_s14 = scalar_lea.vmem %s48_s30, 32768  ;;  %p5675_p6 = scmp.lt.s32.totalorder %s48_s30, %s48_s30 }
  0x2e   :  { %p5671_p5 = scmp.ne.s32.totalorder %s48_s30, %s5670_s14  ;;  %p5676_p7 = scmp.lt.s32.totalorder %s5670_s14, %s5670_s14 }
  0x30   :  { %p5677_p8 = por %p5676_p7, %p5675_p6 }
  0x32   :  { %p5678_p9 = pnand %p5677_p8, %p5671_p5 }
  0x34   :  { %5681 = shalt.err (!%p5678_p9)
}
  0x35   :  { %s5693_s0 = smov 1024   ;;  %s5694_s15 = smov 64  }
  0x36   :  { %53 = dma.hbm_to_vmem [thread:$0]  %s7242_s3, 32768, %s48_s30, [#allocation7], %s5693_s0, %s5693_s0, %s5694_s15  }
  0x37   :  { %5682 = dma.done.wait [#allocation5], 1024  }
  0x38   :  { %5683 = vsyncadd [#allocation5], 4294966272 }
  0x39   :  { %5684 = dma.done.wait [#allocation7], 33792  }
  0x3a   :  { %5685 = vsyncadd [#allocation7], 4294933504  ;;  %v7253_v1 = vmov 0.0   ;;  %v78_v2 = vld [vmem:[#allocation6 + $0x8] sm:$0xff]  ;;  %v77_v4 = vld [vmem:[#allocation6] sm:$0xff]  ;;  %vm107_vm0 = vcmask 130048  }
  0x3b   :  { %196 = vmatprep.mubr.f32.mxu0 %v7253_v1  ;;  %309 = vmatprep.mubr.f32.mxu1 %v7253_v1  ;;  %v82_v3 = vld [vmem:[#allocation6 + $0x28] sm:$0xff]  ;;  %v81_v6 = vld [vmem:[#allocation6 + $0x20] sm:$0xff]  ;;  %v80_v7 = vld [vmem:[#allocation6 + $0x18] sm:$0xff]  ;;  %vm3292_vm1 = vcmask 7168  }
  0x3c   :  { %v3366_v5 = vpack.c.bf16 %v82_v3, %v78_v2  ;;  %v3368_v8 = vpack.c.bf16 %v81_v6, %v77_v4  ;;  %v69_v9 = vld [vmem:[#allocation4] sm:$0xff]  ;;  %v84_v10 = vld [vmem:[#allocation6 + $0x38] sm:$0xff]  ;;  %v79_v11 = vld [vmem:[#allocation6 + $0x10] sm:$0xff] }
  0x3d   :  { %v83_v12 = vld [vmem:[#allocation6 + $0x30] sm:$0xff]  ;;  %v3370_v13 = vpack.c.bf16 %v84_v10, %v80_v7  ;;  %v391_v15 = vld [vmem:[#allocation8 + $0x8] sm:$0xff]  ;;  %v393_v17 = vld [vmem:[#allocation8 + $0x18] sm:$0xff] }
  0x3e   :  { %3367 = vmatprep.subr.bf16.mxu0 %v3366_v5  ;;  %v3372_v14 = vpack.c.bf16 %v83_v12, %v79_v11  ;;  %v399_v16 = vld [vmem:[#allocation8 + $0x48] sm:$0xff]  ;;  %v401_v19 = vld [vmem:[#allocation8 + $0x58] sm:$0xff]  ;;  %v390_v20 = vld [vmem:[#allocation8] sm:$0xff] }
  0x3f   :  { %3369 = vmatpush1.bf16.msra.mxu0 %v3368_v8  ;;  %v5777_v18 = vpack.c.bf16 %v399_v16, %v391_v15  ;;  %v398_v21 = vld [vmem:[#allocation8 + $0x40] sm:$0xff]  ;;  %3371 = vmatprep.subr.bf16.mxu1 %v3370_v13  ;;  %v5779_v22 = vpack.c.bf16 %v401_v19, %v393_v17  ;;  %v392_v24 = vld [vmem:[#allocation8 + $0x10] sm:$0xff]  ;;  %v407_v26 = vld [vmem:[#allocation8 + $0x88] sm:$0xff] }
  0x40   :  { %v5781_v23 = vpack.c.bf16 %v398_v21, %v390_v20  ;;  %v400_v25 = vld [vmem:[#allocation8 + $0x50] sm:$0xff]  ;;  %3373 = vmatpush1.bf16.msra.mxu1 %v3372_v14  ;;  %v415_v28 = vld [vmem:[#allocation8 + $0xc8] sm:$0xff]  ;;  %v409_v29 = vld [vmem:[#allocation8 + $0x98] sm:$0xff] }
  0x41   :  { %7541 = vst [vmem:[#allocation11_spill] sm:$0xff] %v5777_v18  ;;  %7542 = vst [vmem:[#allocation12_spill] sm:$0xff] %v5779_v22  ;;  %3375 = vmatprep.subr.bf16.mxu0 %v5777_v18  ;;  %v5784_v27 = vpack.c.bf16 %v400_v25, %v392_v24  ;;  %v417_v30 = vld [vmem:[#allocation8 + $0xd8] sm:$0xff]  ;;  %3439 = vmatprep.subr.bf16.mxu1 %v5779_v22  ;;  %v5788_v31 = vpack.c.bf16 %v415_v28, %v407_v26  ;;  %v406_v33 = vld [vmem:[#allocation8 + $0x80] sm:$0xff] }
  0x42   :  { %7543 = vst [vmem:[#allocation13_spill] sm:$0xff] %v5781_v23  ;;  %3300 = vmatmul.mubr.msk.f32.vlgmr.msra.gmra.mrb[0].mxu0 %vm107_vm0, %v69_v9  ;;  %v5790_v32 = vpack.c.bf16 %v417_v30, %v409_v29  ;;  %v414_v34 = vld [vmem:[#allocation8 + $0xc0] sm:$0xff]  ;;  %v408_v35 = vld [vmem:[#allocation8 + $0x90] sm:$0xff]  ;;  %v423_v38 = vld [vmem:[#allocation8 + $0x108] sm:$0xff] }
  0x43   :  { %7544 = vst [vmem:[#allocation14_spill] sm:$0xff] %v5784_v27  ;;  %7545 = vst [vmem:[#allocation15_spill] sm:$0xff] %v5788_v31  ;;  %3377 = vmatpush1.bf16.msra.mxu0 %v5781_v23  ;;  %v5793_v36 = vpack.c.bf16 %v414_v34, %v406_v33  ;;  %v416_v37 = vld [vmem:[#allocation8 + $0xd0] sm:$0xff]  ;;  %v431_v39 = vld [vmem:[#allocation8 + $0x148] sm:$0xff]  ;;  %202 = vmatprep.mubr.f32.mxu0 %v7253_v1 }
  0x44   :  { %7546 = vst [vmem:[#allocation16_spill] sm:$0xff] %v5790_v32  ;;  %3308 = vmatmul.mubr.msk.f32.vlgmr.msra.gmra.mrb[0].mxu1 %vm107_vm0, %v69_v9  ;;  %3379 = vmatprep.subr.bf16.mxu0 %v5788_v31  ;;  %v5798_v40 = vpack.c.bf16 %v431_v39, %v423_v38  ;;  %v425_v41 = vld [vmem:[#allocation8 + $0x118] sm:$0xff]  ;;  %v422_v43 = vld [vmem:[#allocation8 + $0x100] sm:$0xff]  ;;  %v5801_v44 = vpack.c.bf16 %v416_v37, %v408_v35  ;;  %v424_v46 = vld [vmem:[#allocation8 + $0x110] sm:$0xff] }
  0x45   :  { %7547 = vst [vmem:[#allocation17_spill] sm:$0xff] %v5793_v36  ;;  %v433_v42 = vld [vmem:[#allocation8 + $0x158] sm:$0xff]  ;;  %3441 = vmatpush1.bf16.msra.mxu1 %v5784_v27  ;;  %v430_v45 = vld [vmem:[#allocation8 + $0x140] sm:$0xff]  ;;  %315 = vmatprep.mubr.f32.mxu1 %v7253_v1  ;;  %v432_v48 = vld [vmem:[#allocation8 + $0x150] sm:$0xff] }
  0x46   :  { %7548 = vst [vmem:[#allocation18_spill] sm:$0xff] %v5798_v40  ;;  %7549 = vst [vmem:[#allocation19_spill] sm:$0xff] %v5801_v44  ;;  %3443 = vmatprep.subr.bf16.mxu1 %v5790_v32  ;;  %v5805_v47 = vpack.c.bf16 %v433_v42, %v425_v41  ;;  %v439_v49 = vld [vmem:[#allocation8 + $0x188] sm:$0xff]  ;;  %v5808_v51 = vpack.c.bf16 %v430_v45, %v422_v43  ;;  %v441_v52 = vld [vmem:[#allocation8 + $0x198] sm:$0xff]  ;;  %v5814_v57 = vpack.c.bf16 %v432_v48, %v424_v46 }
  0x47   :  { %v447_v50 = vld [vmem:[#allocation8 + $0x1c8] sm:$0xff]  ;;  %3381 = vmatpush1.bf16.msra.mxu0 %v5793_v36  ;;  %v449_v53 = vld [vmem:[#allocation8 + $0x1d8] sm:$0xff]  ;;  %v438_v55 = vld [vmem:[#allocation8 + $0x180] sm:$0xff] }
  0x48   :  { %7550 = vst [vmem:[#allocation20_spill] sm:$0xff] %v5805_v47  ;;  %7551 = vst [vmem:[#allocation21_spill] sm:$0xff] %v5808_v51  ;;  %3383 = vmatprep.subr.bf16.mxu0 %v5798_v40  ;;  %v5811_v54 = vpack.c.bf16 %v447_v50, %v439_v49  ;;  %v446_v56 = vld [vmem:[#allocation8 + $0x1c0] sm:$0xff]  ;;  %v455_v58 = vld [vmem:[#allocation8 + $0x208] sm:$0xff]  ;;  %v5817_v60 = vpack.c.bf16 %v449_v53, %v441_v52 }
  0x49   :  { %3445 = vmatpush1.bf16.msra.mxu1 %v5801_v44  ;;  %7553 = vst [vmem:[#allocation23_spill] sm:$0xff] %v5814_v57  ;;  %v463_v59 = vld [vmem:[#allocation8 + $0x248] sm:$0xff]  ;;  %v440_v61 = vld [vmem:[#allocation8 + $0x190] sm:$0xff]  ;;  %v5820_v63 = vpack.c.bf16 %v446_v56, %v438_v55  ;;  %v457_v0 = vld [vmem:[#allocation8 + $0x218] sm:$0xff] }
  0x4a   :  { %7552 = vst [vmem:[#allocation22_spill] sm:$0xff] %v5811_v54  ;;  %3447 = vmatprep.subr.bf16.mxu1 %v5805_v47  ;;  %7554 = vst [vmem:[#allocation24_spill] sm:$0xff] %v5817_v60  ;;  %v448_v62 = vld [vmem:[#allocation8 + $0x1d0] sm:$0xff]  ;;  %v465_v2 = vld [vmem:[#allocation8 + $0x258] sm:$0xff]  ;;  %v5823_v3 = vpack.c.bf16 %v463_v59, %v455_v58 }
  0x4b   :  { %3385 = vmatpush1.bf16.msra.mxu0 %v5808_v51  ;;  %7555 = vst [vmem:[#allocation25_spill] sm:$0xff] %v5820_v63  ;;  %v454_v4 = vld [vmem:[#allocation8 + $0x200] sm:$0xff]  ;;  %v5826_v6 = vpack.c.bf16 %v448_v62, %v440_v61  ;;  %v5829_v7 = vpack.c.bf16 %v465_v2, %v457_v0  ;;  %v456_v8 = vld [vmem:[#allocation8 + $0x210] sm:$0xff]  ;;  %v471_v12 = vld [vmem:[#allocation8 + $0x288] sm:$0xff] }
  0x4c   :  { %3387 = vmatprep.subr.bf16.mxu0 %v5811_v54  ;;  %7556 = vst [vmem:[#allocation26_spill] sm:$0xff] %v5823_v3  ;;  %v462_v5 = vld [vmem:[#allocation8 + $0x240] sm:$0xff]  ;;  %v464_v9 = vld [vmem:[#allocation8 + $0x250] sm:$0xff]  ;;  %v479_v13 = vld [vmem:[#allocation8 + $0x2c8] sm:$0xff] }
  0x4d   :  { %3449 = vmatpush1.bf16.msra.mxu1 %v5814_v57  ;;  %7557 = vst [vmem:[#allocation27_spill] sm:$0xff] %v5826_v6  ;;  %7558 = vst [vmem:[#allocation28_spill] sm:$0xff] %v5829_v7  ;;  %v5832_v10 = vpack.c.bf16 %v462_v5, %v454_v4  ;;  %v5836_v11 = vpack.c.bf16 %v464_v9, %v456_v8  ;;  %v473_v14 = vld [vmem:[#allocation8 + $0x298] sm:$0xff]  ;;  %v5841_v15 = vpack.c.bf16 %v479_v13, %v471_v12  ;;  %v470_v17 = vld [vmem:[#allocation8 + $0x280] sm:$0xff] }
  0x4e   :  { %3451 = vmatprep.subr.bf16.mxu1 %v5817_v60  ;;  %v481_v16 = vld [vmem:[#allocation8 + $0x2d8] sm:$0xff]  ;;  %v478_v19 = vld [vmem:[#allocation8 + $0x2c0] sm:$0xff]  ;;  %v472_v24 = vld [vmem:[#allocation8 + $0x290] sm:$0xff] }
  0x4f   :  { %3389 = vmatpush1.bf16.msra.mxu0 %v5820_v63  ;;  %7559 = vst [vmem:[#allocation29_spill] sm:$0xff] %v5832_v10  ;;  %7560 = vst [vmem:[#allocation30_spill] sm:$0xff] %v5836_v11  ;;  %v5843_v20 = vpack.c.bf16 %v481_v16, %v473_v14  ;;  %v5845_v21 = vpack.c.bf16 %v478_v19, %v470_v17  ;;  %v480_v25 = vld [vmem:[#allocation8 + $0x2d0] sm:$0xff]  ;;  %v487_v28 = vld [vmem:[#allocation8 + $0x308] sm:$0xff] }
  0x50   :  { %3391 = vmatprep.subr.bf16.mxu0 %v5823_v3  ;;  %7561 = vst [vmem:[#allocation31_spill] sm:$0xff] %v5841_v15  ;;  %v5848_v26 = vpack.c.bf16 %v480_v25, %v472_v24  ;;  %v495_v29 = vld [vmem:[#allocation8 + $0x348] sm:$0xff]  ;;  %v489_v30 = vld [vmem:[#allocation8 + $0x318] sm:$0xff]  ;;  %v486_v35 = vld [vmem:[#allocation8 + $0x300] sm:$0xff] }
  0x51   :  { %3453 = vmatpush1.bf16.msra.mxu1 %v5826_v6  ;;  %7562 = vst [vmem:[#allocation32_spill] sm:$0xff] %v5843_v20  ;;  %7563 = vst [vmem:[#allocation33_spill] sm:$0xff] %v5845_v21  ;;  %v5853_v33 = vpack.c.bf16 %v495_v29, %v487_v28  ;;  %v497_v34 = vld [vmem:[#allocation8 + $0x358] sm:$0xff]  ;;  %v494_v37 = vld [vmem:[#allocation8 + $0x340] sm:$0xff] }
  0x52   :  { %3455 = vmatprep.subr.bf16.mxu1 %v5829_v7  ;;  %7564 = vst [vmem:[#allocation34_spill] sm:$0xff] %v5848_v26  ;;  %v5855_v38 = vpack.c.bf16 %v497_v34, %v489_v30  ;;  %v5857_v39 = vpack.c.bf16 %v494_v37, %v486_v35  ;;  %v488_v41 = vld [vmem:[#allocation8 + $0x310] sm:$0xff]  ;;  %v503_v45 = vld [vmem:[#allocation8 + $0x388] sm:$0xff]  ;;  %v505_v48 = vld [vmem:[#allocation8 + $0x398] sm:$0xff] }
  0x53   :  { %3393 = vmatpush1.bf16.msra.mxu0 %v5832_v10  ;;  %7565 = vst [vmem:[#allocation35_spill] sm:$0xff] %v5853_v33  ;;  %v496_v42 = vld [vmem:[#allocation8 + $0x350] sm:$0xff]  ;;  %v511_v46 = vld [vmem:[#allocation8 + $0x3c8] sm:$0xff]  ;;  %v513_v50 = vld [vmem:[#allocation8 + $0x3d8] sm:$0xff] }
  0x54   :  { %3395 = vmatprep.subr.bf16.mxu0 %v5841_v15  ;;  %7566 = vst [vmem:[#allocation36_spill] sm:$0xff] %v5855_v38  ;;  %7567 = vst [vmem:[#allocation37_spill] sm:$0xff] %v5857_v39  ;;  %v5860_v43 = vpack.c.bf16 %v496_v42, %v488_v41  ;;  %v5865_v49 = vpack.c.bf16 %v511_v46, %v503_v45  ;;  %v502_v52 = vld [vmem:[#allocation8 + $0x380] sm:$0xff]  ;;  %v5867_v55 = vpack.c.bf16 %v513_v50, %v505_v48  ;;  %v504_v58 = vld [vmem:[#allocation8 + $0x390] sm:$0xff] }
  0x55   :  { %3457 = vmatpush1.bf16.msra.mxu1 %v5836_v11  ;;  %v510_v53 = vld [vmem:[#allocation8 + $0x3c0] sm:$0xff]  ;;  %v512_v59 = vld [vmem:[#allocation8 + $0x3d0] sm:$0xff]  ;;  %v519_v62 = vld [vmem:[#allocation8 + $0x408] sm:$0xff] }
  0x56   :  { %3459 = vmatprep.subr.bf16.mxu1 %v5843_v20  ;;  %7568 = vst [vmem:[#allocation38_spill] sm:$0xff] %v5860_v43  ;;  %7569 = vst [vmem:[#allocation39_spill] sm:$0xff] %v5865_v49  ;;  %v5869_v56 = vpack.c.bf16 %v510_v53, %v502_v52  ;;  %v5872_v61 = vpack.c.bf16 %v512_v59, %v504_v58  ;;  %v527_v0 = vld [vmem:[#allocation8 + $0x448] sm:$0xff]  ;;  %v521_v2 = vld [vmem:[#allocation8 + $0x418] sm:$0xff] }
  0x57   :  { %3397 = vmatpush1.bf16.msra.mxu0 %v5845_v21  ;;  %7570 = vst [vmem:[#allocation40_spill] sm:$0xff] %v5867_v55  ;;  %v5877_v4 = vpack.c.bf16 %v527_v0, %v519_v62  ;;  %v529_v5 = vld [vmem:[#allocation8 + $0x458] sm:$0xff]  ;;  %v518_v8 = vld [vmem:[#allocation8 + $0x400] sm:$0xff]  ;;  %v520_v14 = vld [vmem:[#allocation8 + $0x410] sm:$0xff] }
  0x58   :  { %3399 = vmatprep.subr.bf16.mxu0 %v5853_v33  ;;  %7571 = vst [vmem:[#allocation41_spill] sm:$0xff] %v5869_v56  ;;  %7572 = vst [vmem:[#allocation42_spill] sm:$0xff] %v5872_v61  ;;  %v526_v9 = vld [vmem:[#allocation8 + $0x440] sm:$0xff]  ;;  %v5879_v12 = vpack.c.bf16 %v529_v5, %v521_v2  ;;  %v528_v16 = vld [vmem:[#allocation8 + $0x450] sm:$0xff] }
  0x59   :  { %3461 = vmatpush1.bf16.msra.mxu1 %v5848_v26  ;;  %7573 = vst [vmem:[#allocation43_spill] sm:$0xff] %v5877_v4  ;;  %v5881_v13 = vpack.c.bf16 %v526_v9, %v518_v8  ;;  %v5884_v17 = vpack.c.bf16 %v528_v16, %v520_v14  ;;  %v535_v19 = vld [vmem:[#allocation8 + $0x488] sm:$0xff]  ;;  %v537_v25 = vld [vmem:[#allocation8 + $0x498] sm:$0xff]  ;;  %v534_v30 = vld [vmem:[#allocation8 + $0x480] sm:$0xff] }
  0x5a   :  { %3463 = vmatprep.subr.bf16.mxu1 %v5855_v38  ;;  %7574 = vst [vmem:[#allocation44_spill] sm:$0xff] %v5879_v12  ;;  %v543_v24 = vld [vmem:[#allocation8 + $0x4c8] sm:$0xff]  ;;  %v545_v29 = vld [vmem:[#allocation8 + $0x4d8] sm:$0xff]  ;;  %v542_v34 = vld [vmem:[#allocation8 + $0x4c0] sm:$0xff] }
  0x5b   :  { %3401 = vmatpush1.bf16.msra.mxu0 %v5857_v39  ;;  %7575 = vst [vmem:[#allocation45_spill] sm:$0xff] %v5881_v13  ;;  %7576 = vst [vmem:[#allocation46_spill] sm:$0xff] %v5884_v17  ;;  %v5889_v28 = vpack.c.bf16 %v543_v24, %v535_v19  ;;  %v5891_v35 = vpack.c.bf16 %v545_v29, %v537_v25  ;;  %v5893_v37 = vpack.c.bf16 %v542_v34, %v534_v30  ;;  %v536_v41 = vld [vmem:[#allocation8 + $0x490] sm:$0xff]  ;;  %v70_v45 = vld [vmem:[#allocation4 + $0x8] sm:$0xff] }
  0x5c   :  { %3403 = vmatprep.subr.bf16.mxu0 %v5865_v49  ;;  %v544_v42 = vld [vmem:[#allocation8 + $0x4d0] sm:$0xff]  ;;  %3301 = vmatmul.mubr.msk.f32.gmra.mrb[2].mxu0 %vm107_vm0, %v70_v45  ;;  %v551_v48 = vld [vmem:[#allocation8 + $0x508] sm:$0xff]  ;;  %v553_v52 = vld [vmem:[#allocation8 + $0x518] sm:$0xff] }
  0x5d   :  { %3465 = vmatpush1.bf16.msra.mxu1 %v5860_v43  ;;  %7577 = vst [vmem:[#allocation47_spill] sm:$0xff] %v5889_v28  ;;  %7578 = vst [vmem:[#allocation48_spill] sm:$0xff] %v5891_v35  ;;  %v5896_v46 = vpack.c.bf16 %v544_v42, %v536_v41  ;;  %v559_v50 = vld [vmem:[#allocation8 + $0x548] sm:$0xff]  ;;  %v561_v58 = vld [vmem:[#allocation8 + $0x558] sm:$0xff]  ;;  %208 = vmatprep.mubr.f32.mxu0 %v7253_v1 }
  0x5e   :  { %3467 = vmatprep.subr.bf16.mxu1 %v5867_v55  ;;  %7579 = vst [vmem:[#allocation49_spill] sm:$0xff] %v5893_v37  ;;  %3309 = vmatmul.mubr.msk.f32.gmra.mrb[2].mxu1 %vm107_vm0, %v70_v45  ;;  %v5902_v53 = vpack.c.bf16 %v559_v50, %v551_v48  ;;  %v550_v59 = vld [vmem:[#allocation8 + $0x500] sm:$0xff]  ;;  %v5906_v0 = vpack.c.bf16 %v561_v58, %v553_v52  ;;  %v552_v5 = vld [vmem:[#allocation8 + $0x510] sm:$0xff]  ;;  %v567_v16 = vld [vmem:[#allocation8 + $0x588] sm:$0xff] }
  0x5f   :  { %3405 = vmatpush1.bf16.msra.mxu0 %v5869_v56  ;;  %7580 = vst [vmem:[#allocation50_spill] sm:$0xff] %v5896_v46  ;;  %v558_v62 = vld [vmem:[#allocation8 + $0x540] sm:$0xff]  ;;  %v560_v8 = vld [vmem:[#allocation8 + $0x550] sm:$0xff]  ;;  %321 = vmatprep.mubr.f32.mxu1 %v7253_v1  ;;  %v575_v19 = vld [vmem:[#allocation8 + $0x5c8] sm:$0xff] }
  0x60   :  { %3407 = vmatprep.subr.bf16.mxu0 %v5877_v4  ;;  %7581 = vst [vmem:[#allocation51_spill] sm:$0xff] %v5902_v53  ;;  %7582 = vst [vmem:[#allocation52_spill] sm:$0xff] %v5906_v0  ;;  %v5908_v2 = vpack.c.bf16 %v558_v62, %v550_v59  ;;  %v71_v9 = vld [vmem:[#allocation4 + $0x10] sm:$0xff]  ;;  %v5912_v14 = vpack.c.bf16 %v560_v8, %v552_v5  ;;  %v569_v24 = vld [vmem:[#allocation8 + $0x598] sm:$0xff]  ;;  %v5918_v25 = vpack.c.bf16 %v575_v19, %v567_v16 }
  0x61   :  { %3469 = vmatpush1.bf16.msra.mxu1 %v5872_v61  ;;  %3302 = vmatmul.mubr.msk.f32.gmra.mrb[4].mxu0 %vm107_vm0, %v71_v9  ;;  %v577_v29 = vld [vmem:[#allocation8 + $0x5d8] sm:$0xff]  ;;  %v566_v30 = vld [vmem:[#allocation8 + $0x580] sm:$0xff]  ;;  %v568_v45 = vld [vmem:[#allocation8 + $0x590] sm:$0xff] }
  0x62   :  { %3471 = vmatprep.subr.bf16.mxu1 %v5879_v12  ;;  %7583 = vst [vmem:[#allocation53_spill] sm:$0xff] %v5908_v2  ;;  %7584 = vst [vmem:[#allocation54_spill] sm:$0xff] %v5912_v14  ;;  %3310 = vmatmul.mubr.msk.f32.gmra.mrb[4].mxu1 %vm107_vm0, %v71_v9  ;;  %v574_v34 = vld [vmem:[#allocation8 + $0x5c0] sm:$0xff]  ;;  %v5922_v41 = vpack.c.bf16 %v577_v29, %v569_v24  ;;  %v576_v48 = vld [vmem:[#allocation8 + $0x5d0] sm:$0xff] }
  0x63   :  { %3409 = vmatpush1.bf16.msra.mxu0 %v5881_v13  ;;  %7585 = vst [vmem:[#allocation55_spill] sm:$0xff] %v5918_v25  ;;  %214 = vmatprep.mubr.f32.mxu0 %v7253_v1  ;;  %v5924_v42 = vpack.c.bf16 %v574_v34, %v566_v30  ;;  %v72_v50 = vld [vmem:[#allocation4 + $0x18] sm:$0xff]  ;;  %v5928_v52 = vpack.c.bf16 %v576_v48, %v568_v45  ;;  %v583_v58 = vld [vmem:[#allocation8 + $0x608] sm:$0xff]  ;;  %v582_v9 = vld [vmem:[#allocation8 + $0x600] sm:$0xff] }
  0x64   :  { %3411 = vmatprep.subr.bf16.mxu0 %v5889_v28  ;;  %7586 = vst [vmem:[#allocation56_spill] sm:$0xff] %v5922_v41  ;;  %327 = vmatprep.mubr.f32.mxu1 %v7253_v1  ;;  %v591_v59 = vld [vmem:[#allocation8 + $0x648] sm:$0xff]  ;;  %v585_v62 = vld [vmem:[#allocation8 + $0x618] sm:$0xff]  ;;  %v590_v16 = vld [vmem:[#allocation8 + $0x640] sm:$0xff] }
  0x65   :  { %3473 = vmatpush1.bf16.msra.mxu1 %v5884_v17  ;;  %7587 = vst [vmem:[#allocation57_spill] sm:$0xff] %v5924_v42  ;;  %7588 = vst [vmem:[#allocation58_spill] sm:$0xff] %v5928_v52  ;;  %3303 = vmatmul.mubr.msk.f32.gmra.mrb[6].mxu0 %vm107_vm0, %v72_v50  ;;  %v5934_v5 = vpack.c.bf16 %v591_v59, %v583_v58  ;;  %v593_v8 = vld [vmem:[#allocation8 + $0x658] sm:$0xff]  ;;  %v5940_v24 = vpack.c.bf16 %v590_v16, %v582_v9  ;;  %v584_v29 = vld [vmem:[#allocation8 + $0x610] sm:$0xff] }
  0x66   :  { %3475 = vmatprep.subr.bf16.mxu1 %v5891_v35  ;;  %3311 = vmatmul.mubr.msk.f32.gmra.mrb[6].mxu1 %vm107_vm0, %v72_v50  ;;  %v5938_v19 = vpack.c.bf16 %v593_v8, %v585_v62  ;;  %v592_v30 = vld [vmem:[#allocation8 + $0x650] sm:$0xff]  ;;  %v73_v34 = vld [vmem:[#allocation4 + $0x20] sm:$0xff]  ;;  %v599_v48 = vld [vmem:[#allocation8 + $0x688] sm:$0xff] }
  0x67   :  { %3413 = vmatpush1.bf16.msra.mxu0 %v5893_v37  ;;  %7589 = vst [vmem:[#allocation59_spill] sm:$0xff] %v5934_v5  ;;  %220 = vmatprep.mubr.f32.mxu0 %v7253_v1  ;;  %7591 = vst [vmem:[#allocation61_spill] sm:$0xff] %v5940_v24  ;;  %v5944_v45 = vpack.c.bf16 %v592_v30, %v584_v29  ;;  %v607_v50 = vld [vmem:[#allocation8 + $0x6c8] sm:$0xff]  ;;  %v601_v58 = vld [vmem:[#allocation8 + $0x698] sm:$0xff] }
  0x68   :  { %3415 = vmatprep.subr.bf16.mxu0 %v5902_v53  ;;  %7590 = vst [vmem:[#allocation60_spill] sm:$0xff] %v5938_v19  ;;  %333 = vmatprep.mubr.f32.mxu1 %v7253_v1  ;;  %v5950_v59 = vpack.c.bf16 %v607_v50, %v599_v48  ;;  %v609_v62 = vld [vmem:[#allocation8 + $0x6d8] sm:$0xff]  ;;  %v598_v8 = vld [vmem:[#allocation8 + $0x680] sm:$0xff]  ;;  %v600_v30 = vld [vmem:[#allocation8 + $0x690] sm:$0xff] }
  0x69   :  { %3477 = vmatpush1.bf16.msra.mxu1 %v5896_v46  ;;  %7592 = vst [vmem:[#allocation62_spill] sm:$0xff] %v5944_v45  ;;  %3304 = vmatmul.mubr.msk.f32.gmra.mrb[8].mxu0 %vm107_vm0, %v73_v34  ;;  %v606_v9 = vld [vmem:[#allocation8 + $0x6c0] sm:$0xff]  ;;  %v5954_v16 = vpack.c.bf16 %v609_v62, %v601_v58  ;;  %v615_v50 = vld [vmem:[#allocation8 + $0x708] sm:$0xff]  ;;  %v617_v58 = vld [vmem:[#allocation8 + $0x718] sm:$0xff] }
  0x6a   :  { %3479 = vmatprep.subr.bf16.mxu1 %v5906_v0  ;;  %3312 = vmatmul.mubr.msk.f32.gmra.mrb[8].mxu1 %vm107_vm0, %v73_v34  ;;  %7593 = vst [vmem:[#allocation63_spill] sm:$0xff] %v5950_v59  ;;  %v5956_v29 = vpack.c.bf16 %v606_v9, %v598_v8  ;;  %v74_v34 = vld [vmem:[#allocation4 + $0x28] sm:$0xff]  ;;  %v625_v62 = vld [vmem:[#allocation8 + $0x758] sm:$0xff]  ;;  %v75_v8 = vld [vmem:[#allocation4 + $0x30] sm:$0xff] }
  0x6b   :  { %3417 = vmatpush1.bf16.msra.mxu0 %v5908_v2  ;;  %226 = vmatprep.mubr.f32.mxu0 %v7253_v1  ;;  %7594 = vst [vmem:[#allocation64_spill] sm:$0xff] %v5954_v16  ;;  %v5968_v9 = vpack.c.bf16 %v625_v62, %v617_v58  ;;  %v633_v62 = vld [vmem:[#allocation8 + $0x798] sm:$0xff]  ;;  %v435_v2 = vld [vmem:[#allocation8 + $0x168] sm:$0xff] }
  0x6c   :  { %3419 = vmatprep.subr.bf16.mxu0 %v5918_v25  ;;  %7595 = vst [vmem:[#allocation65_spill] sm:$0xff] %v5956_v29  ;;  %339 = vmatprep.mubr.f32.mxu1 %v7253_v1  ;;  %v614_v1 = vld [vmem:[#allocation8 + $0x700] sm:$0xff]  ;;  %v429_v0 = vld [vmem:[#allocation8 + $0x138] sm:$0xff] }
  0x6d   :  { %3481 = vmatpush1.bf16.msra.mxu1 %v5912_v14  ;;  %3305 = vmatmul.mubr.msk.f32.gmra.mrb[10].mxu0 %vm107_vm0, %v74_v34  ;;  %7598 = vst [vmem:[#allocation68_spill] sm:$0xff] %v5968_v9  ;;  %v427_v14 = vld [vmem:[#allocation8 + $0x128] sm:$0xff]  ;;  %v437_v53 = vld [vmem:[#allocation8 + $0x178] sm:$0xff] }
  0x6e   :  { %3483 = vmatprep.subr.bf16.mxu1 %v5922_v41  ;;  %3313 = vmatmul.mubr.msk.f32.gmra.mrb[10].mxu1 %vm107_vm0, %v74_v34 }
  0x6f   :  { %3421 = vmatpush1.bf16.msra.mxu0 %v5924_v42  ;;  %v632_v42 = vld [vmem:[#allocation8 + $0x790] sm:$0xff] }
  0x70   :  { %3423 = vmatprep.subr.bf16.mxu0 %v5934_v5  ;;  %v639_v5 = vld [vmem:[#allocation8 + $0x7c8] sm:$0xff] }
  0x71   :  { %3485 = vmatpush1.bf16.msra.mxu1 %v5928_v52  ;;  %v76_v52 = vld [vmem:[#allocation4 + $0x38] sm:$0xff] }
  0x72   :  { %3487 = vmatprep.subr.bf16.mxu1 %v5938_v19  ;;  %v608_v19 = vld [vmem:[#allocation8 + $0x6d0] sm:$0xff] }
  0x73   :  { %3425 = vmatpush1.bf16.msra.mxu0 %v5940_v24  ;;  %v5960_v48 = vpack.c.bf16 %v608_v19, %v600_v30  ;;  %v623_v24 = vld [vmem:[#allocation8 + $0x748] sm:$0xff]  ;;  %v622_v19 = vld [vmem:[#allocation8 + $0x740] sm:$0xff]  ;;  %v616_v30 = vld [vmem:[#allocation8 + $0x710] sm:$0xff] }
  0x74   :  { %3427 = vmatprep.subr.bf16.mxu0 %v5950_v59  ;;  %v7599_v59 = vmov 0.0  }
  0x75   :  { %3489 = vmatpush1.bf16.msra.mxu1 %v5944_v45  ;;  %7596 = vst [vmem:[#allocation66_spill] sm:$0xff] %v5960_v48  ;;  %v5964_v45 = vpack.c.bf16 %v623_v24, %v615_v50  ;;  %232 = vmatprep.mubr.f32.mxu0 %v7599_v59  ;;  %v624_v24 = vld [vmem:[#allocation8 + $0x750] sm:$0xff]  ;;  %v631_v50 = vld [vmem:[#allocation8 + $0x788] sm:$0xff] }
  0x76   :  { %3491 = vmatprep.subr.bf16.mxu1 %v5954_v16  ;;  %v5972_v16 = vpack.c.bf16 %v622_v19, %v614_v1  ;;  %345 = vmatprep.mubr.f32.mxu1 %v7599_v59  ;;  %v5976_v34 = vpack.c.bf16 %v624_v24, %v616_v30  ;;  %v5978_v58 = vpack.c.bf16 %v639_v5, %v631_v50  ;;  %v630_v19 = vld [vmem:[#allocation8 + $0x780] sm:$0xff]  ;;  %v640_v5 = vld [vmem:[#allocation8 + $0x7d0] sm:$0xff]  ;;  %v395_v24 = vld [vmem:[#allocation8 + $0x28] sm:$0xff] }
  0x77   :  { %7597 = vst [vmem:[#allocation67_spill] sm:$0xff] %v5964_v45  ;;  %3429 = vmatpush1.bf16.msra.mxu0 %v5956_v29  ;;  %v641_v29 = vld [vmem:[#allocation8 + $0x7d8] sm:$0xff]  ;;  %3314 = vmatmul.mubr.msk.f32.gmra.mrb[12].mxu1 %vm107_vm0, %v75_v8  ;;  %v403_v50 = vld [vmem:[#allocation8 + $0x68] sm:$0xff] }
  0x78   :  { %7600 = vst [vmem:[#allocation69_spill] sm:$0xff] %v5972_v16  ;;  %3431 = vmatprep.subr.bf16.mxu0 %v5964_v45  ;;  %7601 = vst [vmem:[#allocation70_spill] sm:$0xff] %v5976_v34  ;;  %3306 = vmatmul.mubr.msk.f32.gmra.mrb[12].mxu0 %vm107_vm0, %v75_v8  ;;  %v5982_v1 = vpack.c.bf16 %v641_v29, %v633_v62  ;;  %v397_v29 = vld [vmem:[#allocation8 + $0x38] sm:$0xff]  ;;  %v5994_v8 = vpack.c.bf16 %v403_v50, %v395_v24 }
  0x79   :  { %3493 = vmatpush1.bf16.msra.mxu1 %v5960_v48  ;;  %7602 = vst [vmem:[#allocation71_spill] sm:$0xff] %v5978_v58  ;;  %v638_v48 = vld [vmem:[#allocation8 + $0x7c0] sm:$0xff]  ;;  %238 = vmatprep.mubr.f32.mxu0 %v7599_v59  ;;  %v405_v62 = vld [vmem:[#allocation8 + $0x78] sm:$0xff] }
  0x7a   :  { %3495 = vmatprep.subr.bf16.mxu1 %v5968_v9  ;;  %7603 = vst [vmem:[#allocation72_spill] sm:$0xff] %v5982_v1  ;;  %v5986_v30 = vpack.c.bf16 %v638_v48, %v630_v19  ;;  %v5990_v9 = vpack.c.bf16 %v640_v5, %v632_v42  ;;  %351 = vmatprep.mubr.f32.mxu1 %v7599_v59  ;;  %7606 = vst [vmem:[#allocation75_spill] sm:$0xff] %v5994_v8  ;;  %v87_v42 = vlaneseq }
  0x7b   :  { %3433 = vmatpush1.bf16.msra.mxu0 %v5972_v16  ;;  %v5998_v48 = vpack.c.bf16 %v405_v62, %v397_v29  ;;  %3315 = vmatmul.mubr.msk.f32.gmra.mrb[14].mxu1 %vm107_vm0, %v76_v52 }
  0x7c   :  { %7604 = vst [vmem:[#allocation73_spill] sm:$0xff] %v5986_v30  ;;  %7605 = vst [vmem:[#allocation74_spill] sm:$0xff] %v5990_v9  ;;  %3435 = vmatprep.subr.bf16.mxu0 %v5978_v58  ;;  %3307 = vmatmul.mubr.msk.f32.gmra.mrb[14].mxu0 %vm107_vm0, %v76_v52  ;;  %v6007_v19 = vshrl.u32 %v87_v42, 7  ;;  %v85_v52 = vld [vmem:[%s7241_s2] sm:$0xf] }
  0x7d   :  { %3497 = vmatpush1.bf16.msra.mxu1 %v5976_v34  ;;  %7607 = vst [vmem:[#allocation76_spill] sm:$0xff] %v5998_v48  ;;  %760 = vmatprep.mubr.f32.mxu0 %v7599_v59 }
  0x7e   :  { %3499 = vmatprep.subr.bf16.mxu1 %v5982_v1  ;;  %831 = vmatprep.mubr.f32.mxu1 %v7599_v59  ;;  %7608 = vst [vmem:[#allocation77_spill] sm:$0xff] %v6007_v19  ;;  %v7283_v5 = vsub.s32 0, %v6007_v19  ;;  %v7288_v24 = vsub.s32 1, %v6007_v19  ;;  %v7293_v62 = vsub.s32 2, %v6007_v19  ;;  %v7302_v16 = vsub.s32 3, %v6007_v19 }
  0x7f   :  { %3437 = vmatpush1.bf16.msra.mxu0 %v5986_v30 }
  0x80   :  { %3503 = vmatprep.subr.bf16.mxu0 %v5994_v8  ;;  %v6016_v50 = vrot.slane %v85_v52, %v7283_v5  ;;  %v6020_v29 = vrot.slane %v85_v52, %v7288_v24  ;;  %v6027_v58 = vrot.slane %v85_v52, %v7293_v62 }
  0x81   :  { %3501 = vmatpush1.bf16.msra.mxu1 %v5990_v9 }
  0x82   :  { %3567 = vmatprep.subr.bf16.mxu1 %v5998_v48  ;;  %7609 = vst [vmem:[#allocation78_spill] sm:$0xff] %v6016_v50  ;;  %7610 = vst [vmem:[#allocation79_spill] sm:$0xff] %v6020_v29 }
  0x83   :  { %7611 = vst [vmem:[#allocation80_spill] sm:$0xff] %v6027_v58 }
 0x115   :  { %v198_v42 = vpop.f32.mrb[0].mxu0 }
 0x116   :  { %v199_v48 = vadd.f32 %v198_v42, %v6016_v50  ;;  %v200_v8 = vpop.f32.mrb[1].mxu0  ;;  %v6033_v42 = vrot.slane %v85_v52, %v7302_v16  ;;  %v421_v16 = vld [vmem:[#allocation8 + $0xf8] sm:$0xff] }
 0x117   :  { %v201_v9 = vadd.f32 %v200_v8, %v6020_v29  ;;  %v311_v30 = vpop.f32.mrb[0].mxu1 }
 0x118   :  { %v3316_v1 = vmul.f32 -1.442695, %v199_v48  ;;  %v313_v5 = vpop.f32.mrb[1].mxu1  ;;  %v312_v24 = vadd.f32 %v311_v30, %v6027_v58  ;;  %7612 = vst [vmem:[#allocation81_spill] sm:$0xff] %v6033_v42 }
 0x119   :  { %v3317_v34 = vmul.f32 -1.442695, %v201_v9  ;;  %v314_v8 = vadd.f32 %v313_v5, %v6033_v42  ;;  %v394_v5 = vld [vmem:[#allocation8 + $0x20] sm:$0xff] }
 0x11a   :  { %5360 = vpow2.f32 %v3316_v1  ;;  %v3318_v50 = vmul.f32 -1.442695, %v312_v24  ;;  %v402_v24 = vld [vmem:[#allocation8 + $0x60] sm:$0xff] }
 0x11b   :  { %5362 = vpow2.f32 %v3317_v34  ;;  %v6039_v25 = vpack.c.bf16 %v402_v24, %v394_v5  ;;  %v434_v24 = vld [vmem:[#allocation8 + $0x160] sm:$0xff] }
 0x11c   :  { %5364 = vpow2.f32 %v3318_v50  ;;  %v396_v50 = vld [vmem:[#allocation8 + $0x30] sm:$0xff] }
 0x11d   :  { %5366 = vtanh.f32 %v314_v8  ;;  %v411_v8 = vld [vmem:[#allocation8 + $0xa8] sm:$0xff]  ;;  %7614 = vst [vmem:[#allocation83_spill] sm:$0xff] %v6039_v25 }
 0x124   :  { %v5361_v48 = vpop.eup %5360 }
 0x125   :  { %v5363_v29 = vpop.eup %5362  ;;  %v681_v62 = vadd.f32 1.0, %v5361_v48  ;;  %v404_v48 = vld [vmem:[#allocation8 + $0x70] sm:$0xff] }
 0x126   :  { %v682_v45 = vadd.f32 1.0, %v5363_v29  ;;  %v5365_v9 = vpop.eup %5364 }
 0x127   :  { %5368 = vrcp.f32 %v681_v62  ;;  %v5367_v1 = vpop.eup %5366  ;;  %v683_v41 = vadd.f32 1.0, %v5365_v9  ;;  %v419_v62 = vld [vmem:[#allocation8 + $0xe8] sm:$0xff]  ;;  %v6041_v9 = vpack.c.bf16 %v404_v48, %v396_v50  ;;  %v6059_v50 = vpack.c.bf16 %v435_v2, %v427_v14 }
 0x128   :  { %5370 = vrcp.f32 %v682_v45  ;;  %v413_v45 = vld [vmem:[#allocation8 + $0xb8] sm:$0xff]  ;;  %v6061_v48 = vpack.c.bf16 %v437_v53, %v429_v0  ;;  %v442_v53 = vld [vmem:[#allocation8 + $0x1a0] sm:$0xff] }
 0x129   :  { %5372 = vrcp.f32 %v683_v41  ;;  %7615 = vst [vmem:[#allocation84_spill] sm:$0xff] %v6041_v9  ;;  %v418_v41 = vld [vmem:[#allocation8 + $0xe0] sm:$0xff]  ;;  %7619 = vst [vmem:[#allocation88_spill] sm:$0xff] %v6059_v50 }
 0x12a   :  { %7620 = vst [vmem:[#allocation89_spill] sm:$0xff] %v6061_v48  ;;  %v450_v0 = vld [vmem:[#allocation8 + $0x1e0] sm:$0xff] }
 0x131   :  { %v5369_v34 = vpop.eup %5368 }
 0x132   :  { %v5371_v30 = vpop.eup %5370  ;;  %v692_v58 = vmul.f32 %v5369_v34, %v5367_v1  ;;  %v410_v1 = vld [vmem:[#allocation8 + $0xa0] sm:$0xff]  ;;  %v6047_v34 = vpack.c.bf16 %v421_v16, %v413_v45  ;;  %v451_v45 = vld [vmem:[#allocation8 + $0x1e8] sm:$0xff] }
 0x133   :  { %v691_v19 = vmul.f32 0.0, %v5371_v30  ;;  %v5373_v29 = vpop.eup %5372  ;;  %v412_v30 = vld [vmem:[#allocation8 + $0xb0] sm:$0xff]  ;;  %v426_v16 = vld [vmem:[#allocation8 + $0x120] sm:$0xff] }
 0x134   :  { %7616 = vst [vmem:[#allocation85_spill] sm:$0xff] %v6047_v34 }
 0x135   :  { %v6036_v52 = vadd.f32 %v692_v58, %v691_v19  ;;  %v6045_v19 = vpack.c.bf16 %v419_v62, %v411_v8  ;;  %v428_v8 = vld [vmem:[#allocation8 + $0x130] sm:$0xff]  ;;  %v443_v62 = vld [vmem:[#allocation8 + $0x1a8] sm:$0xff] }
 0x136   :  { %v6073_v14 = vpack.c.bf16 %v451_v45, %v443_v62  ;;  %v460_v62 = vld [vmem:[#allocation8 + $0x230] sm:$0xff] }
 0x137   :  { %7613 = vst [vmem:[#allocation82_spill] sm:$0xff] %v6036_v52  ;;  %5374 = vtanh.f32 %v6036_v52  ;;  %v420_v52 = vld [vmem:[#allocation8 + $0xf0] sm:$0xff] }
 0x138   :  { %v6055_v5 = vpack.c.bf16 %v420_v52, %v412_v30  ;;  %v6067_v52 = vpack.c.bf16 %v434_v24, %v426_v16  ;;  %7623 = vst [vmem:[#allocation92_spill] sm:$0xff] %v6073_v14  ;;  %v459_v30 = vld [vmem:[#allocation8 + $0x228] sm:$0xff]  ;;  %v6079_v16 = vpack.c.bf16 %v450_v0, %v442_v53  ;;  %v468_v45 = vld [vmem:[#allocation8 + $0x270] sm:$0xff] }
 0x139   :  { %v6093_v0 = vpack.c.bf16 %v468_v45, %v460_v62  ;;  %v490_v62 = vld [vmem:[#allocation8 + $0x320] sm:$0xff] }
 0x13a   :  { %7618 = vst [vmem:[#allocation87_spill] sm:$0xff] %v6055_v5  ;;  %7621 = vst [vmem:[#allocation90_spill] sm:$0xff] %v6067_v52  ;;  %v498_v45 = vld [vmem:[#allocation8 + $0x360] sm:$0xff] }
 0x13b   :  { %7625 = vst [vmem:[#allocation94_spill] sm:$0xff] %v6079_v16  ;;  %7630 = vst [vmem:[#allocation99_spill] sm:$0xff] %v6093_v0 }
 0x141   :  { %v5375_v42 = vpop.eup %5374 }
 0x142   :  { %v6043_v58 = vmul.f32 %v5375_v42, %v5373_v29  ;;  %v6053_v42 = vpack.c.bf16 %v418_v41, %v410_v1  ;;  %v436_v29 = vld [vmem:[#allocation8 + $0x170] sm:$0xff] }
 0x143   :  { %v6069_v2 = vpack.c.bf16 %v436_v29, %v428_v8  ;;  %v444_v41 = vld [vmem:[#allocation8 + $0x1b0] sm:$0xff]  ;;  %v458_v8 = vld [vmem:[#allocation8 + $0x220] sm:$0xff] }
 0x144   :  { %761 = vmatmul.mubr.f32.vlgmr.msra.gmra.mrb[16].mxu0 %v6043_v58  ;;  %832 = vmatmul.mubr.f32.vlgmr.msra.gmra.mrb[16].mxu1 %v6043_v58  ;;  %7617 = vst [vmem:[#allocation86_spill] sm:$0xff] %v6053_v42  ;;  %v466_v29 = vld [vmem:[#allocation8 + $0x260] sm:$0xff] }
 0x145   :  { %3505 = vmatpush1.bf16.msra.mxu0 %v6039_v25  ;;  %3569 = vmatpush1.bf16.msra.mxu1 %v6041_v9  ;;  %v445_v25 = vld [vmem:[#allocation8 + $0x1b8] sm:$0xff]  ;;  %7622 = vst [vmem:[#allocation91_spill] sm:$0xff] %v6069_v2  ;;  %v6091_v53 = vpack.c.bf16 %v466_v29, %v458_v8 }
 0x146   :  { %3507 = vmatprep.subr.bf16.mxu0 %v6045_v19  ;;  %3571 = vmatprep.subr.bf16.mxu1 %v6047_v34  ;;  %v453_v9 = vld [vmem:[#allocation8 + $0x1f8] sm:$0xff] }
 0x147   :  { %902 = vmatprep.mubr.f32.mxu0 %v7599_v59  ;;  %973 = vmatprep.mubr.f32.mxu1 %v7599_v59  ;;  %v6075_v1 = vpack.c.bf16 %v453_v9, %v445_v25  ;;  %v452_v59 = vld [vmem:[#allocation8 + $0x1f0] sm:$0xff]  ;;  %v461_v34 = vld [vmem:[#allocation8 + $0x238] sm:$0xff]  ;;  %7629 = vst [vmem:[#allocation98_spill] sm:$0xff] %v6091_v53 }
 0x148   :  { %v6081_v24 = vpack.c.bf16 %v452_v59, %v444_v41  ;;  %v474_v41 = vld [vmem:[#allocation8 + $0x2a0] sm:$0xff] }
 0x149   :  { %3509 = vmatpush1.bf16.msra.mxu0 %v6053_v42  ;;  %3573 = vmatpush1.bf16.msra.mxu1 %v6055_v5  ;;  %7624 = vst [vmem:[#allocation93_spill] sm:$0xff] %v6075_v1  ;;  %v467_v42 = vld [vmem:[#allocation8 + $0x268] sm:$0xff]  ;;  %v469_v5 = vld [vmem:[#allocation8 + $0x278] sm:$0xff]  ;;  %v482_v59 = vld [vmem:[#allocation8 + $0x2e0] sm:$0xff] }
 0x14a   :  { %3511 = vmatprep.subr.bf16.mxu0 %v6059_v50  ;;  %3575 = vmatprep.subr.bf16.mxu1 %v6061_v48  ;;  %7626 = vst [vmem:[#allocation95_spill] sm:$0xff] %v6081_v24  ;;  %v6085_v25 = vpack.c.bf16 %v467_v42, %v459_v30  ;;  %v6087_v9 = vpack.c.bf16 %v469_v5, %v461_v34  ;;  %v475_v48 = vld [vmem:[#allocation8 + $0x2a8] sm:$0xff]  ;;  %v477_v50 = vld [vmem:[#allocation8 + $0x2b8] sm:$0xff]  ;;  %v476_v5 = vld [vmem:[#allocation8 + $0x2b0] sm:$0xff] }
 0x14b   :  { %v484_v30 = vld [vmem:[#allocation8 + $0x2f0] sm:$0xff]  ;;  %v6103_v8 = vpack.c.bf16 %v482_v59, %v474_v41  ;;  %v6115_v41 = vpack.c.bf16 %v498_v45, %v490_v62 }
 0x14c   :  { %7627 = vst [vmem:[#allocation96_spill] sm:$0xff] %v6085_v25  ;;  %7628 = vst [vmem:[#allocation97_spill] sm:$0xff] %v6087_v9  ;;  %v6105_v29 = vpack.c.bf16 %v484_v30, %v476_v5  ;;  %v506_v5 = vld [vmem:[#allocation8 + $0x3a0] sm:$0xff] }
 0x14d   :  { %3513 = vmatpush1.bf16.msra.mxu0 %v6067_v52  ;;  %3577 = vmatpush1.bf16.msra.mxu1 %v6069_v2  ;;  %v483_v52 = vld [vmem:[#allocation8 + $0x2e8] sm:$0xff]  ;;  %v485_v2 = vld [vmem:[#allocation8 + $0x2f8] sm:$0xff]  ;;  %7633 = vst [vmem:[#allocation102_spill] sm:$0xff] %v6103_v8  ;;  %7637 = vst [vmem:[#allocation106_spill] sm:$0xff] %v6115_v41 }
 0x14e   :  { %3515 = vmatprep.subr.bf16.mxu0 %v6073_v14  ;;  %3579 = vmatprep.subr.bf16.mxu1 %v6075_v1  ;;  %v6097_v34 = vpack.c.bf16 %v483_v52, %v475_v48  ;;  %v6099_v42 = vpack.c.bf16 %v485_v2, %v477_v50  ;;  %v491_v1 = vld [vmem:[#allocation8 + $0x328] sm:$0xff]  ;;  %v493_v14 = vld [vmem:[#allocation8 + $0x338] sm:$0xff]  ;;  %7634 = vst [vmem:[#allocation103_spill] sm:$0xff] %v6105_v29  ;;  %v492_v52 = vld [vmem:[#allocation8 + $0x330] sm:$0xff] }
 0x14f   :  { %v500_v2 = vld [vmem:[#allocation8 + $0x370] sm:$0xff]  ;;  %v514_v30 = vld [vmem:[#allocation8 + $0x3e0] sm:$0xff] }
 0x150   :  { %7631 = vst [vmem:[#allocation100_spill] sm:$0xff] %v6097_v34  ;;  %7632 = vst [vmem:[#allocation101_spill] sm:$0xff] %v6099_v42  ;;  %v6117_v59 = vpack.c.bf16 %v500_v2, %v492_v52  ;;  %v6127_v62 = vpack.c.bf16 %v514_v30, %v506_v5  ;;  %v522_v52 = vld [vmem:[#allocation8 + $0x420] sm:$0xff] }
 0x151   :  { %3517 = vmatpush1.bf16.msra.mxu0 %v6079_v16  ;;  %3581 = vmatpush1.bf16.msra.mxu1 %v6081_v24  ;;  %v499_v16 = vld [vmem:[#allocation8 + $0x368] sm:$0xff]  ;;  %v501_v24 = vld [vmem:[#allocation8 + $0x378] sm:$0xff]  ;;  %v530_v2 = vld [vmem:[#allocation8 + $0x460] sm:$0xff] }
 0x152   :  { %3519 = vmatprep.subr.bf16.mxu0 %v6085_v25  ;;  %3583 = vmatprep.subr.bf16.mxu1 %v6087_v9  ;;  %v6109_v50 = vpack.c.bf16 %v499_v16, %v491_v1  ;;  %v6111_v48 = vpack.c.bf16 %v501_v24, %v493_v14  ;;  %v507_v9 = vld [vmem:[#allocation8 + $0x3a8] sm:$0xff]  ;;  %v509_v25 = vld [vmem:[#allocation8 + $0x3b8] sm:$0xff]  ;;  %7638 = vst [vmem:[#allocation107_spill] sm:$0xff] %v6117_v59  ;;  %v508_v16 = vld [vmem:[#allocation8 + $0x3b0] sm:$0xff] }
 0x153   :  { %v516_v24 = vld [vmem:[#allocation8 + $0x3f0] sm:$0xff]  ;;  %7641 = vst [vmem:[#allocation110_spill] sm:$0xff] %v6127_v62  ;;  %v6139_v5 = vpack.c.bf16 %v530_v2, %v522_v52 }
 0x154   :  { %7635 = vst [vmem:[#allocation104_spill] sm:$0xff] %v6109_v50  ;;  %7636 = vst [vmem:[#allocation105_spill] sm:$0xff] %v6111_v48  ;;  %v6129_v45 = vpack.c.bf16 %v516_v24, %v508_v16  ;;  %v538_v16 = vld [vmem:[#allocation8 + $0x4a0] sm:$0xff] }
 0x155   :  { %3521 = vmatpush1.bf16.msra.mxu0 %v6091_v53  ;;  %3585 = vmatpush1.bf16.msra.mxu1 %v6093_v0  ;;  %v515_v53 = vld [vmem:[#allocation8 + $0x3e8] sm:$0xff]  ;;  %v517_v0 = vld [vmem:[#allocation8 + $0x3f8] sm:$0xff]  ;;  %7645 = vst [vmem:[#allocation114_spill] sm:$0xff] %v6139_v5  ;;  %v546_v24 = vld [vmem:[#allocation8 + $0x4e0] sm:$0xff] }
 0x156   :  { %3523 = vmatprep.subr.bf16.mxu0 %v6097_v34  ;;  %3587 = vmatprep.subr.bf16.mxu1 %v6099_v42  ;;  %v6121_v14 = vpack.c.bf16 %v515_v53, %v507_v9  ;;  %v6123_v1 = vpack.c.bf16 %v517_v0, %v509_v25  ;;  %v523_v42 = vld [vmem:[#allocation8 + $0x428] sm:$0xff]  ;;  %v525_v34 = vld [vmem:[#allocation8 + $0x438] sm:$0xff]  ;;  %7642 = vst [vmem:[#allocation111_spill] sm:$0xff] %v6129_v45  ;;  %v524_v53 = vld [vmem:[#allocation8 + $0x430] sm:$0xff] }
 0x157   :  { %v532_v0 = vld [vmem:[#allocation8 + $0x470] sm:$0xff]  ;;  %v6151_v52 = vpack.c.bf16 %v546_v24, %v538_v16 }
 0x158   :  { %7639 = vst [vmem:[#allocation108_spill] sm:$0xff] %v6121_v14  ;;  %7640 = vst [vmem:[#allocation109_spill] sm:$0xff] %v6123_v1  ;;  %v6141_v30 = vpack.c.bf16 %v532_v0, %v524_v53  ;;  %v554_v53 = vld [vmem:[#allocation8 + $0x520] sm:$0xff] }
 0x159   :  { %3525 = vmatpush1.bf16.msra.mxu0 %v6103_v8  ;;  %3589 = vmatpush1.bf16.msra.mxu1 %v6105_v29  ;;  %v531_v8 = vld [vmem:[#allocation8 + $0x468] sm:$0xff]  ;;  %v533_v29 = vld [vmem:[#allocation8 + $0x478] sm:$0xff]  ;;  %7649 = vst [vmem:[#allocation118_spill] sm:$0xff] %v6151_v52  ;;  %v562_v0 = vld [vmem:[#allocation8 + $0x560] sm:$0xff] }
 0x15a   :  { %3527 = vmatprep.subr.bf16.mxu0 %v6109_v50  ;;  %3591 = vmatprep.subr.bf16.mxu1 %v6111_v48  ;;  %v6133_v25 = vpack.c.bf16 %v531_v8, %v523_v42  ;;  %v6135_v9 = vpack.c.bf16 %v533_v29, %v525_v34  ;;  %v539_v48 = vld [vmem:[#allocation8 + $0x4a8] sm:$0xff]  ;;  %v541_v50 = vld [vmem:[#allocation8 + $0x4b8] sm:$0xff]  ;;  %7646 = vst [vmem:[#allocation115_spill] sm:$0xff] %v6141_v30  ;;  %v540_v8 = vld [vmem:[#allocation8 + $0x4b0] sm:$0xff] }
 0x15b   :  { %v548_v29 = vld [vmem:[#allocation8 + $0x4f0] sm:$0xff]  ;;  %v6163_v16 = vpack.c.bf16 %v562_v0, %v554_v53 }
 0x15c   :  { %7643 = vst [vmem:[#allocation112_spill] sm:$0xff] %v6133_v25  ;;  %7644 = vst [vmem:[#allocation113_spill] sm:$0xff] %v6135_v9  ;;  %v6153_v2 = vpack.c.bf16 %v548_v29, %v540_v8  ;;  %v570_v8 = vld [vmem:[#allocation8 + $0x5a0] sm:$0xff] }
 0x15d   :  { %3529 = vmatpush1.bf16.msra.mxu0 %v6115_v41  ;;  %3593 = vmatpush1.bf16.msra.mxu1 %v6117_v59  ;;  %v547_v41 = vld [vmem:[#allocation8 + $0x4e8] sm:$0xff]  ;;  %v549_v59 = vld [vmem:[#allocation8 + $0x4f8] sm:$0xff]  ;;  %7653 = vst [vmem:[#allocation122_spill] sm:$0xff] %v6163_v16  ;;  %v578_v29 = vld [vmem:[#allocation8 + $0x5e0] sm:$0xff] }
 0x15e   :  { %3531 = vmatprep.subr.bf16.mxu0 %v6121_v14  ;;  %3595 = vmatprep.subr.bf16.mxu1 %v6123_v1  ;;  %v6145_v34 = vpack.c.bf16 %v547_v41, %v539_v48  ;;  %v6147_v42 = vpack.c.bf16 %v549_v59, %v541_v50  ;;  %v555_v1 = vld [vmem:[#allocation8 + $0x528] sm:$0xff]  ;;  %v557_v14 = vld [vmem:[#allocation8 + $0x538] sm:$0xff]  ;;  %7650 = vst [vmem:[#allocation119_spill] sm:$0xff] %v6153_v2  ;;  %v556_v41 = vld [vmem:[#allocation8 + $0x530] sm:$0xff] }
 0x15f   :  { %v564_v59 = vld [vmem:[#allocation8 + $0x570] sm:$0xff]  ;;  %v6175_v53 = vpack.c.bf16 %v578_v29, %v570_v8 }
 0x160   :  { %7647 = vst [vmem:[#allocation116_spill] sm:$0xff] %v6145_v34  ;;  %7648 = vst [vmem:[#allocation117_spill] sm:$0xff] %v6147_v42  ;;  %v6165_v24 = vpack.c.bf16 %v564_v59, %v556_v41  ;;  %v586_v41 = vld [vmem:[#allocation8 + $0x620] sm:$0xff] }
 0x161   :  { %3533 = vmatpush1.bf16.msra.mxu0 %v6127_v62  ;;  %3597 = vmatpush1.bf16.msra.mxu1 %v6129_v45  ;;  %v563_v62 = vld [vmem:[#allocation8 + $0x568] sm:$0xff]  ;;  %v565_v45 = vld [vmem:[#allocation8 + $0x578] sm:$0xff]  ;;  %7657 = vst [vmem:[#allocation126_spill] sm:$0xff] %v6175_v53  ;;  %v594_v59 = vld [vmem:[#allocation8 + $0x660] sm:$0xff] }
 0x162   :  { %3535 = vmatprep.subr.bf16.mxu0 %v6133_v25  ;;  %3599 = vmatprep.subr.bf16.mxu1 %v6135_v9  ;;  %v6157_v50 = vpack.c.bf16 %v563_v62, %v555_v1  ;;  %v6159_v48 = vpack.c.bf16 %v565_v45, %v557_v14  ;;  %v571_v9 = vld [vmem:[#allocation8 + $0x5a8] sm:$0xff]  ;;  %v573_v25 = vld [vmem:[#allocation8 + $0x5b8] sm:$0xff]  ;;  %7654 = vst [vmem:[#allocation123_spill] sm:$0xff] %v6165_v24  ;;  %v572_v62 = vld [vmem:[#allocation8 + $0x5b0] sm:$0xff] }
 0x163   :  { %v580_v45 = vld [vmem:[#allocation8 + $0x5f0] sm:$0xff]  ;;  %v6187_v8 = vpack.c.bf16 %v594_v59, %v586_v41 }
 0x164   :  { %7651 = vst [vmem:[#allocation120_spill] sm:$0xff] %v6157_v50  ;;  %7652 = vst [vmem:[#allocation121_spill] sm:$0xff] %v6159_v48  ;;  %v6177_v0 = vpack.c.bf16 %v580_v45, %v572_v62  ;;  %v602_v62 = vld [vmem:[#allocation8 + $0x6a0] sm:$0xff] }
 0x165   :  { %3537 = vmatpush1.bf16.msra.mxu0 %v6139_v5  ;;  %3601 = vmatpush1.bf16.msra.mxu1 %v6141_v30  ;;  %v579_v5 = vld [vmem:[#allocation8 + $0x5e8] sm:$0xff]  ;;  %v581_v30 = vld [vmem:[#allocation8 + $0x5f8] sm:$0xff]  ;;  %7661 = vst [vmem:[#allocation130_spill] sm:$0xff] %v6187_v8  ;;  %v610_v45 = vld [vmem:[#allocation8 + $0x6e0] sm:$0xff] }
 0x166   :  { %3539 = vmatprep.subr.bf16.mxu0 %v6145_v34  ;;  %3603 = vmatprep.subr.bf16.mxu1 %v6147_v42  ;;  %v6169_v14 = vpack.c.bf16 %v579_v5, %v571_v9  ;;  %v6171_v1 = vpack.c.bf16 %v581_v30, %v573_v25  ;;  %v587_v42 = vld [vmem:[#allocation8 + $0x628] sm:$0xff]  ;;  %v589_v34 = vld [vmem:[#allocation8 + $0x638] sm:$0xff]  ;;  %7658 = vst [vmem:[#allocation127_spill] sm:$0xff] %v6177_v0  ;;  %v588_v5 = vld [vmem:[#allocation8 + $0x630] sm:$0xff] }
 0x167   :  { %v596_v30 = vld [vmem:[#allocation8 + $0x670] sm:$0xff]  ;;  %v6199_v41 = vpack.c.bf16 %v610_v45, %v602_v62 }
 0x168   :  { %7655 = vst [vmem:[#allocation124_spill] sm:$0xff] %v6169_v14  ;;  %7656 = vst [vmem:[#allocation125_spill] sm:$0xff] %v6171_v1  ;;  %v6189_v29 = vpack.c.bf16 %v596_v30, %v588_v5  ;;  %v618_v5 = vld [vmem:[#allocation8 + $0x720] sm:$0xff] }
 0x169   :  { %3541 = vmatpush1.bf16.msra.mxu0 %v6151_v52  ;;  %3605 = vmatpush1.bf16.msra.mxu1 %v6153_v2  ;;  %v595_v52 = vld [vmem:[#allocation8 + $0x668] sm:$0xff]  ;;  %v597_v2 = vld [vmem:[#allocation8 + $0x678] sm:$0xff]  ;;  %7665 = vst [vmem:[#allocation134_spill] sm:$0xff] %v6199_v41  ;;  %v626_v30 = vld [vmem:[#allocation8 + $0x760] sm:$0xff] }
 0x16a   :  { %3543 = vmatprep.subr.bf16.mxu0 %v6157_v50  ;;  %3607 = vmatprep.subr.bf16.mxu1 %v6159_v48  ;;  %v6181_v25 = vpack.c.bf16 %v595_v52, %v587_v42  ;;  %v6183_v9 = vpack.c.bf16 %v597_v2, %v589_v34  ;;  %v603_v48 = vld [vmem:[#allocation8 + $0x6a8] sm:$0xff]  ;;  %v605_v50 = vld [vmem:[#allocation8 + $0x6b8] sm:$0xff]  ;;  %7662 = vst [vmem:[#allocation131_spill] sm:$0xff] %v6189_v29  ;;  %v604_v52 = vld [vmem:[#allocation8 + $0x6b0] sm:$0xff] }
 0x16b   :  { %v612_v2 = vld [vmem:[#allocation8 + $0x6f0] sm:$0xff]  ;;  %v6211_v62 = vpack.c.bf16 %v626_v30, %v618_v5 }
 0x16c   :  { %7659 = vst [vmem:[#allocation128_spill] sm:$0xff] %v6181_v25  ;;  %7660 = vst [vmem:[#allocation129_spill] sm:$0xff] %v6183_v9  ;;  %v6201_v59 = vpack.c.bf16 %v612_v2, %v604_v52  ;;  %v634_v52 = vld [vmem:[#allocation8 + $0x7a0] sm:$0xff]  ;;  %v644_v2 = vld [vmem:[#allocation8 + $0x7f0] sm:$0xff] }
 0x16d   :  { %3545 = vmatpush1.bf16.msra.mxu0 %v6163_v16  ;;  %3609 = vmatpush1.bf16.msra.mxu1 %v6165_v24  ;;  %v611_v16 = vld [vmem:[#allocation8 + $0x6e8] sm:$0xff]  ;;  %v613_v24 = vld [vmem:[#allocation8 + $0x6f8] sm:$0xff]  ;;  %7669 = vst [vmem:[#allocation138_spill] sm:$0xff] %v6211_v62 }
 0x16e   :  { %3547 = vmatprep.subr.bf16.mxu0 %v6169_v14  ;;  %3611 = vmatprep.subr.bf16.mxu1 %v6171_v1  ;;  %v6193_v34 = vpack.c.bf16 %v611_v16, %v603_v48  ;;  %v6195_v42 = vpack.c.bf16 %v613_v24, %v605_v50  ;;  %v619_v1 = vld [vmem:[#allocation8 + $0x728] sm:$0xff]  ;;  %v621_v14 = vld [vmem:[#allocation8 + $0x738] sm:$0xff]  ;;  %7666 = vst [vmem:[#allocation135_spill] sm:$0xff] %v6201_v59  ;;  %v620_v16 = vld [vmem:[#allocation8 + $0x730] sm:$0xff] }
 0x16f   :  { %v628_v24 = vld [vmem:[#allocation8 + $0x770] sm:$0xff] }
 0x170   :  { %7663 = vst [vmem:[#allocation132_spill] sm:$0xff] %v6193_v34  ;;  %7664 = vst [vmem:[#allocation133_spill] sm:$0xff] %v6195_v42  ;;  %v6213_v45 = vpack.c.bf16 %v628_v24, %v620_v16  ;;  %v7680_v16 = vld [vmem:[#allocation56_spill] sm:$0xff]  ;;  %v7681_v24 = vld [vmem:[#allocation57_spill] sm:$0xff] }
 0x171   :  { %3549 = vmatpush1.bf16.msra.mxu0 %v6175_v53  ;;  %3613 = vmatpush1.bf16.msra.mxu1 %v6177_v0  ;;  %v627_v53 = vld [vmem:[#allocation8 + $0x768] sm:$0xff]  ;;  %v629_v0 = vld [vmem:[#allocation8 + $0x778] sm:$0xff] }
 0x172   :  { %3551 = vmatprep.subr.bf16.mxu0 %v6181_v25  ;;  %3615 = vmatprep.subr.bf16.mxu1 %v6183_v9  ;;  %v6205_v50 = vpack.c.bf16 %v627_v53, %v619_v1  ;;  %v6207_v48 = vpack.c.bf16 %v629_v0, %v621_v14  ;;  %v635_v9 = vld [vmem:[#allocation8 + $0x7a8] sm:$0xff]  ;;  %v637_v25 = vld [vmem:[#allocation8 + $0x7b8] sm:$0xff]  ;;  %7670 = vst [vmem:[#allocation139_spill] sm:$0xff] %v6213_v45  ;;  %v642_v53 = vld [vmem:[#allocation8 + $0x7e0] sm:$0xff] }
 0x173   :  { %v636_v0 = vld [vmem:[#allocation8 + $0x7b0] sm:$0xff]  ;;  %v6223_v5 = vpack.c.bf16 %v642_v53, %v634_v52  ;;  %v7682_v52 = vld [vmem:[#allocation58_spill] sm:$0xff]  ;;  %v7683_v53 = vld [vmem:[#allocation59_spill] sm:$0xff] }
 0x174   :  { %7667 = vst [vmem:[#allocation136_spill] sm:$0xff] %v6205_v50  ;;  %7668 = vst [vmem:[#allocation137_spill] sm:$0xff] %v6207_v48  ;;  %v6225_v30 = vpack.c.bf16 %v644_v2, %v636_v0  ;;  %v7684_v0 = vld [vmem:[#allocation60_spill] sm:$0xff]  ;;  %v7685_v2 = vld [vmem:[#allocation61_spill] sm:$0xff] }
 0x175   :  { %3553 = vmatpush1.bf16.msra.mxu0 %v6187_v8  ;;  %3617 = vmatpush1.bf16.msra.mxu1 %v6189_v29  ;;  %v643_v8 = vld [vmem:[#allocation8 + $0x7e8] sm:$0xff]  ;;  %v645_v29 = vld [vmem:[#allocation8 + $0x7f8] sm:$0xff]  ;;  %7673 = vst [vmem:[#allocation142_spill] sm:$0xff] %v6223_v5 }
 0x176   :  { %3555 = vmatprep.subr.bf16.mxu0 %v6193_v34  ;;  %3619 = vmatprep.subr.bf16.mxu1 %v6195_v42  ;;  %v6217_v14 = vpack.c.bf16 %v643_v8, %v635_v9  ;;  %v6219_v1 = vpack.c.bf16 %v645_v29, %v637_v25  ;;  %7674 = vst [vmem:[#allocation143_spill] sm:$0xff] %v6225_v30  ;;  %v7676_v25 = vld [vmem:[#allocation52_spill] sm:$0xff]  ;;  %v7677_v9 = vld [vmem:[#allocation53_spill] sm:$0xff]  ;;  %v7678_v8 = vld [vmem:[#allocation54_spill] sm:$0xff] }
 0x177   :  { %v7679_v29 = vld [vmem:[#allocation55_spill] sm:$0xff] }
 0x178   :  { %7671 = vst [vmem:[#allocation140_spill] sm:$0xff] %v6217_v14  ;;  %7672 = vst [vmem:[#allocation141_spill] sm:$0xff] %v6219_v1 }
 0x179   :  { %3557 = vmatpush1.bf16.msra.mxu0 %v6199_v41  ;;  %3621 = vmatpush1.bf16.msra.mxu1 %v6201_v59 }
 0x17a   :  { %3559 = vmatprep.subr.bf16.mxu0 %v6205_v50  ;;  %3623 = vmatprep.subr.bf16.mxu1 %v6207_v48 }
 0x17d   :  { %3561 = vmatpush1.bf16.msra.mxu0 %v6211_v62  ;;  %3625 = vmatpush1.bf16.msra.mxu1 %v6213_v45 }
 0x17e   :  { %3563 = vmatprep.subr.bf16.mxu0 %v6217_v14  ;;  %3627 = vmatprep.subr.bf16.mxu1 %v6219_v1 }
 0x181   :  { %3565 = vmatpush1.bf16.msra.mxu0 %v6223_v5  ;;  %3629 = vmatpush1.bf16.msra.mxu1 %v6225_v30 }
 0x182   :  { %3631 = vmatprep.subr.bf16.mxu0 %v5777_v18  ;;  %3695 = vmatprep.subr.bf16.mxu1 %v5779_v22 }
 0x184   :  { %903 = vmatmul.mubr.f32.vlgmr.msra.gmra.mrb[2].mxu0 %v6043_v58  ;;  %974 = vmatmul.mubr.f32.vlgmr.msra.gmra.mrb[2].mxu1 %v6043_v58  ;;  %v7675_v58 = vld [vmem:[#allocation51_spill] sm:$0xff] }
 0x185   :  { %3633 = vmatpush1.bf16.msra.mxu0 %v5781_v23  ;;  %3697 = vmatpush1.bf16.msra.mxu1 %v5784_v27 }
 0x186   :  { %3635 = vmatprep.subr.bf16.mxu0 %v5788_v31  ;;  %3699 = vmatprep.subr.bf16.mxu1 %v5790_v32 }
 0x189   :  { %3637 = vmatpush1.bf16.msra.mxu0 %v5793_v36  ;;  %3701 = vmatpush1.bf16.msra.mxu1 %v5801_v44 }
 0x18a   :  { %3639 = vmatprep.subr.bf16.mxu0 %v5798_v40  ;;  %3703 = vmatprep.subr.bf16.mxu1 %v5805_v47 }
 0x18d   :  { %3641 = vmatpush1.bf16.msra.mxu0 %v5808_v51  ;;  %3705 = vmatpush1.bf16.msra.mxu1 %v5814_v57 }
 0x18e   :  { %3643 = vmatprep.subr.bf16.mxu0 %v5811_v54  ;;  %3707 = vmatprep.subr.bf16.mxu1 %v5817_v60 }
 0x191   :  { %3645 = vmatpush1.bf16.msra.mxu0 %v5820_v63  ;;  %3709 = vmatpush1.bf16.msra.mxu1 %v5826_v6 }
 0x192   :  { %3647 = vmatprep.subr.bf16.mxu0 %v5823_v3  ;;  %3711 = vmatprep.subr.bf16.mxu1 %v5829_v7 }
 0x195   :  { %3649 = vmatpush1.bf16.msra.mxu0 %v5832_v10  ;;  %3713 = vmatpush1.bf16.msra.mxu1 %v5836_v11 }
 0x196   :  { %3651 = vmatprep.subr.bf16.mxu0 %v5841_v15  ;;  %3715 = vmatprep.subr.bf16.mxu1 %v5843_v20 }
 0x199   :  { %3653 = vmatpush1.bf16.msra.mxu0 %v5845_v21  ;;  %3717 = vmatpush1.bf16.msra.mxu1 %v5848_v26 }
 0x19a   :  { %3655 = vmatprep.subr.bf16.mxu0 %v5853_v33  ;;  %3719 = vmatprep.subr.bf16.mxu1 %v5855_v38 }
 0x19d   :  { %3657 = vmatpush1.bf16.msra.mxu0 %v5857_v39  ;;  %3721 = vmatpush1.bf16.msra.mxu1 %v5860_v43 }
 0x19e   :  { %3659 = vmatprep.subr.bf16.mxu0 %v5865_v49  ;;  %3723 = vmatprep.subr.bf16.mxu1 %v5867_v55 }
 0x1a1   :  { %3661 = vmatpush1.bf16.msra.mxu0 %v5869_v56  ;;  %3725 = vmatpush1.bf16.msra.mxu1 %v5872_v61 }
 0x1a2   :  { %3663 = vmatprep.subr.bf16.mxu0 %v5877_v4  ;;  %3727 = vmatprep.subr.bf16.mxu1 %v5879_v12 }
 0x1a5   :  { %3665 = vmatpush1.bf16.msra.mxu0 %v5881_v13  ;;  %3729 = vmatpush1.bf16.msra.mxu1 %v5884_v17 }
 0x1a6   :  { %3667 = vmatprep.subr.bf16.mxu0 %v5889_v28  ;;  %3731 = vmatprep.subr.bf16.mxu1 %v5891_v35 }
 0x1a9   :  { %3669 = vmatpush1.bf16.msra.mxu0 %v5893_v37  ;;  %3733 = vmatpush1.bf16.msra.mxu1 %v5896_v46 }
 0x1aa   :  { %3671 = vmatprep.subr.bf16.mxu0 %v7675_v58  ;;  %3735 = vmatprep.subr.bf16.mxu1 %v7676_v25  ;;  %v7686_v58 = vld [vmem:[#allocation62_spill] sm:$0xff]  ;;  %v7687_v25 = vld [vmem:[#allocation63_spill] sm:$0xff] }
 0x1ad   :  { %3673 = vmatpush1.bf16.msra.mxu0 %v7677_v9  ;;  %3737 = vmatpush1.bf16.msra.mxu1 %v7678_v8  ;;  %v7688_v9 = vld [vmem:[#allocation64_spill] sm:$0xff]  ;;  %v7689_v8 = vld [vmem:[#allocation65_spill] sm:$0xff] }
 0x1ae   :  { %3675 = vmatprep.subr.bf16.mxu0 %v7679_v29  ;;  %3739 = vmatprep.subr.bf16.mxu1 %v7680_v16  ;;  %v7690_v29 = vld [vmem:[#allocation66_spill] sm:$0xff]  ;;  %v7691_v16 = vld [vmem:[#allocation67_spill] sm:$0xff] }
 0x1b1   :  { %3677 = vmatpush1.bf16.msra.mxu0 %v7681_v24  ;;  %3741 = vmatpush1.bf16.msra.mxu1 %v7682_v52  ;;  %v7692_v24 = vld [vmem:[#allocation68_spill] sm:$0xff]  ;;  %v7693_v52 = vld [vmem:[#allocation69_spill] sm:$0xff] }
 0x1b2   :  { %3679 = vmatprep.subr.bf16.mxu0 %v7683_v53  ;;  %3743 = vmatprep.subr.bf16.mxu1 %v7684_v0  ;;  %v7694_v53 = vld [vmem:[#allocation70_spill] sm:$0xff]  ;;  %v7695_v0 = vld [vmem:[#allocation71_spill] sm:$0xff] }
 0x1b5   :  { %3681 = vmatpush1.bf16.msra.mxu0 %v7685_v2  ;;  %3745 = vmatpush1.bf16.msra.mxu1 %v7686_v58  ;;  %v7696_v2 = vld [vmem:[#allocation72_spill] sm:$0xff]  ;;  %v7697_v58 = vld [vmem:[#allocation73_spill] sm:$0xff] }
 0x1b6   :  { %3683 = vmatprep.subr.bf16.mxu0 %v7687_v25  ;;  %3747 = vmatprep.subr.bf16.mxu1 %v7688_v9  ;;  %v7698_v25 = vld [vmem:[#allocation74_spill] sm:$0xff]  ;;  %v7699_v9 = vld [vmem:[#allocation75_spill] sm:$0xff] }
 0x1b9   :  { %3685 = vmatpush1.bf16.msra.mxu0 %v7689_v8  ;;  %3749 = vmatpush1.bf16.msra.mxu1 %v7690_v29  ;;  %v7700_v8 = vld [vmem:[#allocation76_spill] sm:$0xff] }
 0x1ba   :  { %3687 = vmatprep.subr.bf16.mxu0 %v7691_v16  ;;  %3751 = vmatprep.subr.bf16.mxu1 %v7692_v24  ;;  %v646_v24 = vld [vmem:[%s7243_s4] sm:$0xf]  ;;  %v7701_v16 = vld [vmem:[#allocation77_spill] sm:$0xff] }
 0x1bb   :  { %v7706_v28 = vsub.s32 2, %v7701_v16 }
 0x1bd   :  { %3689 = vmatpush1.bf16.msra.mxu0 %v7693_v52  ;;  %3753 = vmatpush1.bf16.msra.mxu1 %v7694_v53  ;;  %v7702_v52 = vsub.s32 0, %v7701_v16  ;;  %v6314_v17 = vrot.slane %v646_v24, %v7706_v28 }
 0x1be   :  { %3691 = vmatprep.subr.bf16.mxu0 %v7695_v0  ;;  %3755 = vmatprep.subr.bf16.mxu1 %v7696_v2  ;;  %v7704_v0 = vsub.s32 1, %v7701_v16 }
 0x1bf   :  { %v6304_v29 = vrot.slane %v646_v24, %v7702_v52  ;;  %7707 = vst [vmem:[#allocation145_spill] sm:$0xff] %v6314_v17  ;;  %v7708_v52 = vsub.s32 3, %v7701_v16 }
 0x1c0   :  { %v6308_v53 = vrot.slane %v646_v24, %v7704_v0 }
 0x1c1   :  { %3693 = vmatpush1.bf16.msra.mxu0 %v7697_v58  ;;  %3757 = vmatpush1.bf16.msra.mxu1 %v7698_v25  ;;  %7703 = vst [vmem:[#allocation77_spill] sm:$0xff] %v6304_v29  ;;  %v6318_v0 = vrot.slane %v646_v24, %v7708_v52 }
 0x1c2   :  { %3759 = vmatprep.subr.bf16.mxu0 %v7699_v9  ;;  %3823 = vmatprep.subr.bf16.mxu1 %v7700_v8  ;;  %7705 = vst [vmem:[#allocation144_spill] sm:$0xff] %v6308_v53 }
 0x1c3   :  { %7709 = vst [vmem:[#allocation146_spill] sm:$0xff] %v6318_v0 }
 0x217   :  { %v762_v2 = vpop.f32.mrb[16].mxu0  ;;  %v833_v58 = vpop.f32.mrb[16].mxu1 }
 0x218   :  { %v980_v25 = vadd.f32 %v762_v2, %v6304_v29  ;;  %v764_v46 = vpop.f32.mrb[17].mxu0  ;;  %v835_v9 = vpop.f32.mrb[17].mxu1  ;;  %v982_v13 = vadd.f32 %v833_v58, %v6314_v17 }
 0x219   :  { %v981_v8 = vadd.f32 %v764_v46, %v6308_v53  ;;  %v983_v2 = vadd.f32 %v835_v9, %v6318_v0 }
 0x21a   :  { %v3319_v37 = vmul.f32 -1.442695, %v980_v25  ;;  %v3321_v29 = vmul.f32 -1.442695, %v982_v13 }
 0x21b   :  { %v3320_v35 = vmul.f32 -1.442695, %v981_v8 }
 0x21c   :  { %5376 = vpow2.f32 %v3319_v37 }
 0x21d   :  { %5378 = vpow2.f32 %v3320_v35 }
 0x21e   :  { %5380 = vtanh.f32 %v983_v2 }
 0x21f   :  { %5382 = vpow2.f32 %v3321_v29  ;;  %v7711_v29 = vld [vmem:[#allocation78_spill] sm:$0xff] }
 0x226   :  { %v5377_v12 = vpop.eup %5376 }
 0x227   :  { %v993_v4 = vadd.f32 1.0, %v5377_v12  ;;  %v5379_v46 = vpop.eup %5378 }
 0x228   :  { %v994_v37 = vadd.f32 1.0, %v5379_v46  ;;  %v5381_v28 = vpop.eup %5380 }
 0x229   :  { %5384 = vrcp.f32 %v993_v4  ;;  %v5383_v25 = vpop.eup %5382 }
 0x22a   :  { %5386 = vrcp.f32 %v994_v37  ;;  %v995_v24 = vadd.f32 1.0, %v5383_v25 }
 0x22c   :  { %5388 = vrcp.f32 %v995_v24 }
 0x233   :  { %v5385_v35 = vpop.eup %5384 }
 0x234   :  { %v1004_v8 = vmul.f32 %v5385_v35, %v5381_v28  ;;  %v5387_v16 = vpop.eup %5386  ;;  %v7712_v28 = vld [vmem:[#allocation79_spill] sm:$0xff] }
 0x235   :  { %v1003_v52 = vmul.f32 0.0, %v5387_v16 }
 0x236   :  { %v5389_v13 = vpop.eup %5388 }
 0x237   :  { %v6322_v53 = vadd.f32 %v1004_v8, %v1003_v52  ;;  %v7713_v8 = vld [vmem:[#allocation80_spill] sm:$0xff]  ;;  %v7714_v52 = vld [vmem:[#allocation81_spill] sm:$0xff] }
 0x239   :  { %7710 = vst [vmem:[#allocation147_spill] sm:$0xff] %v6322_v53  ;;  %5390 = vtanh.f32 %v6322_v53 }
 0x243   :  { %v5391_v12 = vpop.eup %5390 }
 0x244   :  { %v1007_v58 = vmul.f32 %v5391_v12, %v5389_v13 }
 0x246   :  { %1104 = vmatprep.mubr.f32.mxu0 %v1007_v58  ;;  %1175 = vmatprep.mubr.f32.mxu1 %v1007_v58 }
 0x257   :  { %v904_v4 = vpop.f32.mrb[2].mxu0  ;;  %v975_v9 = vpop.f32.mrb[2].mxu1 }
 0x258   :  { %v5294_v2 = vadd.f32 %v904_v4, %v7711_v29  ;;  %v906_v46 = vpop.f32.mrb[3].mxu0  ;;  %v977_v37 = vpop.f32.mrb[3].mxu1  ;;  %v5308_v24 = vadd.f32 %v975_v9, %v7713_v8 }
 0x259   :  { %v5295_v35 = vadd.f32 %v906_v46, %v7712_v28  ;;  %v5309_v53 = vadd.f32 %v977_v37, %v7714_v52 }
 0x25a   :  { %v3322_v25 = vmul.f32 -1.442695, %v5294_v2  ;;  %v3324_v0 = vmul.f32 -1.442695, %v5308_v24 }
 0x25b   :  { %v3323_v16 = vmul.f32 -1.442695, %v5295_v35 }
 0x25c   :  { %5392 = vpow2.f32 %v3322_v25 }
 0x25d   :  { %5394 = vpow2.f32 %v3323_v16  ;;  %v7715_v16 = vld [vmem:[#allocation82_spill] sm:$0xff] }
 0x25e   :  { %5396 = vtanh.f32 %v5309_v53 }
 0x25f   :  { %5398 = vpow2.f32 %v3324_v0  ;;  %v7717_v0 = vld [vmem:[#allocation84_spill] sm:$0xff] }
 0x266   :  { %v5393_v13 = vpop.eup %5392 }
 0x267   :  { %v1025_v12 = vadd.f32 1.0, %v5393_v13  ;;  %v5395_v17 = vpop.eup %5394  ;;  %v7721_v13 = vld [vmem:[#allocation88_spill] sm:$0xff] }
 0x268   :  { %v1026_v4 = vadd.f32 1.0, %v5395_v17  ;;  %v5397_v29 = vpop.eup %5396  ;;  %v7716_v17 = vld [vmem:[#allocation83_spill] sm:$0xff] }
 0x269   :  { %5400 = vrcp.f32 %v1025_v12  ;;  %v5399_v61 = vpop.eup %5398  ;;  %v7722_v12 = vld [vmem:[#allocation89_spill] sm:$0xff] }
 0x26a   :  { %5402 = vrcp.f32 %v1026_v4  ;;  %v1027_v25 = vadd.f32 1.0, %v5399_v61  ;;  %v7718_v61 = vld [vmem:[#allocation85_spill] sm:$0xff]  ;;  %v7723_v4 = vld [vmem:[#allocation90_spill] sm:$0xff] }
 0x26c   :  { %5404 = vrcp.f32 %v1027_v25  ;;  %v7728_v25 = vld [vmem:[#allocation95_spill] sm:$0xff] }
 0x273   :  { %v5401_v46 = vpop.eup %5400 }
 0x274   :  { %v1036_v2 = vmul.f32 %v5401_v46, %v5397_v29  ;;  %v5403_v35 = vpop.eup %5402  ;;  %v7719_v29 = vld [vmem:[#allocation86_spill] sm:$0xff]  ;;  %v7724_v46 = vld [vmem:[#allocation91_spill] sm:$0xff] }
 0x275   :  { %v1035_v28 = vmul.f32 %v5403_v35, %v7715_v16  ;;  %v7726_v35 = vld [vmem:[#allocation93_spill] sm:$0xff]  ;;  %v7729_v16 = vld [vmem:[#allocation96_spill] sm:$0xff] }
 0x276   :  { %v5405_v37 = vpop.eup %5404 }
 0x277   :  { %v6330_v9 = vadd.f32 %v1036_v2, %v1035_v28  ;;  %v7720_v28 = vld [vmem:[#allocation87_spill] sm:$0xff]  ;;  %v7725_v2 = vld [vmem:[#allocation92_spill] sm:$0xff] }
 0x279   :  { %5406 = vtanh.f32 %v6330_v9 }
 0x283   :  { %v5407_v53 = vpop.eup %5406 }
 0x284   :  { %v6333_v24 = vmul.f32 %v5407_v53, %v5405_v37  ;;  %v7730_v37 = vld [vmem:[#allocation97_spill] sm:$0xff]  ;;  %v7731_v53 = vld [vmem:[#allocation98_spill] sm:$0xff] }
 0x286   :  { %1105 = vmatmul.mubr.f32.vlgmr.msra.gmra.mrb[18].mxu0 %v6333_v24  ;;  %1176 = vmatmul.mubr.f32.vlgmr.msra.gmra.mrb[18].mxu1 %v6333_v24 }
 0x287   :  { %3761 = vmatpush1.bf16.msra.mxu0 %v7716_v17  ;;  %3825 = vmatpush1.bf16.msra.mxu1 %v7717_v0 }
 0x288   :  { %1246 = vmatprep.mubr.f32.mxu0 %v1007_v58  ;;  %1317 = vmatprep.mubr.f32.mxu1 %v1007_v58  ;;  %v7727_v58 = vld [vmem:[#allocation94_spill] sm:$0xff] }
 0x289   :  { %3763 = vmatprep.subr.bf16.mxu0 %v6045_v19  ;;  %3827 = vmatprep.subr.bf16.mxu1 %v7718_v61 }
 0x28b   :  { %3765 = vmatpush1.bf16.msra.mxu0 %v7719_v29  ;;  %3829 = vmatpush1.bf16.msra.mxu1 %v7720_v28 }
 0x28c   :  { %3767 = vmatprep.subr.bf16.mxu0 %v7721_v13  ;;  %3831 = vmatprep.subr.bf16.mxu1 %v7722_v12  ;;  %v7732_v13 = vld [vmem:[#allocation99_spill] sm:$0xff]  ;;  %v7733_v12 = vld [vmem:[#allocation100_spill] sm:$0xff] }
 0x28f   :  { %3769 = vmatpush1.bf16.msra.mxu0 %v7723_v4  ;;  %3833 = vmatpush1.bf16.msra.mxu1 %v7724_v46  ;;  %v7734_v4 = vld [vmem:[#allocation101_spill] sm:$0xff]  ;;  %v7735_v46 = vld [vmem:[#allocation102_spill] sm:$0xff] }
 0x290   :  { %3771 = vmatprep.subr.bf16.mxu0 %v7725_v2  ;;  %3835 = vmatprep.subr.bf16.mxu1 %v7726_v35  ;;  %v7736_v2 = vld [vmem:[#allocation103_spill] sm:$0xff]  ;;  %v7737_v35 = vld [vmem:[#allocation104_spill] sm:$0xff] }
 0x293   :  { %3773 = vmatpush1.bf16.msra.mxu0 %v7727_v58  ;;  %3837 = vmatpush1.bf16.msra.mxu1 %v7728_v25  ;;  %v7738_v58 = vld [vmem:[#allocation105_spill] sm:$0xff]  ;;  %v7739_v25 = vld [vmem:[#allocation106_spill] sm:$0xff] }
 0x294   :  { %3775 = vmatprep.subr.bf16.mxu0 %v7729_v16  ;;  %3839 = vmatprep.subr.bf16.mxu1 %v7730_v37  ;;  %v7740_v16 = vld [vmem:[#allocation107_spill] sm:$0xff]  ;;  %v7741_v37 = vld [vmem:[#allocation108_spill] sm:$0xff] }
 0x297   :  { %3777 = vmatpush1.bf16.msra.mxu0 %v7731_v53  ;;  %3841 = vmatpush1.bf16.msra.mxu1 %v7732_v13  ;;  %v7742_v53 = vld [vmem:[#allocation109_spill] sm:$0xff]  ;;  %v7743_v13 = vld [vmem:[#allocation110_spill] sm:$0xff] }
 0x298   :  { %3779 = vmatprep.subr.bf16.mxu0 %v7733_v12  ;;  %3843 = vmatprep.subr.bf16.mxu1 %v7734_v4  ;;  %v7744_v12 = vld [vmem:[#allocation111_spill] sm:$0xff]  ;;  %v7745_v4 = vld [vmem:[#allocation112_spill] sm:$0xff] }
 0x29b   :  { %3781 = vmatpush1.bf16.msra.mxu0 %v7735_v46  ;;  %3845 = vmatpush1.bf16.msra.mxu1 %v7736_v2  ;;  %v7746_v46 = vld [vmem:[#allocation113_spill] sm:$0xff]  ;;  %v7747_v2 = vld [vmem:[#allocation114_spill] sm:$0xff] }
 0x29c   :  { %3783 = vmatprep.subr.bf16.mxu0 %v7737_v35  ;;  %3847 = vmatprep.subr.bf16.mxu1 %v7738_v58  ;;  %v7748_v35 = vld [vmem:[#allocation115_spill] sm:$0xff]  ;;  %v7749_v58 = vld [vmem:[#allocation116_spill] sm:$0xff] }
 0x29f   :  { %3785 = vmatpush1.bf16.msra.mxu0 %v7739_v25  ;;  %3849 = vmatpush1.bf16.msra.mxu1 %v7740_v16  ;;  %v7750_v25 = vld [vmem:[#allocation117_spill] sm:$0xff]  ;;  %v7751_v16 = vld [vmem:[#allocation118_spill] sm:$0xff] }
 0x2a0   :  { %3787 = vmatprep.subr.bf16.mxu0 %v7741_v37  ;;  %3851 = vmatprep.subr.bf16.mxu1 %v7742_v53  ;;  %v7752_v37 = vld [vmem:[#allocation119_spill] sm:$0xff]  ;;  %v7753_v53 = vld [vmem:[#allocation120_spill] sm:$0xff] }
 0x2a3   :  { %3789 = vmatpush1.bf16.msra.mxu0 %v7743_v13  ;;  %3853 = vmatpush1.bf16.msra.mxu1 %v7744_v12  ;;  %v7754_v13 = vld [vmem:[#allocation121_spill] sm:$0xff]  ;;  %v7755_v12 = vld [vmem:[#allocation122_spill] sm:$0xff] }
 0x2a4   :  { %3791 = vmatprep.subr.bf16.mxu0 %v7745_v4  ;;  %3855 = vmatprep.subr.bf16.mxu1 %v7746_v46  ;;  %v7756_v4 = vld [vmem:[#allocation123_spill] sm:$0xff]  ;;  %v7757_v46 = vld [vmem:[#allocation124_spill] sm:$0xff] }
 0x2a7   :  { %3793 = vmatpush1.bf16.msra.mxu0 %v7747_v2  ;;  %3857 = vmatpush1.bf16.msra.mxu1 %v7748_v35  ;;  %v7758_v2 = vld [vmem:[#allocation125_spill] sm:$0xff]  ;;  %v7759_v35 = vld [vmem:[#allocation126_spill] sm:$0xff] }
 0x2a8   :  { %3795 = vmatprep.subr.bf16.mxu0 %v7749_v58  ;;  %3859 = vmatprep.subr.bf16.mxu1 %v7750_v25  ;;  %v7760_v58 = vld [vmem:[#allocation127_spill] sm:$0xff]  ;;  %v7761_v25 = vld [vmem:[#allocation128_spill] sm:$0xff] }
 0x2ab   :  { %3797 = vmatpush1.bf16.msra.mxu0 %v7751_v16  ;;  %3861 = vmatpush1.bf16.msra.mxu1 %v7752_v37  ;;  %v7762_v16 = vld [vmem:[#allocation129_spill] sm:$0xff]  ;;  %v7763_v37 = vld [vmem:[#allocation130_spill] sm:$0xff] }
 0x2ac   :  { %3799 = vmatprep.subr.bf16.mxu0 %v7753_v53  ;;  %3863 = vmatprep.subr.bf16.mxu1 %v7754_v13  ;;  %v7764_v53 = vld [vmem:[#allocation131_spill] sm:$0xff] }
 0x2af   :  { %3801 = vmatpush1.bf16.msra.mxu0 %v7755_v12  ;;  %3865 = vmatpush1.bf16.msra.mxu1 %v7756_v4 }
 0x2b0   :  { %3803 = vmatprep.subr.bf16.mxu0 %v7757_v46  ;;  %3867 = vmatprep.subr.bf16.mxu1 %v7758_v2 }
 0x2b3   :  { %3805 = vmatpush1.bf16.msra.mxu0 %v7759_v35  ;;  %3869 = vmatpush1.bf16.msra.mxu1 %v7760_v58 }
 0x2b4   :  { %3807 = vmatprep.subr.bf16.mxu0 %v7761_v25  ;;  %3871 = vmatprep.subr.bf16.mxu1 %v7762_v16 }
 0x2b7   :  { %3809 = vmatpush1.bf16.msra.mxu0 %v7763_v37  ;;  %3873 = vmatpush1.bf16.msra.mxu1 %v7764_v53 }
 0x2b8   :  { %3811 = vmatprep.subr.bf16.mxu0 %v6193_v34  ;;  %3875 = vmatprep.subr.bf16.mxu1 %v6195_v42 }
 0x2bb   :  { %3813 = vmatpush1.bf16.msra.mxu0 %v6199_v41  ;;  %3877 = vmatpush1.bf16.msra.mxu1 %v6201_v59 }
 0x2bc   :  { %3815 = vmatprep.subr.bf16.mxu0 %v6205_v50  ;;  %3879 = vmatprep.subr.bf16.mxu1 %v6207_v48 }
 0x2bf   :  { %3817 = vmatpush1.bf16.msra.mxu0 %v6211_v62  ;;  %3881 = vmatpush1.bf16.msra.mxu1 %v6213_v45 }
 0x2c0   :  { %3819 = vmatprep.subr.bf16.mxu0 %v6217_v14  ;;  %3883 = vmatprep.subr.bf16.mxu1 %v6219_v1 }
 0x2c3   :  { %3821 = vmatpush1.bf16.msra.mxu0 %v6223_v5  ;;  %3885 = vmatpush1.bf16.msra.mxu1 %v6225_v30 }
 0x2c4   :  { %3887 = vmatprep.subr.bf16.mxu0 %v5777_v18  ;;  %3951 = vmatprep.subr.bf16.mxu1 %v5779_v22 }
 0x2c6   :  { %1247 = vmatmul.mubr.f32.vlgmr.msra.gmra.mrb[4].mxu0 %v6333_v24  ;;  %1318 = vmatmul.mubr.f32.vlgmr.msra.gmra.mrb[4].mxu1 %v6333_v24  ;;  %v7765_v24 = vld [vmem:[#allocation42_spill] sm:$0xff] }
 0x2c7   :  { %3889 = vmatpush1.bf16.msra.mxu0 %v5781_v23  ;;  %3953 = vmatpush1.bf16.msra.mxu1 %v5784_v27 }
 0x2c8   :  { %3891 = vmatprep.subr.bf16.mxu0 %v5788_v31  ;;  %3955 = vmatprep.subr.bf16.mxu1 %v5790_v32 }
 0x2cb   :  { %3893 = vmatpush1.bf16.msra.mxu0 %v5793_v36  ;;  %3957 = vmatpush1.bf16.msra.mxu1 %v5801_v44 }
 0x2cc   :  { %3895 = vmatprep.subr.bf16.mxu0 %v5798_v40  ;;  %3959 = vmatprep.subr.bf16.mxu1 %v5805_v47 }
 0x2cf   :  { %3897 = vmatpush1.bf16.msra.mxu0 %v5808_v51  ;;  %3961 = vmatpush1.bf16.msra.mxu1 %v5814_v57 }
 0x2d0   :  { %3899 = vmatprep.subr.bf16.mxu0 %v5811_v54  ;;  %3963 = vmatprep.subr.bf16.mxu1 %v5817_v60 }
 0x2d3   :  { %3901 = vmatpush1.bf16.msra.mxu0 %v5820_v63  ;;  %3965 = vmatpush1.bf16.msra.mxu1 %v5826_v6 }
 0x2d4   :  { %3903 = vmatprep.subr.bf16.mxu0 %v5823_v3  ;;  %3967 = vmatprep.subr.bf16.mxu1 %v5829_v7  ;;  %v7803_v3 = vld [vmem:[#allocation146_spill] sm:$0xff] }
 0x2d7   :  { %3905 = vmatpush1.bf16.msra.mxu0 %v5832_v10  ;;  %3969 = vmatpush1.bf16.msra.mxu1 %v5836_v11  ;;  %v7801_v10 = vld [vmem:[#allocation144_spill] sm:$0xff] }
 0x2d8   :  { %3907 = vmatprep.subr.bf16.mxu0 %v5841_v15  ;;  %3971 = vmatprep.subr.bf16.mxu1 %v5843_v20  ;;  %v7766_v20 = vld [vmem:[#allocation43_spill] sm:$0xff]  ;;  %v7800_v15 = vld [vmem:[#allocation77_spill] sm:$0xff] }
 0x2db   :  { %3909 = vmatpush1.bf16.msra.mxu0 %v5845_v21  ;;  %3973 = vmatpush1.bf16.msra.mxu1 %v5848_v26  ;;  %v7767_v21 = vld [vmem:[#allocation44_spill] sm:$0xff]  ;;  %v7768_v26 = vld [vmem:[#allocation45_spill] sm:$0xff] }
 0x2dc   :  { %3911 = vmatprep.subr.bf16.mxu0 %v5853_v33  ;;  %3975 = vmatprep.subr.bf16.mxu1 %v5855_v38  ;;  %v7769_v33 = vld [vmem:[#allocation46_spill] sm:$0xff]  ;;  %v7770_v38 = vld [vmem:[#allocation47_spill] sm:$0xff] }
 0x2df   :  { %3913 = vmatpush1.bf16.msra.mxu0 %v5857_v39  ;;  %3977 = vmatpush1.bf16.msra.mxu1 %v5860_v43  ;;  %v7771_v39 = vld [vmem:[#allocation48_spill] sm:$0xff]  ;;  %v7772_v43 = vld [vmem:[#allocation49_spill] sm:$0xff] }
 0x2e0   :  { %3915 = vmatprep.subr.bf16.mxu0 %v5865_v49  ;;  %3979 = vmatprep.subr.bf16.mxu1 %v5867_v55  ;;  %v7773_v49 = vld [vmem:[#allocation50_spill] sm:$0xff]  ;;  %v7774_v55 = vld [vmem:[#allocation51_spill] sm:$0xff] }
 0x2e3   :  { %3917 = vmatpush1.bf16.msra.mxu0 %v5869_v56  ;;  %3981 = vmatpush1.bf16.msra.mxu1 %v7765_v24  ;;  %v7775_v56 = vld [vmem:[#allocation52_spill] sm:$0xff]  ;;  %v7776_v24 = vld [vmem:[#allocation53_spill] sm:$0xff] }
 0x2e4   :  { %3919 = vmatprep.subr.bf16.mxu0 %v7766_v20  ;;  %3983 = vmatprep.subr.bf16.mxu1 %v7767_v21  ;;  %v7777_v20 = vld [vmem:[#allocation54_spill] sm:$0xff]  ;;  %v7778_v21 = vld [vmem:[#allocation55_spill] sm:$0xff] }
 0x2e7   :  { %3921 = vmatpush1.bf16.msra.mxu0 %v7768_v26  ;;  %3985 = vmatpush1.bf16.msra.mxu1 %v7769_v33  ;;  %v7779_v26 = vld [vmem:[#allocation56_spill] sm:$0xff]  ;;  %v7780_v33 = vld [vmem:[#allocation57_spill] sm:$0xff] }
 0x2e8   :  { %3923 = vmatprep.subr.bf16.mxu0 %v7770_v38  ;;  %3987 = vmatprep.subr.bf16.mxu1 %v7771_v39  ;;  %v7781_v38 = vld [vmem:[#allocation58_spill] sm:$0xff]  ;;  %v7782_v39 = vld [vmem:[#allocation59_spill] sm:$0xff] }
 0x2eb   :  { %3925 = vmatpush1.bf16.msra.mxu0 %v7772_v43  ;;  %3989 = vmatpush1.bf16.msra.mxu1 %v7773_v49  ;;  %v7783_v43 = vld [vmem:[#allocation60_spill] sm:$0xff]  ;;  %v7784_v49 = vld [vmem:[#allocation61_spill] sm:$0xff] }
 0x2ec   :  { %3927 = vmatprep.subr.bf16.mxu0 %v7774_v55  ;;  %3991 = vmatprep.subr.bf16.mxu1 %v7775_v56  ;;  %v7785_v55 = vld [vmem:[#allocation62_spill] sm:$0xff]  ;;  %v7786_v56 = vld [vmem:[#allocation63_spill] sm:$0xff] }
 0x2ef   :  { %3929 = vmatpush1.bf16.msra.mxu0 %v7776_v24  ;;  %3993 = vmatpush1.bf16.msra.mxu1 %v7777_v20  ;;  %v7787_v24 = vld [vmem:[#allocation64_spill] sm:$0xff]  ;;  %v7788_v20 = vld [vmem:[#allocation65_spill] sm:$0xff] }
 0x2f0   :  { %3931 = vmatprep.subr.bf16.mxu0 %v7778_v21  ;;  %3995 = vmatprep.subr.bf16.mxu1 %v7779_v26  ;;  %v7789_v21 = vld [vmem:[#allocation66_spill] sm:$0xff]  ;;  %v7790_v26 = vld [vmem:[#allocation67_spill] sm:$0xff] }
 0x2f3   :  { %3933 = vmatpush1.bf16.msra.mxu0 %v7780_v33  ;;  %3997 = vmatpush1.bf16.msra.mxu1 %v7781_v38  ;;  %v7791_v33 = vld [vmem:[#allocation68_spill] sm:$0xff]  ;;  %v7792_v38 = vld [vmem:[#allocation69_spill] sm:$0xff] }
 0x2f4   :  { %3935 = vmatprep.subr.bf16.mxu0 %v7782_v39  ;;  %3999 = vmatprep.subr.bf16.mxu1 %v7783_v43  ;;  %v7793_v39 = vld [vmem:[#allocation70_spill] sm:$0xff]  ;;  %v7794_v43 = vld [vmem:[#allocation71_spill] sm:$0xff] }
 0x2f7   :  { %3937 = vmatpush1.bf16.msra.mxu0 %v7784_v49  ;;  %4001 = vmatpush1.bf16.msra.mxu1 %v7785_v55  ;;  %v7795_v49 = vld [vmem:[#allocation72_spill] sm:$0xff]  ;;  %v7796_v55 = vld [vmem:[#allocation73_spill] sm:$0xff] }
 0x2f8   :  { %3939 = vmatprep.subr.bf16.mxu0 %v7786_v56  ;;  %4003 = vmatprep.subr.bf16.mxu1 %v7787_v24  ;;  %v7797_v56 = vld [vmem:[#allocation74_spill] sm:$0xff]  ;;  %v7798_v24 = vld [vmem:[#allocation75_spill] sm:$0xff] }
 0x2fb   :  { %3941 = vmatpush1.bf16.msra.mxu0 %v7788_v20  ;;  %4005 = vmatpush1.bf16.msra.mxu1 %v7789_v21  ;;  %v7799_v20 = vld [vmem:[#allocation76_spill] sm:$0xff] }
 0x2fc   :  { %3943 = vmatprep.subr.bf16.mxu0 %v7790_v26  ;;  %4007 = vmatprep.subr.bf16.mxu1 %v7791_v33 }
 0x2ff   :  { %3945 = vmatpush1.bf16.msra.mxu0 %v7792_v38  ;;  %4009 = vmatpush1.bf16.msra.mxu1 %v7793_v39 }
 0x300   :  { %3947 = vmatprep.subr.bf16.mxu0 %v7794_v43  ;;  %4011 = vmatprep.subr.bf16.mxu1 %v7795_v49  ;;  %v7802_v49 = vld [vmem:[#allocation145_spill] sm:$0xff] }
 0x303   :  { %3949 = vmatpush1.bf16.msra.mxu0 %v7796_v55  ;;  %4013 = vmatpush1.bf16.msra.mxu1 %v7797_v56 }
 0x304   :  { %4015 = vmatprep.subr.bf16.mxu0 %v7798_v24  ;;  %4079 = vmatprep.subr.bf16.mxu1 %v7799_v20 }
 0x359   :  { %v1106_v21 = vpop.f32.mrb[18].mxu0  ;;  %v1177_v26 = vpop.f32.mrb[18].mxu1 }
 0x35a   :  { %v1324_v33 = vadd.f32 %v1106_v21, %v7800_v15  ;;  %v1108_v11 = vpop.f32.mrb[19].mxu0  ;;  %v1179_v38 = vpop.f32.mrb[19].mxu1  ;;  %v1326_v55 = vadd.f32 %v1177_v26, %v7802_v49 }
 0x35b   :  { %v1325_v39 = vadd.f32 %v1108_v11, %v7801_v10  ;;  %v1327_v56 = vadd.f32 %v1179_v38, %v7803_v3 }
 0x35c   :  { %v3325_v7 = vmul.f32 -1.442695, %v1324_v33  ;;  %v3327_v6 = vmul.f32 -1.442695, %v1326_v55 }
 0x35d   :  { %v3326_v43 = vmul.f32 -1.442695, %v1325_v39 }
 0x35e   :  { %5408 = vpow2.f32 %v3325_v7 }
 0x35f   :  { %5410 = vpow2.f32 %v3326_v43  ;;  %v7804_v43 = vld [vmem:[#allocation147_spill] sm:$0xff] }
 0x360   :  { %5412 = vtanh.f32 %v1327_v56 }
 0x361   :  { %5414 = vpow2.f32 %v3327_v6 }
 0x368   :  { %v5409_v24 = vpop.eup %5408 }
 0x369   :  { %v1337_v63 = vadd.f32 1.0, %v5409_v24  ;;  %v5411_v20 = vpop.eup %5410 }
 0x36a   :  { %v1338_v21 = vadd.f32 1.0, %v5411_v20  ;;  %v5413_v15 = vpop.eup %5412  ;;  %v7806_v20 = vld [vmem:[#allocation78_spill] sm:$0xff] }
 0x36b   :  { %5416 = vrcp.f32 %v1337_v63  ;;  %v5415_v60 = vpop.eup %5414 }
 0x36c   :  { %5418 = vrcp.f32 %v1338_v21  ;;  %v1339_v7 = vadd.f32 1.0, %v5415_v60 }
 0x36e   :  { %5420 = vrcp.f32 %v1339_v7 }
 0x375   :  { %v5417_v11 = vpop.eup %5416 }
 0x376   :  { %v1348_v33 = vmul.f32 %v5417_v11, %v5413_v15  ;;  %v5419_v39 = vpop.eup %5418  ;;  %v7807_v11 = vld [vmem:[#allocation79_spill] sm:$0xff] }
 0x377   :  { %v1347_v10 = vmul.f32 %v5419_v39, %v7804_v43 }
 0x378   :  { %v5421_v38 = vpop.eup %5420 }
 0x379   :  { %v6472_v26 = vadd.f32 %v1348_v33, %v1347_v10 }
 0x37b   :  { %7805 = vst [vmem:[#allocation80_spill] sm:$0xff] %v6472_v26  ;;  %5422 = vtanh.f32 %v6472_v26 }
 0x385   :  { %v5423_v55 = vpop.eup %5422 }
 0x386   :  { %v1351_v56 = vmul.f32 %v5423_v55, %v5421_v38 }
 0x388   :  { %1448 = vmatprep.mubr.f32.mxu0 %v1351_v56  ;;  %1519 = vmatprep.mubr.f32.mxu1 %v1351_v56 }
 0x399   :  { %v1248_v63 = vpop.f32.mrb[4].mxu0  ;;  %v1319_v6 = vpop.f32.mrb[4].mxu1 }
 0x39a   :  { %v5296_v24 = vadd.f32 %v1248_v63, %v7806_v20  ;;  %v1250_v21 = vpop.f32.mrb[5].mxu0  ;;  %v1321_v15 = vpop.f32.mrb[5].mxu1  ;;  %v5310_v10 = vadd.f32 %v1319_v6, %v7713_v8 }
 0x39b   :  { %v5297_v60 = vadd.f32 %v1250_v21, %v7807_v11  ;;  %v5311_v33 = vadd.f32 %v1321_v15, %v7714_v52 }
 0x39c   :  { %v3328_v3 = vmul.f32 -1.442695, %v5296_v24  ;;  %v3330_v7 = vmul.f32 -1.442695, %v5310_v10 }
 0x39d   :  { %v3329_v39 = vmul.f32 -1.442695, %v5297_v60 }
 0x39e   :  { %5424 = vpow2.f32 %v3328_v3 }
 0x39f   :  { %5426 = vpow2.f32 %v3329_v39 }
 0x3a0   :  { %5428 = vtanh.f32 %v5311_v33 }
 0x3a1   :  { %5430 = vpow2.f32 %v3330_v7  ;;  %v7811_v7 = vld [vmem:[#allocation91_spill] sm:$0xff] }
 0x3a8   :  { %v5425_v43 = vpop.eup %5424 }
 0x3a9   :  { %v1369_v38 = vadd.f32 1.0, %v5425_v43  ;;  %v5427_v55 = vpop.eup %5426  ;;  %v7812_v43 = vld [vmem:[#allocation92_spill] sm:$0xff] }
 0x3aa   :  { %v1370_v63 = vadd.f32 1.0, %v5427_v55  ;;  %v5429_v20 = vpop.eup %5428  ;;  %v7815_v55 = vld [vmem:[#allocation95_spill] sm:$0xff] }
 0x3ab   :  { %5432 = vrcp.f32 %v1369_v38  ;;  %v5431_v26 = vpop.eup %5430  ;;  %v7813_v38 = vld [vmem:[#allocation93_spill] sm:$0xff] }
 0x3ac   :  { %5434 = vrcp.f32 %v1370_v63  ;;  %v1371_v3 = vadd.f32 1.0, %v5431_v26  ;;  %v7809_v26 = vld [vmem:[#allocation89_spill] sm:$0xff]  ;;  %v7816_v63 = vld [vmem:[#allocation96_spill] sm:$0xff] }
 0x3ae   :  { %5436 = vrcp.f32 %v1371_v3  ;;  %v7820_v3 = vld [vmem:[#allocation100_spill] sm:$0xff] }
 0x3b5   :  { %v5433_v21 = vpop.eup %5432 }
 0x3b6   :  { %v1380_v24 = vmul.f32 %v5433_v21, %v5429_v20  ;;  %v5435_v60 = vpop.eup %5434  ;;  %v7810_v20 = vld [vmem:[#allocation90_spill] sm:$0xff]  ;;  %v7817_v21 = vld [vmem:[#allocation97_spill] sm:$0xff] }
 0x3b7   :  { %v1379_v39 = vmul.f32 %v5435_v60, %v6330_v9  ;;  %v7808_v9 = vld [vmem:[#allocation88_spill] sm:$0xff]  ;;  %v7819_v60 = vld [vmem:[#allocation99_spill] sm:$0xff] }
 0x3b8   :  { %v5437_v15 = vpop.eup %5436 }
 0x3b9   :  { %v6480_v6 = vadd.f32 %v1380_v24, %v1379_v39  ;;  %v7818_v24 = vld [vmem:[#allocation98_spill] sm:$0xff]  ;;  %v7821_v39 = vld [vmem:[#allocation101_spill] sm:$0xff] }
 0x3bb   :  { %5438 = vtanh.f32 %v6480_v6 }
 0x3c5   :  { %v5439_v10 = vpop.eup %5438 }
 0x3c6   :  { %v6483_v33 = vmul.f32 %v5439_v10, %v5437_v15  ;;  %v7822_v15 = vld [vmem:[#allocation102_spill] sm:$0xff]  ;;  %v7823_v10 = vld [vmem:[#allocation103_spill] sm:$0xff] }
 0x3c8   :  { %1449 = vmatmul.mubr.f32.vlgmr.msra.gmra.mrb[20].mxu0 %v6483_v33  ;;  %1520 = vmatmul.mubr.f32.vlgmr.msra.gmra.mrb[20].mxu1 %v6483_v33 }
 0x3c9   :  { %4017 = vmatpush1.bf16.msra.mxu0 %v7716_v17  ;;  %4081 = vmatpush1.bf16.msra.mxu1 %v7717_v0 }
 0x3ca   :  { %1590 = vmatprep.mubr.f32.mxu0 %v1351_v56  ;;  %1661 = vmatprep.mubr.f32.mxu1 %v1351_v56  ;;  %v7814_v56 = vld [vmem:[#allocation94_spill] sm:$0xff] }
 0x3cb   :  { %4019 = vmatprep.subr.bf16.mxu0 %v6045_v19  ;;  %4083 = vmatprep.subr.bf16.mxu1 %v7718_v61 }
 0x3cd   :  { %4021 = vmatpush1.bf16.msra.mxu0 %v7719_v29  ;;  %4085 = vmatpush1.bf16.msra.mxu1 %v7720_v28 }
 0x3ce   :  { %4023 = vmatprep.subr.bf16.mxu0 %v7808_v9  ;;  %4087 = vmatprep.subr.bf16.mxu1 %v7809_v26 }
 0x3d1   :  { %4025 = vmatpush1.bf16.msra.mxu0 %v7810_v20  ;;  %4089 = vmatpush1.bf16.msra.mxu1 %v7811_v7 }
 0x3d2   :  { %4027 = vmatprep.subr.bf16.mxu0 %v7812_v43  ;;  %4091 = vmatprep.subr.bf16.mxu1 %v7813_v38  ;;  %v7824_v38 = vld [vmem:[#allocation104_spill] sm:$0xff] }
 0x3d5   :  { %4029 = vmatpush1.bf16.msra.mxu0 %v7814_v56  ;;  %4093 = vmatpush1.bf16.msra.mxu1 %v7815_v55  ;;  %v7825_v56 = vld [vmem:[#allocation105_spill] sm:$0xff]  ;;  %v7826_v55 = vld [vmem:[#allocation106_spill] sm:$0xff] }
 0x3d6   :  { %4031 = vmatprep.subr.bf16.mxu0 %v7816_v63  ;;  %4095 = vmatprep.subr.bf16.mxu1 %v7817_v21  ;;  %v7827_v63 = vld [vmem:[#allocation107_spill] sm:$0xff]  ;;  %v7828_v21 = vld [vmem:[#allocation108_spill] sm:$0xff] }
 0x3d9   :  { %4033 = vmatpush1.bf16.msra.mxu0 %v7818_v24  ;;  %4097 = vmatpush1.bf16.msra.mxu1 %v7819_v60  ;;  %v7829_v24 = vld [vmem:[#allocation109_spill] sm:$0xff]  ;;  %v7830_v60 = vld [vmem:[#allocation110_spill] sm:$0xff] }
 0x3da   :  { %4035 = vmatprep.subr.bf16.mxu0 %v7820_v3  ;;  %4099 = vmatprep.subr.bf16.mxu1 %v7821_v39  ;;  %v7831_v3 = vld [vmem:[#allocation111_spill] sm:$0xff]  ;;  %v7832_v39 = vld [vmem:[#allocation112_spill] sm:$0xff] }
 0x3dd   :  { %4037 = vmatpush1.bf16.msra.mxu0 %v7822_v15  ;;  %4101 = vmatpush1.bf16.msra.mxu1 %v7823_v10  ;;  %v7833_v15 = vld [vmem:[#allocation113_spill] sm:$0xff]  ;;  %v7834_v10 = vld [vmem:[#allocation114_spill] sm:$0xff] }
 0x3de   :  { %4039 = vmatprep.subr.bf16.mxu0 %v7824_v38  ;;  %4103 = vmatprep.subr.bf16.mxu1 %v7825_v56  ;;  %v7835_v38 = vld [vmem:[#allocation115_spill] sm:$0xff]  ;;  %v7836_v56 = vld [vmem:[#allocation116_spill] sm:$0xff] }
 0x3e1   :  { %4041 = vmatpush1.bf16.msra.mxu0 %v7826_v55  ;;  %4105 = vmatpush1.bf16.msra.mxu1 %v7827_v63  ;;  %v7837_v55 = vld [vmem:[#allocation117_spill] sm:$0xff]  ;;  %v7838_v63 = vld [vmem:[#allocation118_spill] sm:$0xff] }
 0x3e2   :  { %4043 = vmatprep.subr.bf16.mxu0 %v7828_v21  ;;  %4107 = vmatprep.subr.bf16.mxu1 %v7829_v24  ;;  %v7839_v21 = vld [vmem:[#allocation119_spill] sm:$0xff]  ;;  %v7840_v24 = vld [vmem:[#allocation120_spill] sm:$0xff] }
 0x3e5   :  { %4045 = vmatpush1.bf16.msra.mxu0 %v7830_v60  ;;  %4109 = vmatpush1.bf16.msra.mxu1 %v7831_v3 }
 0x3e6   :  { %4047 = vmatprep.subr.bf16.mxu0 %v7832_v39  ;;  %4111 = vmatprep.subr.bf16.mxu1 %v7833_v15 }
 0x3e9   :  { %4049 = vmatpush1.bf16.msra.mxu0 %v7834_v10  ;;  %4113 = vmatpush1.bf16.msra.mxu1 %v7835_v38 }
 0x3ea   :  { %4051 = vmatprep.subr.bf16.mxu0 %v7836_v56  ;;  %4115 = vmatprep.subr.bf16.mxu1 %v7837_v55 }
 0x3ed   :  { %4053 = vmatpush1.bf16.msra.mxu0 %v7838_v63  ;;  %4117 = vmatpush1.bf16.msra.mxu1 %v7839_v21 }
 0x3ee   :  { %4055 = vmatprep.subr.bf16.mxu0 %v7840_v24  ;;  %4119 = vmatprep.subr.bf16.mxu1 %v7754_v13 }
 0x3f1   :  { %4057 = vmatpush1.bf16.msra.mxu0 %v7755_v12  ;;  %4121 = vmatpush1.bf16.msra.mxu1 %v7756_v4 }
 0x3f2   :  { %4059 = vmatprep.subr.bf16.mxu0 %v7757_v46  ;;  %4123 = vmatprep.subr.bf16.mxu1 %v7758_v2 }
 0x3f5   :  { %4061 = vmatpush1.bf16.msra.mxu0 %v7759_v35  ;;  %4125 = vmatpush1.bf16.msra.mxu1 %v7760_v58 }
 0x3f6   :  { %4063 = vmatprep.subr.bf16.mxu0 %v7761_v25  ;;  %4127 = vmatprep.subr.bf16.mxu1 %v7762_v16 }
 0x3f9   :  { %4065 = vmatpush1.bf16.msra.mxu0 %v7763_v37  ;;  %4129 = vmatpush1.bf16.msra.mxu1 %v7764_v53 }
 0x3fa   :  { %4067 = vmatprep.subr.bf16.mxu0 %v6193_v34  ;;  %4131 = vmatprep.subr.bf16.mxu1 %v6195_v42 }
 0x3fd   :  { %4069 = vmatpush1.bf16.msra.mxu0 %v6199_v41  ;;  %4133 = vmatpush1.bf16.msra.mxu1 %v6201_v59 }
 0x3fe   :  { %4071 = vmatprep.subr.bf16.mxu0 %v6205_v50  ;;  %4135 = vmatprep.subr.bf16.mxu1 %v6207_v48 }
 0x401   :  { %4073 = vmatpush1.bf16.msra.mxu0 %v6211_v62  ;;  %4137 = vmatpush1.bf16.msra.mxu1 %v6213_v45 }
 0x402   :  { %4075 = vmatprep.subr.bf16.mxu0 %v6217_v14  ;;  %4139 = vmatprep.subr.bf16.mxu1 %v6219_v1 }
 0x405   :  { %4077 = vmatpush1.bf16.msra.mxu0 %v6223_v5  ;;  %4141 = vmatpush1.bf16.msra.mxu1 %v6225_v30 }
 0x406   :  { %4143 = vmatprep.subr.bf16.mxu0 %v5777_v18  ;;  %4207 = vmatprep.subr.bf16.mxu1 %v5779_v22  ;;  %v7895_v18 = vld [vmem:[#allocation144_spill] sm:$0xff] }
 0x408   :  { %1591 = vmatmul.mubr.f32.vlgmr.msra.gmra.mrb[6].mxu0 %v6483_v33  ;;  %1662 = vmatmul.mubr.f32.vlgmr.msra.gmra.mrb[6].mxu1 %v6483_v33  ;;  %v7841_v33 = vld [vmem:[#allocation24_spill] sm:$0xff] }
 0x409   :  { %4145 = vmatpush1.bf16.msra.mxu0 %v5781_v23  ;;  %4209 = vmatpush1.bf16.msra.mxu1 %v5784_v27  ;;  %v7842_v27 = vld [vmem:[#allocation25_spill] sm:$0xff] }
 0x40a   :  { %4147 = vmatprep.subr.bf16.mxu0 %v5788_v31  ;;  %4211 = vmatprep.subr.bf16.mxu1 %v5790_v32  ;;  %v7843_v31 = vld [vmem:[#allocation27_spill] sm:$0xff]  ;;  %v7844_v32 = vld [vmem:[#allocation26_spill] sm:$0xff]  ;;  %v7894_v23 = vld [vmem:[#allocation77_spill] sm:$0xff] }
 0x40d   :  { %4149 = vmatpush1.bf16.msra.mxu0 %v5793_v36  ;;  %4213 = vmatpush1.bf16.msra.mxu1 %v5801_v44  ;;  %v7845_v36 = vld [vmem:[#allocation28_spill] sm:$0xff]  ;;  %v7846_v44 = vld [vmem:[#allocation29_spill] sm:$0xff] }
 0x40e   :  { %4151 = vmatprep.subr.bf16.mxu0 %v5798_v40  ;;  %4215 = vmatprep.subr.bf16.mxu1 %v5805_v47  ;;  %v7847_v40 = vld [vmem:[#allocation30_spill] sm:$0xff]  ;;  %v7848_v47 = vld [vmem:[#allocation31_spill] sm:$0xff] }
 0x411   :  { %4153 = vmatpush1.bf16.msra.mxu0 %v5808_v51  ;;  %4217 = vmatpush1.bf16.msra.mxu1 %v5814_v57  ;;  %v7849_v51 = vld [vmem:[#allocation32_spill] sm:$0xff]  ;;  %v7850_v57 = vld [vmem:[#allocation33_spill] sm:$0xff] }
 0x412   :  { %4155 = vmatprep.subr.bf16.mxu0 %v5811_v54  ;;  %4219 = vmatprep.subr.bf16.mxu1 %v7841_v33  ;;  %v7851_v54 = vld [vmem:[#allocation34_spill] sm:$0xff]  ;;  %v7852_v33 = vld [vmem:[#allocation35_spill] sm:$0xff] }
 0x415   :  { %4157 = vmatpush1.bf16.msra.mxu0 %v7842_v27  ;;  %4221 = vmatpush1.bf16.msra.mxu1 %v7843_v31  ;;  %v7853_v27 = vld [vmem:[#allocation36_spill] sm:$0xff]  ;;  %v7854_v31 = vld [vmem:[#allocation37_spill] sm:$0xff] }
 0x416   :  { %4159 = vmatprep.subr.bf16.mxu0 %v7844_v32  ;;  %4223 = vmatprep.subr.bf16.mxu1 %v7845_v36  ;;  %v7855_v32 = vld [vmem:[#allocation38_spill] sm:$0xff]  ;;  %v7856_v36 = vld [vmem:[#allocation39_spill] sm:$0xff] }
 0x419   :  { %4161 = vmatpush1.bf16.msra.mxu0 %v7846_v44  ;;  %4225 = vmatpush1.bf16.msra.mxu1 %v7847_v40  ;;  %v7857_v44 = vld [vmem:[#allocation40_spill] sm:$0xff]  ;;  %v7858_v40 = vld [vmem:[#allocation41_spill] sm:$0xff] }
 0x41a   :  { %4163 = vmatprep.subr.bf16.mxu0 %v7848_v47  ;;  %4227 = vmatprep.subr.bf16.mxu1 %v7849_v51  ;;  %v7859_v47 = vld [vmem:[#allocation42_spill] sm:$0xff]  ;;  %v7860_v51 = vld [vmem:[#allocation43_spill] sm:$0xff] }
 0x41d   :  { %4165 = vmatpush1.bf16.msra.mxu0 %v7850_v57  ;;  %4229 = vmatpush1.bf16.msra.mxu1 %v7851_v54  ;;  %v7861_v57 = vld [vmem:[#allocation44_spill] sm:$0xff]  ;;  %v7862_v54 = vld [vmem:[#allocation45_spill] sm:$0xff] }
 0x41e   :  { %4167 = vmatprep.subr.bf16.mxu0 %v7852_v33  ;;  %4231 = vmatprep.subr.bf16.mxu1 %v7853_v27  ;;  %v7863_v33 = vld [vmem:[#allocation46_spill] sm:$0xff]  ;;  %v7864_v27 = vld [vmem:[#allocation47_spill] sm:$0xff] }
 0x421   :  { %4169 = vmatpush1.bf16.msra.mxu0 %v7854_v31  ;;  %4233 = vmatpush1.bf16.msra.mxu1 %v7855_v32  ;;  %v7865_v31 = vld [vmem:[#allocation48_spill] sm:$0xff]  ;;  %v7866_v32 = vld [vmem:[#allocation49_spill] sm:$0xff] }
 0x422   :  { %4171 = vmatprep.subr.bf16.mxu0 %v7856_v36  ;;  %4235 = vmatprep.subr.bf16.mxu1 %v7857_v44  ;;  %v7867_v36 = vld [vmem:[#allocation50_spill] sm:$0xff]  ;;  %v7868_v44 = vld [vmem:[#allocation51_spill] sm:$0xff] }
 0x425   :  { %4173 = vmatpush1.bf16.msra.mxu0 %v7858_v40  ;;  %4237 = vmatpush1.bf16.msra.mxu1 %v7859_v47  ;;  %v7869_v40 = vld [vmem:[#allocation52_spill] sm:$0xff]  ;;  %v7870_v47 = vld [vmem:[#allocation53_spill] sm:$0xff] }
 0x426   :  { %4175 = vmatprep.subr.bf16.mxu0 %v7860_v51  ;;  %4239 = vmatprep.subr.bf16.mxu1 %v7861_v57  ;;  %v7871_v51 = vld [vmem:[#allocation54_spill] sm:$0xff]  ;;  %v7872_v57 = vld [vmem:[#allocation55_spill] sm:$0xff] }
 0x429   :  { %4177 = vmatpush1.bf16.msra.mxu0 %v7862_v54  ;;  %4241 = vmatpush1.bf16.msra.mxu1 %v7863_v33  ;;  %v7873_v54 = vld [vmem:[#allocation56_spill] sm:$0xff]  ;;  %v7874_v33 = vld [vmem:[#allocation57_spill] sm:$0xff] }
 0x42a   :  { %4179 = vmatprep.subr.bf16.mxu0 %v7864_v27  ;;  %4243 = vmatprep.subr.bf16.mxu1 %v7865_v31  ;;  %v7875_v27 = vld [vmem:[#allocation58_spill] sm:$0xff]  ;;  %v7876_v31 = vld [vmem:[#allocation59_spill] sm:$0xff] }
 0x42d   :  { %4181 = vmatpush1.bf16.msra.mxu0 %v7866_v32  ;;  %4245 = vmatpush1.bf16.msra.mxu1 %v7867_v36  ;;  %v7877_v32 = vld [vmem:[#allocation60_spill] sm:$0xff]  ;;  %v7878_v36 = vld [vmem:[#allocation61_spill] sm:$0xff] }
 0x42e   :  { %4183 = vmatprep.subr.bf16.mxu0 %v7868_v44  ;;  %4247 = vmatprep.subr.bf16.mxu1 %v7869_v40  ;;  %v7879_v44 = vld [vmem:[#allocation62_spill] sm:$0xff]  ;;  %v7880_v40 = vld [vmem:[#allocation63_spill] sm:$0xff] }
 0x431   :  { %4185 = vmatpush1.bf16.msra.mxu0 %v7870_v47  ;;  %4249 = vmatpush1.bf16.msra.mxu1 %v7871_v51  ;;  %v7881_v47 = vld [vmem:[#allocation64_spill] sm:$0xff]  ;;  %v7882_v51 = vld [vmem:[#allocation65_spill] sm:$0xff] }
 0x432   :  { %4187 = vmatprep.subr.bf16.mxu0 %v7872_v57  ;;  %4251 = vmatprep.subr.bf16.mxu1 %v7873_v54  ;;  %v7883_v57 = vld [vmem:[#allocation66_spill] sm:$0xff]  ;;  %v7884_v54 = vld [vmem:[#allocation67_spill] sm:$0xff] }
 0x435   :  { %4189 = vmatpush1.bf16.msra.mxu0 %v7874_v33  ;;  %4253 = vmatpush1.bf16.msra.mxu1 %v7875_v27  ;;  %v7885_v33 = vld [vmem:[#allocation68_spill] sm:$0xff]  ;;  %v7886_v27 = vld [vmem:[#allocation69_spill] sm:$0xff] }
 0x436   :  { %4191 = vmatprep.subr.bf16.mxu0 %v7876_v31  ;;  %4255 = vmatprep.subr.bf16.mxu1 %v7877_v32  ;;  %v7887_v31 = vld [vmem:[#allocation70_spill] sm:$0xff]  ;;  %v7888_v32 = vld [vmem:[#allocation71_spill] sm:$0xff] }
 0x439   :  { %4193 = vmatpush1.bf16.msra.mxu0 %v7878_v36  ;;  %4257 = vmatpush1.bf16.msra.mxu1 %v7879_v44  ;;  %v7889_v36 = vld [vmem:[#allocation72_spill] sm:$0xff]  ;;  %v7890_v44 = vld [vmem:[#allocation73_spill] sm:$0xff] }
 0x43a   :  { %4195 = vmatprep.subr.bf16.mxu0 %v7880_v40  ;;  %4259 = vmatprep.subr.bf16.mxu1 %v7881_v47  ;;  %v7891_v40 = vld [vmem:[#allocation74_spill] sm:$0xff]  ;;  %v7892_v47 = vld [vmem:[#allocation75_spill] sm:$0xff] }
 0x43d   :  { %4197 = vmatpush1.bf16.msra.mxu0 %v7882_v51  ;;  %4261 = vmatpush1.bf16.msra.mxu1 %v7883_v57  ;;  %v7893_v51 = vld [vmem:[#allocation76_spill] sm:$0xff] }
 0x43e   :  { %4199 = vmatprep.subr.bf16.mxu0 %v7884_v54  ;;  %4263 = vmatprep.subr.bf16.mxu1 %v7885_v33 }
 0x441   :  { %4201 = vmatpush1.bf16.msra.mxu0 %v7886_v27  ;;  %4265 = vmatpush1.bf16.msra.mxu1 %v7887_v31 }
 0x442   :  { %4203 = vmatprep.subr.bf16.mxu0 %v7888_v32  ;;  %4267 = vmatprep.subr.bf16.mxu1 %v7889_v36  ;;  %v7896_v36 = vld [vmem:[#allocation146_spill] sm:$0xff] }
 0x445   :  { %4205 = vmatpush1.bf16.msra.mxu0 %v7890_v44  ;;  %4269 = vmatpush1.bf16.msra.mxu1 %v7891_v40 }
 0x446   :  { %4271 = vmatprep.subr.bf16.mxu0 %v7892_v47  ;;  %4335 = vmatprep.subr.bf16.mxu1 %v7893_v51 }
 0x49b   :  { %v1450_v57 = vpop.f32.mrb[20].mxu0  ;;  %v1521_v54 = vpop.f32.mrb[20].mxu1 }
 0x49c   :  { %v1668_v33 = vadd.f32 %v1450_v57, %v7894_v23  ;;  %v1452_v22 = vpop.f32.mrb[21].mxu0  ;;  %v1523_v27 = vpop.f32.mrb[21].mxu1  ;;  %v1670_v44 = vadd.f32 %v1521_v54, %v7802_v49 }
 0x49d   :  { %v1669_v31 = vadd.f32 %v1452_v22, %v7895_v18  ;;  %v1671_v40 = vadd.f32 %v1523_v27, %v7896_v36 }
 0x49e   :  { %v3331_v30 = vmul.f32 -1.442695, %v1668_v33  ;;  %v3333_v5 = vmul.f32 -1.442695, %v1670_v44 }
 0x49f   :  { %v3332_v32 = vmul.f32 -1.442695, %v1669_v31 }
 0x4a0   :  { %5440 = vpow2.f32 %v3331_v30 }
 0x4a1   :  { %5442 = vpow2.f32 %v3332_v32  ;;  %v7897_v32 = vld [vmem:[#allocation80_spill] sm:$0xff] }
 0x4a2   :  { %5444 = vtanh.f32 %v1671_v40 }
 0x4a3   :  { %5446 = vpow2.f32 %v3333_v5 }
 0x4aa   :  { %v5441_v47 = vpop.eup %5440 }
 0x4ab   :  { %v1681_v1 = vadd.f32 1.0, %v5441_v47  ;;  %v5443_v51 = vpop.eup %5442 }
 0x4ac   :  { %v1682_v57 = vadd.f32 1.0, %v5443_v51  ;;  %v5445_v23 = vpop.eup %5444 }
 0x4ad   :  { %5448 = vrcp.f32 %v1681_v1  ;;  %v5447_v14 = vpop.eup %5446  ;;  %v7899_v1 = vld [vmem:[#allocation78_spill] sm:$0xff] }
 0x4ae   :  { %5450 = vrcp.f32 %v1682_v57  ;;  %v1683_v30 = vadd.f32 1.0, %v5447_v14 }
 0x4b0   :  { %5452 = vrcp.f32 %v1683_v30 }
 0x4b7   :  { %v5449_v22 = vpop.eup %5448 }
 0x4b8   :  { %v1692_v33 = vmul.f32 %v5449_v22, %v5445_v23  ;;  %v5451_v31 = vpop.eup %5450 }
 0x4b9   :  { %v1691_v18 = vmul.f32 %v5451_v31, %v7897_v32 }
 0x4ba   :  { %v5453_v27 = vpop.eup %5452 }
 0x4bb   :  { %v6622_v54 = vadd.f32 %v1692_v33, %v1691_v18 }
 0x4bd   :  { %7898 = vst [vmem:[#allocation81_spill] sm:$0xff] %v6622_v54  ;;  %5454 = vtanh.f32 %v6622_v54 }
 0x4c7   :  { %v5455_v40 = vpop.eup %5454 }
 0x4c8   :  { %v1695_v44 = vmul.f32 %v5455_v40, %v5453_v27 }
 0x4ca   :  { %1792 = vmatprep.mubr.f32.mxu0 %v1695_v44  ;;  %1863 = vmatprep.mubr.f32.mxu1 %v1695_v44 }
 0x4db   :  { %v1592_v47 = vpop.f32.mrb[6].mxu0  ;;  %v1663_v51 = vpop.f32.mrb[6].mxu1 }
 0x4dc   :  { %v5298_v5 = vadd.f32 %v1592_v47, %v7899_v1  ;;  %v1594_v57 = vpop.f32.mrb[7].mxu0  ;;  %v1665_v23 = vpop.f32.mrb[7].mxu1  ;;  %v5312_v18 = vadd.f32 %v1663_v51, %v7713_v8 }
 0x4dd   :  { %v5299_v14 = vadd.f32 %v1594_v57, %v7807_v11  ;;  %v5313_v33 = vadd.f32 %v1665_v23, %v7714_v52 }
 0x4de   :  { %v3334_v22 = vmul.f32 -1.442695, %v5298_v5  ;;  %v3336_v30 = vmul.f32 -1.442695, %v5312_v18 }
 0x4df   :  { %v3335_v31 = vmul.f32 -1.442695, %v5299_v14 }
 0x4e0   :  { %5456 = vpow2.f32 %v3334_v22 }
 0x4e1   :  { %5458 = vpow2.f32 %v3335_v31 }
 0x4e2   :  { %5460 = vtanh.f32 %v5313_v33 }
 0x4e3   :  { %5462 = vpow2.f32 %v3336_v30  ;;  %v7904_v30 = vld [vmem:[#allocation97_spill] sm:$0xff] }
 0x4ea   :  { %v5457_v32 = vpop.eup %5456 }
 0x4eb   :  { %v1713_v27 = vadd.f32 1.0, %v5457_v32  ;;  %v5459_v40 = vpop.eup %5458  ;;  %v7905_v32 = vld [vmem:[#allocation98_spill] sm:$0xff] }
 0x4ec   :  { %v1714_v47 = vadd.f32 1.0, %v5459_v40  ;;  %v5461_v1 = vpop.eup %5460  ;;  %v7907_v40 = vld [vmem:[#allocation100_spill] sm:$0xff] }
 0x4ed   :  { %5464 = vrcp.f32 %v1713_v27  ;;  %v5463_v54 = vpop.eup %5462  ;;  %v7906_v27 = vld [vmem:[#allocation99_spill] sm:$0xff] }
 0x4ee   :  { %5466 = vrcp.f32 %v1714_v47  ;;  %v1715_v22 = vadd.f32 1.0, %v5463_v54  ;;  %v7901_v54 = vld [vmem:[#allocation94_spill] sm:$0xff]  ;;  %v7908_v47 = vld [vmem:[#allocation101_spill] sm:$0xff] }
 0x4f0   :  { %5468 = vrcp.f32 %v1715_v22  ;;  %v7912_v22 = vld [vmem:[#allocation105_spill] sm:$0xff] }
 0x4f7   :  { %v5465_v57 = vpop.eup %5464 }
 0x4f8   :  { %v1724_v5 = vmul.f32 %v5465_v57, %v5461_v1  ;;  %v5467_v14 = vpop.eup %5466  ;;  %v7903_v1 = vld [vmem:[#allocation96_spill] sm:$0xff]  ;;  %v7909_v57 = vld [vmem:[#allocation102_spill] sm:$0xff] }
 0x4f9   :  { %v1723_v31 = vmul.f32 %v5467_v14, %v6480_v6  ;;  %v7900_v6 = vld [vmem:[#allocation93_spill] sm:$0xff]  ;;  %v7911_v14 = vld [vmem:[#allocation104_spill] sm:$0xff] }
 0x4fa   :  { %v5469_v23 = vpop.eup %5468 }
 0x4fb   :  { %v6630_v51 = vadd.f32 %v1724_v5, %v1723_v31  ;;  %v7910_v5 = vld [vmem:[#allocation103_spill] sm:$0xff]  ;;  %v7913_v31 = vld [vmem:[#allocation106_spill] sm:$0xff] }
 0x4fd   :  { %5470 = vtanh.f32 %v6630_v51 }
 0x507   :  { %v5471_v18 = vpop.eup %5470 }
 0x508   :  { %v6633_v33 = vmul.f32 %v5471_v18, %v5469_v23  ;;  %v7914_v23 = vld [vmem:[#allocation107_spill] sm:$0xff]  ;;  %v7915_v18 = vld [vmem:[#allocation108_spill] sm:$0xff] }
 0x50a   :  { %1793 = vmatmul.mubr.f32.vlgmr.msra.gmra.mrb[22].mxu0 %v6633_v33  ;;  %1864 = vmatmul.mubr.f32.vlgmr.msra.gmra.mrb[22].mxu1 %v6633_v33 }
 0x50b   :  { %4273 = vmatpush1.bf16.msra.mxu0 %v7716_v17  ;;  %4337 = vmatpush1.bf16.msra.mxu1 %v7717_v0 }
 0x50c   :  { %1934 = vmatprep.mubr.f32.mxu0 %v1695_v44  ;;  %2005 = vmatprep.mubr.f32.mxu1 %v1695_v44  ;;  %v7902_v44 = vld [vmem:[#allocation95_spill] sm:$0xff] }
 0x50d   :  { %4275 = vmatprep.subr.bf16.mxu0 %v6045_v19  ;;  %4339 = vmatprep.subr.bf16.mxu1 %v7718_v61 }
 0x50f   :  { %4277 = vmatpush1.bf16.msra.mxu0 %v7719_v29  ;;  %4341 = vmatpush1.bf16.msra.mxu1 %v7720_v28 }
 0x510   :  { %4279 = vmatprep.subr.bf16.mxu0 %v7808_v9  ;;  %4343 = vmatprep.subr.bf16.mxu1 %v7809_v26 }
 0x513   :  { %4281 = vmatpush1.bf16.msra.mxu0 %v7810_v20  ;;  %4345 = vmatpush1.bf16.msra.mxu1 %v7811_v7 }
 0x514   :  { %4283 = vmatprep.subr.bf16.mxu0 %v7812_v43  ;;  %4347 = vmatprep.subr.bf16.mxu1 %v7900_v6 }
 0x517   :  { %4285 = vmatpush1.bf16.msra.mxu0 %v7901_v54  ;;  %4349 = vmatpush1.bf16.msra.mxu1 %v7902_v44 }
 0x518   :  { %4287 = vmatprep.subr.bf16.mxu0 %v7903_v1  ;;  %4351 = vmatprep.subr.bf16.mxu1 %v7904_v30 }
 0x51b   :  { %4289 = vmatpush1.bf16.msra.mxu0 %v7905_v32  ;;  %4353 = vmatpush1.bf16.msra.mxu1 %v7906_v27  ;;  %v7916_v32 = vld [vmem:[#allocation109_spill] sm:$0xff] }
 0x51c   :  { %4291 = vmatprep.subr.bf16.mxu0 %v7907_v40  ;;  %4355 = vmatprep.subr.bf16.mxu1 %v7908_v47 }
 0x51f   :  { %4293 = vmatpush1.bf16.msra.mxu0 %v7909_v57  ;;  %4357 = vmatpush1.bf16.msra.mxu1 %v7910_v5 }
 0x520   :  { %4295 = vmatprep.subr.bf16.mxu0 %v7911_v14  ;;  %4359 = vmatprep.subr.bf16.mxu1 %v7912_v22 }
 0x523   :  { %4297 = vmatpush1.bf16.msra.mxu0 %v7913_v31  ;;  %4361 = vmatpush1.bf16.msra.mxu1 %v7914_v23 }
 0x524   :  { %4299 = vmatprep.subr.bf16.mxu0 %v7915_v18  ;;  %4363 = vmatprep.subr.bf16.mxu1 %v7916_v32 }
 0x527   :  { %4301 = vmatpush1.bf16.msra.mxu0 %v7830_v60  ;;  %4365 = vmatpush1.bf16.msra.mxu1 %v7831_v3 }
 0x528   :  { %4303 = vmatprep.subr.bf16.mxu0 %v7832_v39  ;;  %4367 = vmatprep.subr.bf16.mxu1 %v7833_v15 }
 0x52b   :  { %4305 = vmatpush1.bf16.msra.mxu0 %v7834_v10  ;;  %4369 = vmatpush1.bf16.msra.mxu1 %v7835_v38 }
 0x52c   :  { %4307 = vmatprep.subr.bf16.mxu0 %v7836_v56  ;;  %4371 = vmatprep.subr.bf16.mxu1 %v7837_v55 }
 0x52f   :  { %4309 = vmatpush1.bf16.msra.mxu0 %v7838_v63  ;;  %4373 = vmatpush1.bf16.msra.mxu1 %v7839_v21 }
 0x530   :  { %4311 = vmatprep.subr.bf16.mxu0 %v7840_v24  ;;  %4375 = vmatprep.subr.bf16.mxu1 %v7754_v13 }
 0x533   :  { %4313 = vmatpush1.bf16.msra.mxu0 %v7755_v12  ;;  %4377 = vmatpush1.bf16.msra.mxu1 %v7756_v4 }
 0x534   :  { %4315 = vmatprep.subr.bf16.mxu0 %v7757_v46  ;;  %4379 = vmatprep.subr.bf16.mxu1 %v7758_v2 }
 0x537   :  { %4317 = vmatpush1.bf16.msra.mxu0 %v7759_v35  ;;  %4381 = vmatpush1.bf16.msra.mxu1 %v7760_v58  ;;  %v7988_v58 = vld [vmem:[#allocation144_spill] sm:$0xff] }
 0x538   :  { %4319 = vmatprep.subr.bf16.mxu0 %v7761_v25  ;;  %4383 = vmatprep.subr.bf16.mxu1 %v7762_v16  ;;  %v7917_v16 = vld [vmem:[#allocation140_spill] sm:$0xff] }
 0x53b   :  { %4321 = vmatpush1.bf16.msra.mxu0 %v7763_v37  ;;  %4385 = vmatpush1.bf16.msra.mxu1 %v7764_v53  ;;  %v7918_v37 = vld [vmem:[#allocation141_spill] sm:$0xff]  ;;  %v7919_v53 = vld [vmem:[#allocation142_spill] sm:$0xff] }
 0x53c   :  { %4323 = vmatprep.subr.bf16.mxu0 %v6193_v34  ;;  %4387 = vmatprep.subr.bf16.mxu1 %v6195_v42  ;;  %v7920_v34 = vld [vmem:[#allocation143_spill] sm:$0xff] }
 0x53d   :  { %v7921_v42 = vld [vmem:[#allocation11_spill] sm:$0xff] }
 0x53f   :  { %4325 = vmatpush1.bf16.msra.mxu0 %v6199_v41  ;;  %4389 = vmatpush1.bf16.msra.mxu1 %v6201_v59  ;;  %v7922_v41 = vld [vmem:[#allocation12_spill] sm:$0xff]  ;;  %v7987_v59 = vld [vmem:[#allocation77_spill] sm:$0xff] }
 0x540   :  { %4327 = vmatprep.subr.bf16.mxu0 %v6205_v50  ;;  %4391 = vmatprep.subr.bf16.mxu1 %v6207_v48  ;;  %v7923_v48 = vld [vmem:[#allocation13_spill] sm:$0xff]  ;;  %v7932_v50 = vld [vmem:[#allocation23_spill] sm:$0xff] }
 0x543   :  { %4329 = vmatpush1.bf16.msra.mxu0 %v6211_v62  ;;  %4393 = vmatpush1.bf16.msra.mxu1 %v6213_v45  ;;  %v7924_v62 = vld [vmem:[#allocation14_spill] sm:$0xff]  ;;  %v7925_v45 = vld [vmem:[#allocation15_spill] sm:$0xff] }
 0x544   :  { %4331 = vmatprep.subr.bf16.mxu0 %v7917_v16  ;;  %4395 = vmatprep.subr.bf16.mxu1 %v7918_v37  ;;  %v7926_v16 = vld [vmem:[#allocation16_spill] sm:$0xff]  ;;  %v7927_v37 = vld [vmem:[#allocation17_spill] sm:$0xff] }
 0x547   :  { %4333 = vmatpush1.bf16.msra.mxu0 %v7919_v53  ;;  %4397 = vmatpush1.bf16.msra.mxu1 %v7920_v34  ;;  %v7928_v53 = vld [vmem:[#allocation19_spill] sm:$0xff]  ;;  %v7929_v34 = vld [vmem:[#allocation18_spill] sm:$0xff] }
 0x548   :  { %4399 = vmatprep.subr.bf16.mxu0 %v7921_v42  ;;  %4463 = vmatprep.subr.bf16.mxu1 %v7922_v41  ;;  %v7930_v42 = vld [vmem:[#allocation20_spill] sm:$0xff]  ;;  %v7931_v41 = vld [vmem:[#allocation21_spill] sm:$0xff] }
 0x54a   :  { %1935 = vmatmul.mubr.f32.vlgmr.msra.gmra.mrb[8].mxu0 %v6633_v33  ;;  %2006 = vmatmul.mubr.f32.vlgmr.msra.gmra.mrb[8].mxu1 %v6633_v33  ;;  %v7933_v33 = vld [vmem:[#allocation22_spill] sm:$0xff] }
 0x54b   :  { %4401 = vmatpush1.bf16.msra.mxu0 %v7923_v48  ;;  %4465 = vmatpush1.bf16.msra.mxu1 %v7924_v62  ;;  %v7934_v48 = vld [vmem:[#allocation24_spill] sm:$0xff]  ;;  %v7935_v62 = vld [vmem:[#allocation25_spill] sm:$0xff] }
 0x54c   :  { %4403 = vmatprep.subr.bf16.mxu0 %v7925_v45  ;;  %4467 = vmatprep.subr.bf16.mxu1 %v7926_v16  ;;  %v7936_v45 = vld [vmem:[#allocation27_spill] sm:$0xff]  ;;  %v7937_v16 = vld [vmem:[#allocation26_spill] sm:$0xff] }
 0x54f   :  { %4405 = vmatpush1.bf16.msra.mxu0 %v7927_v37  ;;  %4469 = vmatpush1.bf16.msra.mxu1 %v7928_v53  ;;  %v7938_v37 = vld [vmem:[#allocation28_spill] sm:$0xff]  ;;  %v7939_v53 = vld [vmem:[#allocation29_spill] sm:$0xff] }
 0x550   :  { %4407 = vmatprep.subr.bf16.mxu0 %v7929_v34  ;;  %4471 = vmatprep.subr.bf16.mxu1 %v7930_v42  ;;  %v7940_v34 = vld [vmem:[#allocation30_spill] sm:$0xff]  ;;  %v7941_v42 = vld [vmem:[#allocation31_spill] sm:$0xff] }
 0x553   :  { %4409 = vmatpush1.bf16.msra.mxu0 %v7931_v41  ;;  %4473 = vmatpush1.bf16.msra.mxu1 %v7932_v50  ;;  %v7942_v41 = vld [vmem:[#allocation32_spill] sm:$0xff]  ;;  %v7943_v50 = vld [vmem:[#allocation33_spill] sm:$0xff] }
 0x554   :  { %4411 = vmatprep.subr.bf16.mxu0 %v7933_v33  ;;  %4475 = vmatprep.subr.bf16.mxu1 %v7934_v48  ;;  %v7944_v33 = vld [vmem:[#allocation34_spill] sm:$0xff]  ;;  %v7945_v48 = vld [vmem:[#allocation35_spill] sm:$0xff] }
 0x557   :  { %4413 = vmatpush1.bf16.msra.mxu0 %v7935_v62  ;;  %4477 = vmatpush1.bf16.msra.mxu1 %v7936_v45  ;;  %v7946_v62 = vld [vmem:[#allocation36_spill] sm:$0xff]  ;;  %v7947_v45 = vld [vmem:[#allocation37_spill] sm:$0xff] }
 0x558   :  { %4415 = vmatprep.subr.bf16.mxu0 %v7937_v16  ;;  %4479 = vmatprep.subr.bf16.mxu1 %v7938_v37  ;;  %v7948_v16 = vld [vmem:[#allocation38_spill] sm:$0xff]  ;;  %v7949_v37 = vld [vmem:[#allocation39_spill] sm:$0xff] }
 0x55b   :  { %4417 = vmatpush1.bf16.msra.mxu0 %v7939_v53  ;;  %4481 = vmatpush1.bf16.msra.mxu1 %v7940_v34  ;;  %v7950_v53 = vld [vmem:[#allocation40_spill] sm:$0xff]  ;;  %v7951_v34 = vld [vmem:[#allocation41_spill] sm:$0xff] }
 0x55c   :  { %4419 = vmatprep.subr.bf16.mxu0 %v7941_v42  ;;  %4483 = vmatprep.subr.bf16.mxu1 %v7942_v41  ;;  %v7952_v42 = vld [vmem:[#allocation42_spill] sm:$0xff]  ;;  %v7953_v41 = vld [vmem:[#allocation43_spill] sm:$0xff] }
 0x55f   :  { %4421 = vmatpush1.bf16.msra.mxu0 %v7943_v50  ;;  %4485 = vmatpush1.bf16.msra.mxu1 %v7944_v33  ;;  %v7954_v50 = vld [vmem:[#allocation44_spill] sm:$0xff]  ;;  %v7955_v33 = vld [vmem:[#allocation45_spill] sm:$0xff] }
 0x560   :  { %4423 = vmatprep.subr.bf16.mxu0 %v7945_v48  ;;  %4487 = vmatprep.subr.bf16.mxu1 %v7946_v62  ;;  %v7956_v48 = vld [vmem:[#allocation46_spill] sm:$0xff]  ;;  %v7957_v62 = vld [vmem:[#allocation47_spill] sm:$0xff] }
 0x563   :  { %4425 = vmatpush1.bf16.msra.mxu0 %v7947_v45  ;;  %4489 = vmatpush1.bf16.msra.mxu1 %v7948_v16  ;;  %v7958_v45 = vld [vmem:[#allocation48_spill] sm:$0xff]  ;;  %v7959_v16 = vld [vmem:[#allocation49_spill] sm:$0xff] }
 0x564   :  { %4427 = vmatprep.subr.bf16.mxu0 %v7949_v37  ;;  %4491 = vmatprep.subr.bf16.mxu1 %v7950_v53  ;;  %v7960_v37 = vld [vmem:[#allocation50_spill] sm:$0xff]  ;;  %v7961_v53 = vld [vmem:[#allocation51_spill] sm:$0xff] }
 0x567   :  { %4429 = vmatpush1.bf16.msra.mxu0 %v7951_v34  ;;  %4493 = vmatpush1.bf16.msra.mxu1 %v7952_v42  ;;  %v7962_v34 = vld [vmem:[#allocation52_spill] sm:$0xff]  ;;  %v7963_v42 = vld [vmem:[#allocation53_spill] sm:$0xff] }
 0x568   :  { %4431 = vmatprep.subr.bf16.mxu0 %v7953_v41  ;;  %4495 = vmatprep.subr.bf16.mxu1 %v7954_v50  ;;  %v7964_v41 = vld [vmem:[#allocation54_spill] sm:$0xff]  ;;  %v7965_v50 = vld [vmem:[#allocation55_spill] sm:$0xff] }
 0x56b   :  { %4433 = vmatpush1.bf16.msra.mxu0 %v7955_v33  ;;  %4497 = vmatpush1.bf16.msra.mxu1 %v7956_v48  ;;  %v7966_v33 = vld [vmem:[#allocation56_spill] sm:$0xff]  ;;  %v7967_v48 = vld [vmem:[#allocation57_spill] sm:$0xff] }
 0x56c   :  { %4435 = vmatprep.subr.bf16.mxu0 %v7957_v62  ;;  %4499 = vmatprep.subr.bf16.mxu1 %v7958_v45  ;;  %v7968_v62 = vld [vmem:[#allocation58_spill] sm:$0xff]  ;;  %v7969_v45 = vld [vmem:[#allocation59_spill] sm:$0xff] }
 0x56f   :  { %4437 = vmatpush1.bf16.msra.mxu0 %v7959_v16  ;;  %4501 = vmatpush1.bf16.msra.mxu1 %v7960_v37  ;;  %v7970_v16 = vld [vmem:[#allocation60_spill] sm:$0xff]  ;;  %v7971_v37 = vld [vmem:[#allocation61_spill] sm:$0xff] }
 0x570   :  { %4439 = vmatprep.subr.bf16.mxu0 %v7961_v53  ;;  %4503 = vmatprep.subr.bf16.mxu1 %v7962_v34  ;;  %v7972_v53 = vld [vmem:[#allocation62_spill] sm:$0xff]  ;;  %v7973_v34 = vld [vmem:[#allocation63_spill] sm:$0xff] }
 0x573   :  { %4441 = vmatpush1.bf16.msra.mxu0 %v7963_v42  ;;  %4505 = vmatpush1.bf16.msra.mxu1 %v7964_v41  ;;  %v7974_v42 = vld [vmem:[#allocation64_spill] sm:$0xff]  ;;  %v7975_v41 = vld [vmem:[#allocation65_spill] sm:$0xff] }
 0x574   :  { %4443 = vmatprep.subr.bf16.mxu0 %v7965_v50  ;;  %4507 = vmatprep.subr.bf16.mxu1 %v7966_v33  ;;  %v7976_v50 = vld [vmem:[#allocation66_spill] sm:$0xff]  ;;  %v7977_v33 = vld [vmem:[#allocation67_spill] sm:$0xff] }
 0x577   :  { %4445 = vmatpush1.bf16.msra.mxu0 %v7967_v48  ;;  %4509 = vmatpush1.bf16.msra.mxu1 %v7968_v62  ;;  %v7978_v48 = vld [vmem:[#allocation68_spill] sm:$0xff]  ;;  %v7979_v62 = vld [vmem:[#allocation69_spill] sm:$0xff] }
 0x578   :  { %4447 = vmatprep.subr.bf16.mxu0 %v7969_v45  ;;  %4511 = vmatprep.subr.bf16.mxu1 %v7970_v16  ;;  %v7980_v45 = vld [vmem:[#allocation70_spill] sm:$0xff]  ;;  %v7981_v16 = vld [vmem:[#allocation71_spill] sm:$0xff] }
 0x57b   :  { %4449 = vmatpush1.bf16.msra.mxu0 %v7971_v37  ;;  %4513 = vmatpush1.bf16.msra.mxu1 %v7972_v53  ;;  %v7982_v37 = vld [vmem:[#allocation72_spill] sm:$0xff]  ;;  %v7983_v53 = vld [vmem:[#allocation73_spill] sm:$0xff] }
 0x57c   :  { %4451 = vmatprep.subr.bf16.mxu0 %v7973_v34  ;;  %4515 = vmatprep.subr.bf16.mxu1 %v7974_v42  ;;  %v7984_v34 = vld [vmem:[#allocation74_spill] sm:$0xff]  ;;  %v7985_v42 = vld [vmem:[#allocation75_spill] sm:$0xff] }
 0x57f   :  { %4453 = vmatpush1.bf16.msra.mxu0 %v7975_v41  ;;  %4517 = vmatpush1.bf16.msra.mxu1 %v7976_v50  ;;  %v7986_v41 = vld [vmem:[#allocation76_spill] sm:$0xff] }
 0x580   :  { %4455 = vmatprep.subr.bf16.mxu0 %v7977_v33  ;;  %4519 = vmatprep.subr.bf16.mxu1 %v7978_v48 }
 0x583   :  { %4457 = vmatpush1.bf16.msra.mxu0 %v7979_v62  ;;  %4521 = vmatpush1.bf16.msra.mxu1 %v7980_v45 }
 0x584   :  { %4459 = vmatprep.subr.bf16.mxu0 %v7981_v16  ;;  %4523 = vmatprep.subr.bf16.mxu1 %v7982_v37 }
 0x587   :  { %4461 = vmatpush1.bf16.msra.mxu0 %v7983_v53  ;;  %4525 = vmatpush1.bf16.msra.mxu1 %v7984_v34 }
 0x588   :  { %4527 = vmatprep.subr.bf16.mxu0 %v7985_v42  ;;  %4591 = vmatprep.subr.bf16.mxu1 %v7986_v41 }
 0x5dd   :  { %v1794_v50 = vpop.f32.mrb[22].mxu0  ;;  %v1865_v33 = vpop.f32.mrb[22].mxu1 }
 0x5de   :  { %v2012_v48 = vadd.f32 %v1794_v50, %v7987_v59  ;;  %v1796_v25 = vpop.f32.mrb[23].mxu0  ;;  %v1867_v62 = vpop.f32.mrb[23].mxu1  ;;  %v2014_v53 = vadd.f32 %v1865_v33, %v7802_v49 }
 0x5df   :  { %v2013_v45 = vadd.f32 %v1796_v25, %v7988_v58  ;;  %v2015_v34 = vadd.f32 %v1867_v62, %v7896_v36 }
 0x5e0   :  { %v3337_v35 = vmul.f32 -1.442695, %v2012_v48  ;;  %v3339_v37 = vmul.f32 -1.442695, %v2014_v53 }
 0x5e1   :  { %v3338_v16 = vmul.f32 -1.442695, %v2013_v45 }
 0x5e2   :  { %5472 = vpow2.f32 %v3337_v35 }
 0x5e3   :  { %5474 = vpow2.f32 %v3338_v16  ;;  %v7989_v16 = vld [vmem:[#allocation81_spill] sm:$0xff] }
 0x5e4   :  { %5476 = vtanh.f32 %v2015_v34 }
 0x5e5   :  { %5478 = vpow2.f32 %v3339_v37  ;;  %v7991_v37 = vld [vmem:[#allocation78_spill] sm:$0xff] }
 0x5ec   :  { %v5473_v42 = vpop.eup %5472 }
 0x5ed   :  { %v2025_v2 = vadd.f32 1.0, %v5473_v42  ;;  %v5475_v41 = vpop.eup %5474 }
 0x5ee   :  { %v2026_v50 = vadd.f32 1.0, %v5475_v41  ;;  %v5477_v59 = vpop.eup %5476 }
 0x5ef   :  { %5480 = vrcp.f32 %v2025_v2  ;;  %v5479_v46 = vpop.eup %5478 }
 0x5f0   :  { %5482 = vrcp.f32 %v2026_v50  ;;  %v2027_v35 = vadd.f32 1.0, %v5479_v46 }
 0x5f2   :  { %5484 = vrcp.f32 %v2027_v35 }
 0x5f9   :  { %v5481_v25 = vpop.eup %5480 }
 0x5fa   :  { %v2036_v48 = vmul.f32 %v5481_v25, %v5477_v59  ;;  %v5483_v45 = vpop.eup %5482 }
 0x5fb   :  { %v2035_v58 = vmul.f32 %v5483_v45, %v7989_v16 }
 0x5fc   :  { %v5485_v42 = vpop.eup %5484 }
 0x5fd   :  { %v6772_v33 = vadd.f32 %v2036_v48, %v2035_v58 }
 0x5ff   :  { %7990 = vst [vmem:[#allocation82_spill] sm:$0xff] %v6772_v33  ;;  %5486 = vtanh.f32 %v6772_v33 }
 0x609   :  { %v5487_v34 = vpop.eup %5486 }
 0x60a   :  { %v2039_v62 = vmul.f32 %v5487_v34, %v5485_v42 }
 0x60c   :  { %2136 = vmatprep.mubr.f32.mxu0 %v2039_v62  ;;  %2207 = vmatprep.mubr.f32.mxu1 %v2039_v62 }
 0x61d   :  { %v1936_v41 = vpop.f32.mrb[8].mxu0  ;;  %v2007_v2 = vpop.f32.mrb[8].mxu1 }
 0x61e   :  { %v5300_v53 = vadd.f32 %v1936_v41, %v7991_v37  ;;  %v1938_v50 = vpop.f32.mrb[9].mxu0  ;;  %v2009_v59 = vpop.f32.mrb[9].mxu1  ;;  %v5314_v58 = vadd.f32 %v2007_v2, %v7713_v8 }
 0x61f   :  { %v5301_v46 = vadd.f32 %v1938_v50, %v7807_v11  ;;  %v5315_v48 = vadd.f32 %v2009_v59, %v7714_v52 }
 0x620   :  { %v3340_v25 = vmul.f32 -1.442695, %v5300_v53  ;;  %v3342_v35 = vmul.f32 -1.442695, %v5314_v58 }
 0x621   :  { %v3341_v45 = vmul.f32 -1.442695, %v5301_v46 }
 0x622   :  { %5488 = vpow2.f32 %v3340_v25 }
 0x623   :  { %5490 = vpow2.f32 %v3341_v45 }
 0x624   :  { %5492 = vtanh.f32 %v5315_v48 }
 0x625   :  { %5494 = vpow2.f32 %v3342_v35  ;;  %v7996_v35 = vld [vmem:[#allocation127_spill] sm:$0xff] }
 0x62c   :  { %v5489_v16 = vpop.eup %5488 }
 0x62d   :  { %v2057_v42 = vadd.f32 1.0, %v5489_v16  ;;  %v5491_v34 = vpop.eup %5490  ;;  %v7997_v16 = vld [vmem:[#allocation128_spill] sm:$0xff] }
 0x62e   :  { %v2058_v41 = vadd.f32 1.0, %v5491_v34  ;;  %v5493_v37 = vpop.eup %5492  ;;  %v7999_v34 = vld [vmem:[#allocation130_spill] sm:$0xff] }
 0x62f   :  { %5496 = vrcp.f32 %v2057_v42  ;;  %v5495_v33 = vpop.eup %5494  ;;  %v7998_v42 = vld [vmem:[#allocation129_spill] sm:$0xff] }
 0x630   :  { %5498 = vrcp.f32 %v2058_v41  ;;  %v2059_v25 = vadd.f32 1.0, %v5495_v33  ;;  %v7993_v33 = vld [vmem:[#allocation124_spill] sm:$0xff]  ;;  %v8000_v41 = vld [vmem:[#allocation131_spill] sm:$0xff] }
 0x632   :  { %5500 = vrcp.f32 %v2059_v25  ;;  %v8004_v25 = vld [vmem:[#allocation135_spill] sm:$0xff] }
 0x639   :  { %v5497_v50 = vpop.eup %5496 }
 0x63a   :  { %v2068_v53 = vmul.f32 %v5497_v50, %v5493_v37  ;;  %v5499_v46 = vpop.eup %5498  ;;  %v7995_v37 = vld [vmem:[#allocation126_spill] sm:$0xff]  ;;  %v8001_v50 = vld [vmem:[#allocation132_spill] sm:$0xff] }
 0x63b   :  { %v2067_v45 = vmul.f32 %v5499_v46, %v6630_v51  ;;  %v7992_v51 = vld [vmem:[#allocation98_spill] sm:$0xff] }
 0x63c   :  { %v5501_v59 = vpop.eup %5500  ;;  %v8003_v46 = vld [vmem:[#allocation134_spill] sm:$0xff] }
 0x63d   :  { %v6780_v2 = vadd.f32 %v2068_v53, %v2067_v45  ;;  %v8002_v53 = vld [vmem:[#allocation133_spill] sm:$0xff]  ;;  %v8005_v45 = vld [vmem:[#allocation136_spill] sm:$0xff] }
 0x63f   :  { %5502 = vtanh.f32 %v6780_v2 }
 0x649   :  { %v5503_v58 = vpop.eup %5502 }
 0x64a   :  { %v6783_v48 = vmul.f32 %v5503_v58, %v5501_v59  ;;  %v8006_v59 = vld [vmem:[#allocation137_spill] sm:$0xff]  ;;  %v8007_v58 = vld [vmem:[#allocation138_spill] sm:$0xff] }
 0x64c   :  { %2137 = vmatmul.mubr.f32.vlgmr.msra.gmra.mrb[24].mxu0 %v6783_v48  ;;  %2208 = vmatmul.mubr.f32.vlgmr.msra.gmra.mrb[24].mxu1 %v6783_v48 }
 0x64d   :  { %4529 = vmatpush1.bf16.msra.mxu0 %v7716_v17  ;;  %4593 = vmatpush1.bf16.msra.mxu1 %v7717_v0 }
 0x64e   :  { %2278 = vmatprep.mubr.f32.mxu0 %v2039_v62  ;;  %2349 = vmatprep.mubr.f32.mxu1 %v2039_v62  ;;  %v7994_v62 = vld [vmem:[#allocation125_spill] sm:$0xff] }
 0x64f   :  { %4531 = vmatprep.subr.bf16.mxu0 %v6045_v19  ;;  %4595 = vmatprep.subr.bf16.mxu1 %v7718_v61 }
 0x651   :  { %4533 = vmatpush1.bf16.msra.mxu0 %v7719_v29  ;;  %4597 = vmatpush1.bf16.msra.mxu1 %v7720_v28 }
 0x652   :  { %4535 = vmatprep.subr.bf16.mxu0 %v7808_v9  ;;  %4599 = vmatprep.subr.bf16.mxu1 %v7809_v26 }
 0x655   :  { %4537 = vmatpush1.bf16.msra.mxu0 %v7810_v20  ;;  %4601 = vmatpush1.bf16.msra.mxu1 %v7811_v7 }
 0x656   :  { %4539 = vmatprep.subr.bf16.mxu0 %v7812_v43  ;;  %4603 = vmatprep.subr.bf16.mxu1 %v7900_v6 }
 0x659   :  { %4541 = vmatpush1.bf16.msra.mxu0 %v7901_v54  ;;  %4605 = vmatpush1.bf16.msra.mxu1 %v7902_v44 }
 0x65a   :  { %4543 = vmatprep.subr.bf16.mxu0 %v7903_v1  ;;  %4607 = vmatprep.subr.bf16.mxu1 %v7904_v30 }
 0x65d   :  { %4545 = vmatpush1.bf16.msra.mxu0 %v7992_v51  ;;  %4609 = vmatpush1.bf16.msra.mxu1 %v7906_v27 }
 0x65e   :  { %4547 = vmatprep.subr.bf16.mxu0 %v7907_v40  ;;  %4611 = vmatprep.subr.bf16.mxu1 %v7908_v47 }
 0x661   :  { %4549 = vmatpush1.bf16.msra.mxu0 %v7909_v57  ;;  %4613 = vmatpush1.bf16.msra.mxu1 %v7910_v5 }
 0x662   :  { %4551 = vmatprep.subr.bf16.mxu0 %v7911_v14  ;;  %4615 = vmatprep.subr.bf16.mxu1 %v7912_v22 }
 0x665   :  { %4553 = vmatpush1.bf16.msra.mxu0 %v7913_v31  ;;  %4617 = vmatpush1.bf16.msra.mxu1 %v7914_v23 }
 0x666   :  { %4555 = vmatprep.subr.bf16.mxu0 %v7915_v18  ;;  %4619 = vmatprep.subr.bf16.mxu1 %v7916_v32 }
 0x669   :  { %4557 = vmatpush1.bf16.msra.mxu0 %v7830_v60  ;;  %4621 = vmatpush1.bf16.msra.mxu1 %v7831_v3 }
 0x66a   :  { %4559 = vmatprep.subr.bf16.mxu0 %v7832_v39  ;;  %4623 = vmatprep.subr.bf16.mxu1 %v7833_v15 }
 0x66d   :  { %4561 = vmatpush1.bf16.msra.mxu0 %v7834_v10  ;;  %4625 = vmatpush1.bf16.msra.mxu1 %v7835_v38 }
 0x66e   :  { %4563 = vmatprep.subr.bf16.mxu0 %v7836_v56  ;;  %4627 = vmatprep.subr.bf16.mxu1 %v7837_v55 }
 0x671   :  { %4565 = vmatpush1.bf16.msra.mxu0 %v7838_v63  ;;  %4629 = vmatpush1.bf16.msra.mxu1 %v7839_v21 }
 0x672   :  { %4567 = vmatprep.subr.bf16.mxu0 %v7840_v24  ;;  %4631 = vmatprep.subr.bf16.mxu1 %v7754_v13 }
 0x675   :  { %4569 = vmatpush1.bf16.msra.mxu0 %v7755_v12  ;;  %4633 = vmatpush1.bf16.msra.mxu1 %v7756_v4 }
 0x676   :  { %4571 = vmatprep.subr.bf16.mxu0 %v7993_v33  ;;  %4635 = vmatprep.subr.bf16.mxu1 %v7994_v62 }
 0x679   :  { %4573 = vmatpush1.bf16.msra.mxu0 %v7995_v37  ;;  %4637 = vmatpush1.bf16.msra.mxu1 %v7996_v35  ;;  %v8080_v37 = vld [vmem:[#allocation144_spill] sm:$0xff] }
 0x67a   :  { %4575 = vmatprep.subr.bf16.mxu0 %v7997_v16  ;;  %4639 = vmatprep.subr.bf16.mxu1 %v7998_v42  ;;  %v8008_v16 = vld [vmem:[#allocation139_spill] sm:$0xff]  ;;  %v8009_v42 = vld [vmem:[#allocation140_spill] sm:$0xff] }
 0x67d   :  { %4577 = vmatpush1.bf16.msra.mxu0 %v7999_v34  ;;  %4641 = vmatpush1.bf16.msra.mxu1 %v8000_v41  ;;  %v8010_v34 = vld [vmem:[#allocation141_spill] sm:$0xff]  ;;  %v8011_v41 = vld [vmem:[#allocation142_spill] sm:$0xff] }
 0x67e   :  { %4579 = vmatprep.subr.bf16.mxu0 %v8001_v50  ;;  %4643 = vmatprep.subr.bf16.mxu1 %v8002_v53  ;;  %v8012_v50 = vld [vmem:[#allocation143_spill] sm:$0xff] }
 0x67f   :  { %v8013_v53 = vld [vmem:[#allocation11_spill] sm:$0xff] }
 0x681   :  { %4581 = vmatpush1.bf16.msra.mxu0 %v8003_v46  ;;  %4645 = vmatpush1.bf16.msra.mxu1 %v8004_v25  ;;  %v8014_v46 = vld [vmem:[#allocation12_spill] sm:$0xff]  ;;  %v8079_v25 = vld [vmem:[#allocation77_spill] sm:$0xff] }
 0x682   :  { %4583 = vmatprep.subr.bf16.mxu0 %v8005_v45  ;;  %4647 = vmatprep.subr.bf16.mxu1 %v8006_v59  ;;  %v8015_v59 = vld [vmem:[#allocation13_spill] sm:$0xff]  ;;  %v8024_v45 = vld [vmem:[#allocation23_spill] sm:$0xff] }
 0x685   :  { %4585 = vmatpush1.bf16.msra.mxu0 %v8007_v58  ;;  %4649 = vmatpush1.bf16.msra.mxu1 %v8008_v16  ;;  %v8016_v58 = vld [vmem:[#allocation14_spill] sm:$0xff]  ;;  %v8017_v16 = vld [vmem:[#allocation15_spill] sm:$0xff] }
 0x686   :  { %4587 = vmatprep.subr.bf16.mxu0 %v8009_v42  ;;  %4651 = vmatprep.subr.bf16.mxu1 %v8010_v34  ;;  %v8018_v42 = vld [vmem:[#allocation16_spill] sm:$0xff]  ;;  %v8019_v34 = vld [vmem:[#allocation17_spill] sm:$0xff] }
 0x689   :  { %4589 = vmatpush1.bf16.msra.mxu0 %v8011_v41  ;;  %4653 = vmatpush1.bf16.msra.mxu1 %v8012_v50  ;;  %v8020_v41 = vld [vmem:[#allocation19_spill] sm:$0xff]  ;;  %v8021_v50 = vld [vmem:[#allocation18_spill] sm:$0xff] }
 0x68a   :  { %4655 = vmatprep.subr.bf16.mxu0 %v8013_v53  ;;  %4719 = vmatprep.subr.bf16.mxu1 %v8014_v46  ;;  %v8022_v53 = vld [vmem:[#allocation20_spill] sm:$0xff]  ;;  %v8023_v46 = vld [vmem:[#allocation21_spill] sm:$0xff] }
 0x68c   :  { %2279 = vmatmul.mubr.f32.vlgmr.msra.gmra.mrb[10].mxu0 %v6783_v48  ;;  %2350 = vmatmul.mubr.f32.vlgmr.msra.gmra.mrb[10].mxu1 %v6783_v48  ;;  %v8025_v48 = vld [vmem:[#allocation22_spill] sm:$0xff] }
 0x68d   :  { %4657 = vmatpush1.bf16.msra.mxu0 %v8015_v59  ;;  %4721 = vmatpush1.bf16.msra.mxu1 %v8016_v58  ;;  %v8026_v59 = vld [vmem:[#allocation24_spill] sm:$0xff]  ;;  %v8027_v58 = vld [vmem:[#allocation25_spill] sm:$0xff] }
 0x68e   :  { %4659 = vmatprep.subr.bf16.mxu0 %v8017_v16  ;;  %4723 = vmatprep.subr.bf16.mxu1 %v8018_v42  ;;  %v8028_v16 = vld [vmem:[#allocation27_spill] sm:$0xff]  ;;  %v8029_v42 = vld [vmem:[#allocation26_spill] sm:$0xff] }
 0x691   :  { %4661 = vmatpush1.bf16.msra.mxu0 %v8019_v34  ;;  %4725 = vmatpush1.bf16.msra.mxu1 %v8020_v41  ;;  %v8030_v34 = vld [vmem:[#allocation28_spill] sm:$0xff]  ;;  %v8031_v41 = vld [vmem:[#allocation29_spill] sm:$0xff] }
 0x692   :  { %4663 = vmatprep.subr.bf16.mxu0 %v8021_v50  ;;  %4727 = vmatprep.subr.bf16.mxu1 %v8022_v53  ;;  %v8032_v50 = vld [vmem:[#allocation30_spill] sm:$0xff]  ;;  %v8033_v53 = vld [vmem:[#allocation31_spill] sm:$0xff] }
 0x695   :  { %4665 = vmatpush1.bf16.msra.mxu0 %v8023_v46  ;;  %4729 = vmatpush1.bf16.msra.mxu1 %v8024_v45  ;;  %v8034_v46 = vld [vmem:[#allocation32_spill] sm:$0xff]  ;;  %v8035_v45 = vld [vmem:[#allocation33_spill] sm:$0xff] }
 0x696   :  { %4667 = vmatprep.subr.bf16.mxu0 %v8025_v48  ;;  %4731 = vmatprep.subr.bf16.mxu1 %v8026_v59  ;;  %v8036_v48 = vld [vmem:[#allocation34_spill] sm:$0xff]  ;;  %v8037_v59 = vld [vmem:[#allocation35_spill] sm:$0xff] }
 0x699   :  { %4669 = vmatpush1.bf16.msra.mxu0 %v8027_v58  ;;  %4733 = vmatpush1.bf16.msra.mxu1 %v8028_v16  ;;  %v8038_v58 = vld [vmem:[#allocation36_spill] sm:$0xff]  ;;  %v8039_v16 = vld [vmem:[#allocation37_spill] sm:$0xff] }
 0x69a   :  { %4671 = vmatprep.subr.bf16.mxu0 %v8029_v42  ;;  %4735 = vmatprep.subr.bf16.mxu1 %v8030_v34  ;;  %v8040_v42 = vld [vmem:[#allocation38_spill] sm:$0xff]  ;;  %v8041_v34 = vld [vmem:[#allocation39_spill] sm:$0xff] }
 0x69d   :  { %4673 = vmatpush1.bf16.msra.mxu0 %v8031_v41  ;;  %4737 = vmatpush1.bf16.msra.mxu1 %v8032_v50  ;;  %v8042_v41 = vld [vmem:[#allocation40_spill] sm:$0xff]  ;;  %v8043_v50 = vld [vmem:[#allocation41_spill] sm:$0xff] }
 0x69e   :  { %4675 = vmatprep.subr.bf16.mxu0 %v8033_v53  ;;  %4739 = vmatprep.subr.bf16.mxu1 %v8034_v46  ;;  %v8044_v53 = vld [vmem:[#allocation42_spill] sm:$0xff]  ;;  %v8045_v46 = vld [vmem:[#allocation43_spill] sm:$0xff] }
 0x6a1   :  { %4677 = vmatpush1.bf16.msra.mxu0 %v8035_v45  ;;  %4741 = vmatpush1.bf16.msra.mxu1 %v8036_v48  ;;  %v8046_v45 = vld [vmem:[#allocation44_spill] sm:$0xff]  ;;  %v8047_v48 = vld [vmem:[#allocation45_spill] sm:$0xff] }
 0x6a2   :  { %4679 = vmatprep.subr.bf16.mxu0 %v8037_v59  ;;  %4743 = vmatprep.subr.bf16.mxu1 %v8038_v58  ;;  %v8048_v59 = vld [vmem:[#allocation46_spill] sm:$0xff]  ;;  %v8049_v58 = vld [vmem:[#allocation47_spill] sm:$0xff] }
 0x6a5   :  { %4681 = vmatpush1.bf16.msra.mxu0 %v8039_v16  ;;  %4745 = vmatpush1.bf16.msra.mxu1 %v8040_v42  ;;  %v8050_v16 = vld [vmem:[#allocation48_spill] sm:$0xff]  ;;  %v8051_v42 = vld [vmem:[#allocation49_spill] sm:$0xff] }
 0x6a6   :  { %4683 = vmatprep.subr.bf16.mxu0 %v8041_v34  ;;  %4747 = vmatprep.subr.bf16.mxu1 %v8042_v41  ;;  %v8052_v34 = vld [vmem:[#allocation50_spill] sm:$0xff]  ;;  %v8053_v41 = vld [vmem:[#allocation51_spill] sm:$0xff] }
 0x6a9   :  { %4685 = vmatpush1.bf16.msra.mxu0 %v8043_v50  ;;  %4749 = vmatpush1.bf16.msra.mxu1 %v8044_v53  ;;  %v8054_v50 = vld [vmem:[#allocation52_spill] sm:$0xff]  ;;  %v8055_v53 = vld [vmem:[#allocation53_spill] sm:$0xff] }
 0x6aa   :  { %4687 = vmatprep.subr.bf16.mxu0 %v8045_v46  ;;  %4751 = vmatprep.subr.bf16.mxu1 %v8046_v45  ;;  %v8056_v46 = vld [vmem:[#allocation54_spill] sm:$0xff]  ;;  %v8057_v45 = vld [vmem:[#allocation55_spill] sm:$0xff] }
 0x6ad   :  { %4689 = vmatpush1.bf16.msra.mxu0 %v8047_v48  ;;  %4753 = vmatpush1.bf16.msra.mxu1 %v8048_v59  ;;  %v8058_v48 = vld [vmem:[#allocation56_spill] sm:$0xff]  ;;  %v8059_v59 = vld [vmem:[#allocation57_spill] sm:$0xff] }
 0x6ae   :  { %4691 = vmatprep.subr.bf16.mxu0 %v8049_v58  ;;  %4755 = vmatprep.subr.bf16.mxu1 %v8050_v16  ;;  %v8060_v58 = vld [vmem:[#allocation58_spill] sm:$0xff]  ;;  %v8061_v16 = vld [vmem:[#allocation59_spill] sm:$0xff] }
 0x6b1   :  { %4693 = vmatpush1.bf16.msra.mxu0 %v8051_v42  ;;  %4757 = vmatpush1.bf16.msra.mxu1 %v8052_v34  ;;  %v8062_v42 = vld [vmem:[#allocation60_spill] sm:$0xff]  ;;  %v8063_v34 = vld [vmem:[#allocation61_spill] sm:$0xff] }
 0x6b2   :  { %4695 = vmatprep.subr.bf16.mxu0 %v8053_v41  ;;  %4759 = vmatprep.subr.bf16.mxu1 %v8054_v50  ;;  %v8064_v41 = vld [vmem:[#allocation62_spill] sm:$0xff]  ;;  %v8065_v50 = vld [vmem:[#allocation63_spill] sm:$0xff] }
 0x6b5   :  { %4697 = vmatpush1.bf16.msra.mxu0 %v8055_v53  ;;  %4761 = vmatpush1.bf16.msra.mxu1 %v8056_v46  ;;  %v8066_v53 = vld [vmem:[#allocation64_spill] sm:$0xff]  ;;  %v8067_v46 = vld [vmem:[#allocation65_spill] sm:$0xff] }
 0x6b6   :  { %4699 = vmatprep.subr.bf16.mxu0 %v8057_v45  ;;  %4763 = vmatprep.subr.bf16.mxu1 %v8058_v48  ;;  %v8068_v45 = vld [vmem:[#allocation66_spill] sm:$0xff]  ;;  %v8069_v48 = vld [vmem:[#allocation67_spill] sm:$0xff] }
 0x6b9   :  { %4701 = vmatpush1.bf16.msra.mxu0 %v8059_v59  ;;  %4765 = vmatpush1.bf16.msra.mxu1 %v8060_v58  ;;  %v8070_v59 = vld [vmem:[#allocation68_spill] sm:$0xff]  ;;  %v8071_v58 = vld [vmem:[#allocation69_spill] sm:$0xff] }
 0x6ba   :  { %4703 = vmatprep.subr.bf16.mxu0 %v8061_v16  ;;  %4767 = vmatprep.subr.bf16.mxu1 %v8062_v42  ;;  %v8072_v16 = vld [vmem:[#allocation70_spill] sm:$0xff]  ;;  %v8073_v42 = vld [vmem:[#allocation71_spill] sm:$0xff] }
 0x6bd   :  { %4705 = vmatpush1.bf16.msra.mxu0 %v8063_v34  ;;  %4769 = vmatpush1.bf16.msra.mxu1 %v8064_v41  ;;  %v8074_v34 = vld [vmem:[#allocation72_spill] sm:$0xff]  ;;  %v8075_v41 = vld [vmem:[#allocation73_spill] sm:$0xff] }
 0x6be   :  { %4707 = vmatprep.subr.bf16.mxu0 %v8065_v50  ;;  %4771 = vmatprep.subr.bf16.mxu1 %v8066_v53  ;;  %v8076_v50 = vld [vmem:[#allocation74_spill] sm:$0xff]  ;;  %v8077_v53 = vld [vmem:[#allocation75_spill] sm:$0xff] }
 0x6c1   :  { %4709 = vmatpush1.bf16.msra.mxu0 %v8067_v46  ;;  %4773 = vmatpush1.bf16.msra.mxu1 %v8068_v45  ;;  %v8078_v46 = vld [vmem:[#allocation76_spill] sm:$0xff] }
 0x6c2   :  { %4711 = vmatprep.subr.bf16.mxu0 %v8069_v48  ;;  %4775 = vmatprep.subr.bf16.mxu1 %v8070_v59 }
 0x6c5   :  { %4713 = vmatpush1.bf16.msra.mxu0 %v8071_v58  ;;  %4777 = vmatpush1.bf16.msra.mxu1 %v8072_v16 }
 0x6c6   :  { %4715 = vmatprep.subr.bf16.mxu0 %v8073_v42  ;;  %4779 = vmatprep.subr.bf16.mxu1 %v8074_v34 }
 0x6c9   :  { %4717 = vmatpush1.bf16.msra.mxu0 %v8075_v41  ;;  %4781 = vmatpush1.bf16.msra.mxu1 %v8076_v50 }
 0x6ca   :  { %4783 = vmatprep.subr.bf16.mxu0 %v8077_v53  ;;  %4847 = vmatprep.subr.bf16.mxu1 %v8078_v46 }
 0x71f   :  { %v2138_v45 = vpop.f32.mrb[24].mxu0  ;;  %v2209_v48 = vpop.f32.mrb[24].mxu1 }
 0x720   :  { %v2356_v59 = vadd.f32 %v2138_v45, %v8079_v25  ;;  %v2140_v35 = vpop.f32.mrb[25].mxu0  ;;  %v2211_v58 = vpop.f32.mrb[25].mxu1  ;;  %v2358_v41 = vadd.f32 %v2209_v48, %v7802_v49 }
 0x721   :  { %v2357_v16 = vadd.f32 %v2140_v35, %v8080_v37  ;;  %v2359_v50 = vadd.f32 %v2211_v58, %v7896_v36 }
 0x722   :  { %v3343_v62 = vmul.f32 -1.442695, %v2356_v59  ;;  %v3345_v34 = vmul.f32 -1.442695, %v2358_v41 }
 0x723   :  { %v3344_v42 = vmul.f32 -1.442695, %v2357_v16 }
 0x724   :  { %5504 = vpow2.f32 %v3343_v62 }
 0x725   :  { %5506 = vpow2.f32 %v3344_v42  ;;  %v8081_v42 = vld [vmem:[#allocation82_spill] sm:$0xff] }
 0x726   :  { %5508 = vtanh.f32 %v2359_v50 }
 0x727   :  { %5510 = vpow2.f32 %v3345_v34 }
 0x72e   :  { %v5505_v53 = vpop.eup %5504 }
 0x72f   :  { %v2369_v33 = vadd.f32 1.0, %v5505_v53  ;;  %v5507_v46 = vpop.eup %5506 }
 0x730   :  { %v2370_v45 = vadd.f32 1.0, %v5507_v46  ;;  %v5509_v25 = vpop.eup %5508  ;;  %v8083_v46 = vld [vmem:[#allocation78_spill] sm:$0xff] }
 0x731   :  { %5512 = vrcp.f32 %v2369_v33  ;;  %v5511_v4 = vpop.eup %5510 }
 0x732   :  { %5514 = vrcp.f32 %v2370_v45  ;;  %v2371_v62 = vadd.f32 1.0, %v5511_v4 }
 0x734   :  { %5516 = vrcp.f32 %v2371_v62 }
 0x73b   :  { %v5513_v35 = vpop.eup %5512 }
 0x73c   :  { %v2380_v59 = vmul.f32 %v5513_v35, %v5509_v25  ;;  %v5515_v16 = vpop.eup %5514 }
 0x73d   :  { %v2379_v37 = vmul.f32 %v5515_v16, %v8081_v42 }
 0x73e   :  { %v5517_v41 = vpop.eup %5516 }
 0x73f   :  { %v6922_v48 = vadd.f32 %v2380_v59, %v2379_v37 }
 0x741   :  { %8082 = vst [vmem:[#allocation83_spill] sm:$0xff] %v6922_v48  ;;  %5518 = vtanh.f32 %v6922_v48 }
 0x74b   :  { %v5519_v50 = vpop.eup %5518 }
 0x74c   :  { %v2383_v53 = vmul.f32 %v5519_v50, %v5517_v41 }
 0x74e   :  { %2480 = vmatprep.mubr.f32.mxu0 %v2383_v53  ;;  %2551 = vmatprep.mubr.f32.mxu1 %v2383_v53 }
 0x75f   :  { %v2280_v33 = vpop.f32.mrb[10].mxu0  ;;  %v2351_v34 = vpop.f32.mrb[10].mxu1 }
 0x760   :  { %v5302_v58 = vadd.f32 %v2280_v33, %v8083_v46  ;;  %v2282_v45 = vpop.f32.mrb[11].mxu0  ;;  %v2353_v25 = vpop.f32.mrb[11].mxu1  ;;  %v5316_v37 = vadd.f32 %v2351_v34, %v7713_v8 }
 0x761   :  { %v5303_v4 = vadd.f32 %v2282_v45, %v7807_v11  ;;  %v5317_v59 = vadd.f32 %v2353_v25, %v7714_v52 }
 0x762   :  { %v3346_v35 = vmul.f32 -1.442695, %v5302_v58  ;;  %v3348_v62 = vmul.f32 -1.442695, %v5316_v37 }
 0x763   :  { %v3347_v16 = vmul.f32 -1.442695, %v5303_v4 }
 0x764   :  { %5520 = vpow2.f32 %v3346_v35 }
 0x765   :  { %5522 = vpow2.f32 %v3347_v16 }
 0x766   :  { %5524 = vtanh.f32 %v5317_v59 }
 0x767   :  { %5526 = vpow2.f32 %v3348_v62  ;;  %v8088_v62 = vld [vmem:[#allocation127_spill] sm:$0xff] }
 0x76e   :  { %v5521_v42 = vpop.eup %5520 }
 0x76f   :  { %v2401_v41 = vadd.f32 1.0, %v5521_v42  ;;  %v5523_v50 = vpop.eup %5522  ;;  %v8089_v42 = vld [vmem:[#allocation128_spill] sm:$0xff] }
 0x770   :  { %v2402_v33 = vadd.f32 1.0, %v5523_v50  ;;  %v5525_v46 = vpop.eup %5524  ;;  %v8091_v50 = vld [vmem:[#allocation130_spill] sm:$0xff] }
 0x771   :  { %5528 = vrcp.f32 %v2401_v41  ;;  %v5527_v48 = vpop.eup %5526  ;;  %v8090_v41 = vld [vmem:[#allocation129_spill] sm:$0xff] }
 0x772   :  { %5530 = vrcp.f32 %v2402_v33  ;;  %v2403_v35 = vadd.f32 1.0, %v5527_v48  ;;  %v8085_v48 = vld [vmem:[#allocation124_spill] sm:$0xff]  ;;  %v8092_v33 = vld [vmem:[#allocation131_spill] sm:$0xff] }
 0x774   :  { %5532 = vrcp.f32 %v2403_v35  ;;  %v8096_v35 = vld [vmem:[#allocation135_spill] sm:$0xff] }
 0x77b   :  { %v5529_v45 = vpop.eup %5528 }
 0x77c   :  { %v2412_v58 = vmul.f32 %v5529_v45, %v5525_v46  ;;  %v5531_v4 = vpop.eup %5530  ;;  %v8087_v46 = vld [vmem:[#allocation126_spill] sm:$0xff]  ;;  %v8093_v45 = vld [vmem:[#allocation132_spill] sm:$0xff] }
 0x77d   :  { %v2411_v16 = vmul.f32 %v5531_v4, %v6780_v2  ;;  %v8084_v2 = vld [vmem:[#allocation123_spill] sm:$0xff]  ;;  %v8095_v4 = vld [vmem:[#allocation134_spill] sm:$0xff] }
 0x77e   :  { %v5533_v25 = vpop.eup %5532 }
 0x77f   :  { %v6930_v34 = vadd.f32 %v2412_v58, %v2411_v16  ;;  %v8094_v58 = vld [vmem:[#allocation133_spill] sm:$0xff]  ;;  %v8097_v16 = vld [vmem:[#allocation136_spill] sm:$0xff] }
 0x781   :  { %5534 = vtanh.f32 %v6930_v34 }
 0x78b   :  { %v5535_v37 = vpop.eup %5534 }
 0x78c   :  { %v6933_v59 = vmul.f32 %v5535_v37, %v5533_v25  ;;  %v8098_v25 = vld [vmem:[#allocation137_spill] sm:$0xff]  ;;  %v8099_v37 = vld [vmem:[#allocation138_spill] sm:$0xff] }
 0x78e   :  { %2481 = vmatmul.mubr.f32.vlgmr.msra.gmra.mrb[26].mxu0 %v6933_v59  ;;  %2552 = vmatmul.mubr.f32.vlgmr.msra.gmra.mrb[26].mxu1 %v6933_v59 }
 0x78f   :  { %4785 = vmatpush1.bf16.msra.mxu0 %v7716_v17  ;;  %4849 = vmatpush1.bf16.msra.mxu1 %v7717_v0 }
 0x790   :  { %2622 = vmatprep.mubr.f32.mxu0 %v2383_v53  ;;  %2693 = vmatprep.mubr.f32.mxu1 %v2383_v53  ;;  %v8086_v53 = vld [vmem:[#allocation125_spill] sm:$0xff] }
 0x791   :  { %4787 = vmatprep.subr.bf16.mxu0 %v6045_v19  ;;  %4851 = vmatprep.subr.bf16.mxu1 %v7718_v61 }
 0x793   :  { %4789 = vmatpush1.bf16.msra.mxu0 %v7719_v29  ;;  %4853 = vmatpush1.bf16.msra.mxu1 %v7720_v28 }
 0x794   :  { %4791 = vmatprep.subr.bf16.mxu0 %v7808_v9  ;;  %4855 = vmatprep.subr.bf16.mxu1 %v7809_v26 }
 0x797   :  { %4793 = vmatpush1.bf16.msra.mxu0 %v7810_v20  ;;  %4857 = vmatpush1.bf16.msra.mxu1 %v7811_v7 }
 0x798   :  { %4795 = vmatprep.subr.bf16.mxu0 %v7812_v43  ;;  %4859 = vmatprep.subr.bf16.mxu1 %v7900_v6 }
 0x79b   :  { %4797 = vmatpush1.bf16.msra.mxu0 %v7901_v54  ;;  %4861 = vmatpush1.bf16.msra.mxu1 %v7902_v44 }
 0x79c   :  { %4799 = vmatprep.subr.bf16.mxu0 %v7903_v1  ;;  %4863 = vmatprep.subr.bf16.mxu1 %v7904_v30 }
 0x79f   :  { %4801 = vmatpush1.bf16.msra.mxu0 %v7992_v51  ;;  %4865 = vmatpush1.bf16.msra.mxu1 %v7906_v27 }
 0x7a0   :  { %4803 = vmatprep.subr.bf16.mxu0 %v7907_v40  ;;  %4867 = vmatprep.subr.bf16.mxu1 %v7908_v47 }
 0x7a3   :  { %4805 = vmatpush1.bf16.msra.mxu0 %v7909_v57  ;;  %4869 = vmatpush1.bf16.msra.mxu1 %v7910_v5 }
 0x7a4   :  { %4807 = vmatprep.subr.bf16.mxu0 %v7911_v14  ;;  %4871 = vmatprep.subr.bf16.mxu1 %v7912_v22 }
 0x7a7   :  { %4809 = vmatpush1.bf16.msra.mxu0 %v7913_v31  ;;  %4873 = vmatpush1.bf16.msra.mxu1 %v7914_v23 }
 0x7a8   :  { %4811 = vmatprep.subr.bf16.mxu0 %v7915_v18  ;;  %4875 = vmatprep.subr.bf16.mxu1 %v7916_v32 }
 0x7ab   :  { %4813 = vmatpush1.bf16.msra.mxu0 %v7830_v60  ;;  %4877 = vmatpush1.bf16.msra.mxu1 %v7831_v3 }
 0x7ac   :  { %4815 = vmatprep.subr.bf16.mxu0 %v7832_v39  ;;  %4879 = vmatprep.subr.bf16.mxu1 %v7833_v15 }
 0x7af   :  { %4817 = vmatpush1.bf16.msra.mxu0 %v7834_v10  ;;  %4881 = vmatpush1.bf16.msra.mxu1 %v7835_v38 }
 0x7b0   :  { %4819 = vmatprep.subr.bf16.mxu0 %v7836_v56  ;;  %4883 = vmatprep.subr.bf16.mxu1 %v7837_v55 }
 0x7b3   :  { %4821 = vmatpush1.bf16.msra.mxu0 %v7838_v63  ;;  %4885 = vmatpush1.bf16.msra.mxu1 %v7839_v21 }
 0x7b4   :  { %4823 = vmatprep.subr.bf16.mxu0 %v7840_v24  ;;  %4887 = vmatprep.subr.bf16.mxu1 %v7754_v13 }
 0x7b7   :  { %4825 = vmatpush1.bf16.msra.mxu0 %v7755_v12  ;;  %4889 = vmatpush1.bf16.msra.mxu1 %v8084_v2 }
 0x7b8   :  { %4827 = vmatprep.subr.bf16.mxu0 %v8085_v48  ;;  %4891 = vmatprep.subr.bf16.mxu1 %v8086_v53 }
 0x7bb   :  { %4829 = vmatpush1.bf16.msra.mxu0 %v8087_v46  ;;  %4893 = vmatpush1.bf16.msra.mxu1 %v8088_v62  ;;  %v8172_v46 = vld [vmem:[#allocation144_spill] sm:$0xff] }
 0x7bc   :  { %4831 = vmatprep.subr.bf16.mxu0 %v8089_v42  ;;  %4895 = vmatprep.subr.bf16.mxu1 %v8090_v41  ;;  %v8100_v42 = vld [vmem:[#allocation139_spill] sm:$0xff]  ;;  %v8101_v41 = vld [vmem:[#allocation140_spill] sm:$0xff] }
 0x7bf   :  { %4833 = vmatpush1.bf16.msra.mxu0 %v8091_v50  ;;  %4897 = vmatpush1.bf16.msra.mxu1 %v8092_v33  ;;  %v8102_v50 = vld [vmem:[#allocation141_spill] sm:$0xff]  ;;  %v8103_v33 = vld [vmem:[#allocation142_spill] sm:$0xff] }
 0x7c0   :  { %4835 = vmatprep.subr.bf16.mxu0 %v8093_v45  ;;  %4899 = vmatprep.subr.bf16.mxu1 %v8094_v58  ;;  %v8104_v45 = vld [vmem:[#allocation143_spill] sm:$0xff] }
 0x7c1   :  { %v8105_v58 = vld [vmem:[#allocation11_spill] sm:$0xff] }
 0x7c3   :  { %4837 = vmatpush1.bf16.msra.mxu0 %v8095_v4  ;;  %4901 = vmatpush1.bf16.msra.mxu1 %v8096_v35  ;;  %v8106_v4 = vld [vmem:[#allocation12_spill] sm:$0xff]  ;;  %v8171_v35 = vld [vmem:[#allocation77_spill] sm:$0xff] }
 0x7c4   :  { %4839 = vmatprep.subr.bf16.mxu0 %v8097_v16  ;;  %4903 = vmatprep.subr.bf16.mxu1 %v8098_v25  ;;  %v8107_v25 = vld [vmem:[#allocation13_spill] sm:$0xff]  ;;  %v8116_v16 = vld [vmem:[#allocation23_spill] sm:$0xff] }
 0x7c7   :  { %4841 = vmatpush1.bf16.msra.mxu0 %v8099_v37  ;;  %4905 = vmatpush1.bf16.msra.mxu1 %v8100_v42  ;;  %v8108_v37 = vld [vmem:[#allocation14_spill] sm:$0xff]  ;;  %v8109_v42 = vld [vmem:[#allocation15_spill] sm:$0xff] }
 0x7c8   :  { %4843 = vmatprep.subr.bf16.mxu0 %v8101_v41  ;;  %4907 = vmatprep.subr.bf16.mxu1 %v8102_v50  ;;  %v8110_v41 = vld [vmem:[#allocation16_spill] sm:$0xff]  ;;  %v8111_v50 = vld [vmem:[#allocation17_spill] sm:$0xff] }
 0x7cb   :  { %4845 = vmatpush1.bf16.msra.mxu0 %v8103_v33  ;;  %4909 = vmatpush1.bf16.msra.mxu1 %v8104_v45  ;;  %v8112_v33 = vld [vmem:[#allocation19_spill] sm:$0xff]  ;;  %v8113_v45 = vld [vmem:[#allocation18_spill] sm:$0xff] }
 0x7cc   :  { %4911 = vmatprep.subr.bf16.mxu0 %v8105_v58  ;;  %4975 = vmatprep.subr.bf16.mxu1 %v8106_v4  ;;  %v8114_v58 = vld [vmem:[#allocation20_spill] sm:$0xff]  ;;  %v8115_v4 = vld [vmem:[#allocation21_spill] sm:$0xff] }
 0x7ce   :  { %2623 = vmatmul.mubr.f32.vlgmr.msra.gmra.mrb[12].mxu0 %v6933_v59  ;;  %2694 = vmatmul.mubr.f32.vlgmr.msra.gmra.mrb[12].mxu1 %v6933_v59  ;;  %v8117_v59 = vld [vmem:[#allocation22_spill] sm:$0xff] }
 0x7cf   :  { %4913 = vmatpush1.bf16.msra.mxu0 %v8107_v25  ;;  %4977 = vmatpush1.bf16.msra.mxu1 %v8108_v37  ;;  %v8118_v25 = vld [vmem:[#allocation24_spill] sm:$0xff]  ;;  %v8119_v37 = vld [vmem:[#allocation25_spill] sm:$0xff] }
 0x7d0   :  { %4915 = vmatprep.subr.bf16.mxu0 %v8109_v42  ;;  %4979 = vmatprep.subr.bf16.mxu1 %v8110_v41  ;;  %v8120_v42 = vld [vmem:[#allocation27_spill] sm:$0xff]  ;;  %v8121_v41 = vld [vmem:[#allocation26_spill] sm:$0xff] }
 0x7d3   :  { %4917 = vmatpush1.bf16.msra.mxu0 %v8111_v50  ;;  %4981 = vmatpush1.bf16.msra.mxu1 %v8112_v33  ;;  %v8122_v50 = vld [vmem:[#allocation28_spill] sm:$0xff]  ;;  %v8123_v33 = vld [vmem:[#allocation29_spill] sm:$0xff] }
 0x7d4   :  { %4919 = vmatprep.subr.bf16.mxu0 %v8113_v45  ;;  %4983 = vmatprep.subr.bf16.mxu1 %v8114_v58  ;;  %v8124_v45 = vld [vmem:[#allocation30_spill] sm:$0xff]  ;;  %v8125_v58 = vld [vmem:[#allocation31_spill] sm:$0xff] }
 0x7d7   :  { %4921 = vmatpush1.bf16.msra.mxu0 %v8115_v4  ;;  %4985 = vmatpush1.bf16.msra.mxu1 %v8116_v16  ;;  %v8126_v4 = vld [vmem:[#allocation32_spill] sm:$0xff]  ;;  %v8127_v16 = vld [vmem:[#allocation33_spill] sm:$0xff] }
 0x7d8   :  { %4923 = vmatprep.subr.bf16.mxu0 %v8117_v59  ;;  %4987 = vmatprep.subr.bf16.mxu1 %v8118_v25  ;;  %v8128_v59 = vld [vmem:[#allocation34_spill] sm:$0xff]  ;;  %v8129_v25 = vld [vmem:[#allocation35_spill] sm:$0xff] }
 0x7db   :  { %4925 = vmatpush1.bf16.msra.mxu0 %v8119_v37  ;;  %4989 = vmatpush1.bf16.msra.mxu1 %v8120_v42  ;;  %v8130_v37 = vld [vmem:[#allocation36_spill] sm:$0xff]  ;;  %v8131_v42 = vld [vmem:[#allocation37_spill] sm:$0xff] }
 0x7dc   :  { %4927 = vmatprep.subr.bf16.mxu0 %v8121_v41  ;;  %4991 = vmatprep.subr.bf16.mxu1 %v8122_v50  ;;  %v8132_v41 = vld [vmem:[#allocation38_spill] sm:$0xff]  ;;  %v8133_v50 = vld [vmem:[#allocation39_spill] sm:$0xff] }
 0x7df   :  { %4929 = vmatpush1.bf16.msra.mxu0 %v8123_v33  ;;  %4993 = vmatpush1.bf16.msra.mxu1 %v8124_v45  ;;  %v8134_v33 = vld [vmem:[#allocation40_spill] sm:$0xff]  ;;  %v8135_v45 = vld [vmem:[#allocation41_spill] sm:$0xff] }
 0x7e0   :  { %4931 = vmatprep.subr.bf16.mxu0 %v8125_v58  ;;  %4995 = vmatprep.subr.bf16.mxu1 %v8126_v4  ;;  %v8136_v58 = vld [vmem:[#allocation42_spill] sm:$0xff]  ;;  %v8137_v4 = vld [vmem:[#allocation43_spill] sm:$0xff] }
 0x7e3   :  { %4933 = vmatpush1.bf16.msra.mxu0 %v8127_v16  ;;  %4997 = vmatpush1.bf16.msra.mxu1 %v8128_v59  ;;  %v8138_v16 = vld [vmem:[#allocation44_spill] sm:$0xff]  ;;  %v8139_v59 = vld [vmem:[#allocation45_spill] sm:$0xff] }
 0x7e4   :  { %4935 = vmatprep.subr.bf16.mxu0 %v8129_v25  ;;  %4999 = vmatprep.subr.bf16.mxu1 %v8130_v37  ;;  %v8140_v25 = vld [vmem:[#allocation46_spill] sm:$0xff]  ;;  %v8141_v37 = vld [vmem:[#allocation47_spill] sm:$0xff] }
 0x7e7   :  { %4937 = vmatpush1.bf16.msra.mxu0 %v8131_v42  ;;  %5001 = vmatpush1.bf16.msra.mxu1 %v8132_v41  ;;  %v8142_v42 = vld [vmem:[#allocation48_spill] sm:$0xff]  ;;  %v8143_v41 = vld [vmem:[#allocation49_spill] sm:$0xff] }
 0x7e8   :  { %4939 = vmatprep.subr.bf16.mxu0 %v8133_v50  ;;  %5003 = vmatprep.subr.bf16.mxu1 %v8134_v33  ;;  %v8144_v50 = vld [vmem:[#allocation50_spill] sm:$0xff]  ;;  %v8145_v33 = vld [vmem:[#allocation51_spill] sm:$0xff] }
 0x7eb   :  { %4941 = vmatpush1.bf16.msra.mxu0 %v8135_v45  ;;  %5005 = vmatpush1.bf16.msra.mxu1 %v8136_v58  ;;  %v8146_v45 = vld [vmem:[#allocation52_spill] sm:$0xff]  ;;  %v8147_v58 = vld [vmem:[#allocation53_spill] sm:$0xff] }
 0x7ec   :  { %4943 = vmatprep.subr.bf16.mxu0 %v8137_v4  ;;  %5007 = vmatprep.subr.bf16.mxu1 %v8138_v16  ;;  %v8148_v4 = vld [vmem:[#allocation54_spill] sm:$0xff]  ;;  %v8149_v16 = vld [vmem:[#allocation55_spill] sm:$0xff] }
 0x7ef   :  { %4945 = vmatpush1.bf16.msra.mxu0 %v8139_v59  ;;  %5009 = vmatpush1.bf16.msra.mxu1 %v8140_v25  ;;  %v8150_v59 = vld [vmem:[#allocation56_spill] sm:$0xff]  ;;  %v8151_v25 = vld [vmem:[#allocation57_spill] sm:$0xff] }
 0x7f0   :  { %4947 = vmatprep.subr.bf16.mxu0 %v8141_v37  ;;  %5011 = vmatprep.subr.bf16.mxu1 %v8142_v42  ;;  %v8152_v37 = vld [vmem:[#allocation58_spill] sm:$0xff]  ;;  %v8153_v42 = vld [vmem:[#allocation59_spill] sm:$0xff] }
 0x7f3   :  { %4949 = vmatpush1.bf16.msra.mxu0 %v8143_v41  ;;  %5013 = vmatpush1.bf16.msra.mxu1 %v8144_v50  ;;  %v8154_v41 = vld [vmem:[#allocation60_spill] sm:$0xff]  ;;  %v8155_v50 = vld [vmem:[#allocation61_spill] sm:$0xff] }
 0x7f4   :  { %4951 = vmatprep.subr.bf16.mxu0 %v8145_v33  ;;  %5015 = vmatprep.subr.bf16.mxu1 %v8146_v45  ;;  %v8156_v33 = vld [vmem:[#allocation62_spill] sm:$0xff]  ;;  %v8157_v45 = vld [vmem:[#allocation63_spill] sm:$0xff] }
 0x7f7   :  { %4953 = vmatpush1.bf16.msra.mxu0 %v8147_v58  ;;  %5017 = vmatpush1.bf16.msra.mxu1 %v8148_v4  ;;  %v8158_v58 = vld [vmem:[#allocation64_spill] sm:$0xff]  ;;  %v8159_v4 = vld [vmem:[#allocation65_spill] sm:$0xff] }
 0x7f8   :  { %4955 = vmatprep.subr.bf16.mxu0 %v8149_v16  ;;  %5019 = vmatprep.subr.bf16.mxu1 %v8150_v59  ;;  %v8160_v16 = vld [vmem:[#allocation66_spill] sm:$0xff]  ;;  %v8161_v59 = vld [vmem:[#allocation67_spill] sm:$0xff] }
 0x7fb   :  { %4957 = vmatpush1.bf16.msra.mxu0 %v8151_v25  ;;  %5021 = vmatpush1.bf16.msra.mxu1 %v8152_v37  ;;  %v8162_v25 = vld [vmem:[#allocation68_spill] sm:$0xff]  ;;  %v8163_v37 = vld [vmem:[#allocation69_spill] sm:$0xff] }
 0x7fc   :  { %4959 = vmatprep.subr.bf16.mxu0 %v8153_v42  ;;  %5023 = vmatprep.subr.bf16.mxu1 %v8154_v41  ;;  %v8164_v42 = vld [vmem:[#allocation70_spill] sm:$0xff]  ;;  %v8165_v41 = vld [vmem:[#allocation71_spill] sm:$0xff] }
 0x7ff   :  { %4961 = vmatpush1.bf16.msra.mxu0 %v8155_v50  ;;  %5025 = vmatpush1.bf16.msra.mxu1 %v8156_v33  ;;  %v8166_v50 = vld [vmem:[#allocation72_spill] sm:$0xff]  ;;  %v8167_v33 = vld [vmem:[#allocation73_spill] sm:$0xff] }
 0x800   :  { %4963 = vmatprep.subr.bf16.mxu0 %v8157_v45  ;;  %5027 = vmatprep.subr.bf16.mxu1 %v8158_v58  ;;  %v8168_v45 = vld [vmem:[#allocation74_spill] sm:$0xff]  ;;  %v8169_v58 = vld [vmem:[#allocation75_spill] sm:$0xff] }
 0x803   :  { %4965 = vmatpush1.bf16.msra.mxu0 %v8159_v4  ;;  %5029 = vmatpush1.bf16.msra.mxu1 %v8160_v16  ;;  %v8170_v4 = vld [vmem:[#allocation76_spill] sm:$0xff] }
 0x804   :  { %4967 = vmatprep.subr.bf16.mxu0 %v8161_v59  ;;  %5031 = vmatprep.subr.bf16.mxu1 %v8162_v25 }
 0x807   :  { %4969 = vmatpush1.bf16.msra.mxu0 %v8163_v37  ;;  %5033 = vmatpush1.bf16.msra.mxu1 %v8164_v42 }
 0x808   :  { %4971 = vmatprep.subr.bf16.mxu0 %v8165_v41  ;;  %5035 = vmatprep.subr.bf16.mxu1 %v8166_v50 }
 0x80b   :  { %4973 = vmatpush1.bf16.msra.mxu0 %v8167_v33  ;;  %5037 = vmatpush1.bf16.msra.mxu1 %v8168_v45 }
 0x80c   :  { %5039 = vmatprep.subr.bf16.mxu0 %v8169_v58  ;;  %5103 = vmatprep.subr.bf16.mxu1 %v8170_v4 }
 0x861   :  { %v2482_v16 = vpop.f32.mrb[26].mxu0  ;;  %v2553_v59 = vpop.f32.mrb[26].mxu1 }
 0x862   :  { %v2700_v25 = vadd.f32 %v2482_v16, %v8171_v35  ;;  %v2484_v62 = vpop.f32.mrb[27].mxu0  ;;  %v2555_v37 = vpop.f32.mrb[27].mxu1  ;;  %v2702_v33 = vadd.f32 %v2553_v59, %v7802_v49 }
 0x863   :  { %v2701_v42 = vadd.f32 %v2484_v62, %v8172_v46  ;;  %v2703_v45 = vadd.f32 %v2555_v37, %v7896_v36 }
 0x864   :  { %v3349_v53 = vmul.f32 -1.442695, %v2700_v25  ;;  %v3351_v50 = vmul.f32 -1.442695, %v2702_v33 }
 0x865   :  { %v3350_v41 = vmul.f32 -1.442695, %v2701_v42 }
 0x866   :  { %5536 = vpow2.f32 %v3349_v53 }
 0x867   :  { %5538 = vpow2.f32 %v3350_v41  ;;  %v8173_v41 = vld [vmem:[#allocation83_spill] sm:$0xff] }
 0x868   :  { %5540 = vtanh.f32 %v2703_v45 }
 0x869   :  { %5542 = vpow2.f32 %v3351_v50 }
 0x870   :  { %v5537_v58 = vpop.eup %5536 }
 0x871   :  { %v2713_v48 = vadd.f32 1.0, %v5537_v58  ;;  %v5539_v4 = vpop.eup %5538  ;;  %v8175_v58 = vld [vmem:[#allocation78_spill] sm:$0xff] }
 0x872   :  { %v2714_v16 = vadd.f32 1.0, %v5539_v4  ;;  %v5541_v35 = vpop.eup %5540 }
 0x873   :  { %5544 = vrcp.f32 %v2713_v48  ;;  %v5543_v2 = vpop.eup %5542 }
 0x874   :  { %5546 = vrcp.f32 %v2714_v16  ;;  %v2715_v53 = vadd.f32 1.0, %v5543_v2 }
 0x876   :  { %5548 = vrcp.f32 %v2715_v53 }
 0x87d   :  { %v5545_v62 = vpop.eup %5544 }
 0x87e   :  { %v2724_v25 = vmul.f32 %v5545_v62, %v5541_v35  ;;  %v5547_v42 = vpop.eup %5546 }
 0x87f   :  { %v2723_v46 = vmul.f32 %v5547_v42, %v8173_v41 }
 0x880   :  { %v5549_v33 = vpop.eup %5548 }
 0x881   :  { %v7072_v59 = vadd.f32 %v2724_v25, %v2723_v46 }
 0x883   :  { %8174 = vst [vmem:[#allocation84_spill] sm:$0xff] %v7072_v59  ;;  %5550 = vtanh.f32 %v7072_v59 }
 0x88d   :  { %v5551_v45 = vpop.eup %5550 }
 0x88e   :  { %v2727_v37 = vmul.f32 %v5551_v45, %v5549_v33 }
 0x890   :  { %2824 = vmatprep.mubr.f32.mxu0 %v2727_v37  ;;  %2895 = vmatprep.mubr.f32.mxu1 %v2727_v37 }
 0x8a1   :  { %v2624_v48 = vpop.f32.mrb[12].mxu0  ;;  %v2695_v50 = vpop.f32.mrb[12].mxu1 }
 0x8a2   :  { %v5304_v4 = vadd.f32 %v2624_v48, %v8175_v58  ;;  %v2626_v16 = vpop.f32.mrb[13].mxu0  ;;  %v2697_v35 = vpop.f32.mrb[13].mxu1  ;;  %v5318_v46 = vadd.f32 %v2695_v50, %v7713_v8 }
 0x8a3   :  { %v5305_v2 = vadd.f32 %v2626_v16, %v7807_v11  ;;  %v5319_v25 = vadd.f32 %v2697_v35, %v7714_v52 }
 0x8a4   :  { %v3352_v62 = vmul.f32 -1.442695, %v5304_v4  ;;  %v3354_v53 = vmul.f32 -1.442695, %v5318_v46 }
 0x8a5   :  { %v3353_v42 = vmul.f32 -1.442695, %v5305_v2 }
 0x8a6   :  { %5552 = vpow2.f32 %v3352_v62 }
 0x8a7   :  { %5554 = vpow2.f32 %v3353_v42 }
 0x8a8   :  { %5556 = vtanh.f32 %v5319_v25 }
 0x8a9   :  { %5558 = vpow2.f32 %v3354_v53  ;;  %v8221_v53 = vld [vmem:[#allocation35_spill] sm:$0xff] }
 0x8b0   :  { %v5553_v41 = vpop.eup %5552 }
 0x8b1   :  { %v2745_v33 = vadd.f32 1.0, %v5553_v41  ;;  %v5555_v45 = vpop.eup %5554  ;;  %v8222_v41 = vld [vmem:[#allocation36_spill] sm:$0xff] }
 0x8b2   :  { %v2746_v48 = vadd.f32 1.0, %v5555_v45  ;;  %v5557_v58 = vpop.eup %5556  ;;  %v8224_v45 = vld [vmem:[#allocation38_spill] sm:$0xff] }
 0x8b3   :  { %5560 = vrcp.f32 %v2745_v33  ;;  %v5559_v59 = vpop.eup %5558  ;;  %v8223_v33 = vld [vmem:[#allocation37_spill] sm:$0xff] }
 0x8b4   :  { %5562 = vrcp.f32 %v2746_v48  ;;  %v2747_v62 = vadd.f32 1.0, %v5559_v59  ;;  %v8218_v59 = vld [vmem:[#allocation32_spill] sm:$0xff]  ;;  %v8225_v48 = vld [vmem:[#allocation39_spill] sm:$0xff] }
 0x8b6   :  { %5564 = vrcp.f32 %v2747_v62  ;;  %v8229_v62 = vld [vmem:[#allocation43_spill] sm:$0xff] }
 0x8bd   :  { %v5561_v16 = vpop.eup %5560 }
 0x8be   :  { %v2756_v4 = vmul.f32 %v5561_v16, %v5557_v58  ;;  %v5563_v2 = vpop.eup %5562  ;;  %v8220_v58 = vld [vmem:[#allocation34_spill] sm:$0xff]  ;;  %v8226_v16 = vld [vmem:[#allocation40_spill] sm:$0xff] }
 0x8bf   :  { %v2755_v42 = vmul.f32 %v5563_v2, %v6930_v34  ;;  %v8217_v34 = vld [vmem:[#allocation31_spill] sm:$0xff]  ;;  %v8228_v2 = vld [vmem:[#allocation42_spill] sm:$0xff] }
 0x8c0   :  { %v5565_v35 = vpop.eup %5564 }
 0x8c1   :  { %v7080_v50 = vadd.f32 %v2756_v4, %v2755_v42  ;;  %v8227_v4 = vld [vmem:[#allocation41_spill] sm:$0xff]  ;;  %v8230_v42 = vld [vmem:[#allocation44_spill] sm:$0xff] }
 0x8c3   :  { %5566 = vtanh.f32 %v7080_v50 }
 0x8cd   :  { %v5567_v46 = vpop.eup %5566 }
 0x8ce   :  { %v7083_v25 = vmul.f32 %v5567_v46, %v5565_v35  ;;  %v8231_v35 = vld [vmem:[#allocation45_spill] sm:$0xff]  ;;  %v8232_v46 = vld [vmem:[#allocation46_spill] sm:$0xff] }
 0x8d0   :  { %2825 = vmatmul.mubr.f32.vlgmr.msra.gmra.mrb[28].mxu0 %v7083_v25  ;;  %2896 = vmatmul.mubr.f32.vlgmr.msra.gmra.mrb[28].mxu1 %v7083_v25 }
 0x8d1   :  { %5041 = vmatpush1.bf16.msra.mxu0 %v7716_v17  ;;  %5105 = vmatpush1.bf16.msra.mxu1 %v7717_v0  ;;  %v8177_v17 = vld [vmem:[#allocation124_spill] sm:$0xff]  ;;  %v8178_v0 = vld [vmem:[#allocation125_spill] sm:$0xff] }
 0x8d2   :  { %2966 = vmatprep.mubr.f32.mxu0 %v2727_v37  ;;  %3037 = vmatprep.mubr.f32.mxu1 %v2727_v37  ;;  %v8219_v37 = vld [vmem:[#allocation33_spill] sm:$0xff] }
 0x8d3   :  { %5043 = vmatprep.subr.bf16.mxu0 %v6045_v19  ;;  %5107 = vmatprep.subr.bf16.mxu1 %v7718_v61  ;;  %v8176_v19 = vld [vmem:[#allocation123_spill] sm:$0xff]  ;;  %v8179_v61 = vld [vmem:[#allocation126_spill] sm:$0xff] }
 0x8d5   :  { %5045 = vmatpush1.bf16.msra.mxu0 %v7719_v29  ;;  %5109 = vmatpush1.bf16.msra.mxu1 %v7720_v28  ;;  %v8180_v29 = vld [vmem:[#allocation127_spill] sm:$0xff]  ;;  %v8181_v28 = vld [vmem:[#allocation128_spill] sm:$0xff] }
 0x8d6   :  { %5047 = vmatprep.subr.bf16.mxu0 %v7808_v9  ;;  %5111 = vmatprep.subr.bf16.mxu1 %v7809_v26  ;;  %v8182_v9 = vld [vmem:[#allocation129_spill] sm:$0xff]  ;;  %v8183_v26 = vld [vmem:[#allocation130_spill] sm:$0xff] }
 0x8d9   :  { %5049 = vmatpush1.bf16.msra.mxu0 %v7810_v20  ;;  %5113 = vmatpush1.bf16.msra.mxu1 %v7811_v7  ;;  %v8184_v20 = vld [vmem:[#allocation131_spill] sm:$0xff]  ;;  %v8187_v7 = vld [vmem:[#allocation134_spill] sm:$0xff] }
 0x8da   :  { %5051 = vmatprep.subr.bf16.mxu0 %v7812_v43  ;;  %5115 = vmatprep.subr.bf16.mxu1 %v7900_v6  ;;  %v8188_v43 = vld [vmem:[#allocation135_spill] sm:$0xff]  ;;  %v8200_v6 = vld [vmem:[#allocation14_spill] sm:$0xff] }
 0x8dd   :  { %5053 = vmatpush1.bf16.msra.mxu0 %v7901_v54  ;;  %5117 = vmatpush1.bf16.msra.mxu1 %v7902_v44  ;;  %v8201_v54 = vld [vmem:[#allocation15_spill] sm:$0xff]  ;;  %v8202_v44 = vld [vmem:[#allocation16_spill] sm:$0xff] }
 0x8de   :  { %5055 = vmatprep.subr.bf16.mxu0 %v7903_v1  ;;  %5119 = vmatprep.subr.bf16.mxu1 %v7904_v30  ;;  %v8203_v1 = vld [vmem:[#allocation17_spill] sm:$0xff]  ;;  %v8204_v30 = vld [vmem:[#allocation19_spill] sm:$0xff] }
 0x8e1   :  { %5057 = vmatpush1.bf16.msra.mxu0 %v7992_v51  ;;  %5121 = vmatpush1.bf16.msra.mxu1 %v7906_v27  ;;  %v8206_v27 = vld [vmem:[#allocation20_spill] sm:$0xff]  ;;  %v8216_v51 = vld [vmem:[#allocation30_spill] sm:$0xff] }
 0x8e2   :  { %5059 = vmatprep.subr.bf16.mxu0 %v7907_v40  ;;  %5123 = vmatprep.subr.bf16.mxu1 %v7908_v47  ;;  %v8207_v40 = vld [vmem:[#allocation21_spill] sm:$0xff]  ;;  %v8208_v47 = vld [vmem:[#allocation23_spill] sm:$0xff] }
 0x8e5   :  { %5061 = vmatpush1.bf16.msra.mxu0 %v7909_v57  ;;  %5125 = vmatpush1.bf16.msra.mxu1 %v7910_v5  ;;  %v8209_v57 = vld [vmem:[#allocation22_spill] sm:$0xff]  ;;  %v8210_v5 = vld [vmem:[#allocation24_spill] sm:$0xff] }
 0x8e6   :  { %5063 = vmatprep.subr.bf16.mxu0 %v7911_v14  ;;  %5127 = vmatprep.subr.bf16.mxu1 %v7912_v22  ;;  %v8211_v14 = vld [vmem:[#allocation25_spill] sm:$0xff]  ;;  %v8212_v22 = vld [vmem:[#allocation27_spill] sm:$0xff] }
 0x8e9   :  { %5065 = vmatpush1.bf16.msra.mxu0 %v7913_v31  ;;  %5129 = vmatpush1.bf16.msra.mxu1 %v7914_v23  ;;  %v8213_v31 = vld [vmem:[#allocation26_spill] sm:$0xff]  ;;  %v8214_v23 = vld [vmem:[#allocation28_spill] sm:$0xff] }
 0x8ea   :  { %5067 = vmatprep.subr.bf16.mxu0 %v7915_v18  ;;  %5131 = vmatprep.subr.bf16.mxu1 %v7916_v32  ;;  %v8205_v32 = vld [vmem:[#allocation18_spill] sm:$0xff]  ;;  %v8215_v18 = vld [vmem:[#allocation29_spill] sm:$0xff] }
 0x8ed   :  { %5069 = vmatpush1.bf16.msra.mxu0 %v7830_v60  ;;  %5133 = vmatpush1.bf16.msra.mxu1 %v7831_v3  ;;  %v8195_v60 = vld [vmem:[#allocation142_spill] sm:$0xff]  ;;  %v8196_v3 = vld [vmem:[#allocation143_spill] sm:$0xff] }
 0x8ee   :  { %5071 = vmatprep.subr.bf16.mxu0 %v7832_v39  ;;  %5135 = vmatprep.subr.bf16.mxu1 %v7833_v15  ;;  %v8197_v39 = vld [vmem:[#allocation11_spill] sm:$0xff]  ;;  %v8198_v15 = vld [vmem:[#allocation12_spill] sm:$0xff] }
 0x8f1   :  { %5073 = vmatpush1.bf16.msra.mxu0 %v7834_v10  ;;  %5137 = vmatpush1.bf16.msra.mxu1 %v7835_v38  ;;  %v8189_v38 = vld [vmem:[#allocation136_spill] sm:$0xff]  ;;  %v8199_v10 = vld [vmem:[#allocation13_spill] sm:$0xff] }
 0x8f2   :  { %5075 = vmatprep.subr.bf16.mxu0 %v7836_v56  ;;  %5139 = vmatprep.subr.bf16.mxu1 %v7837_v55  ;;  %v8190_v56 = vld [vmem:[#allocation137_spill] sm:$0xff]  ;;  %v8191_v55 = vld [vmem:[#allocation138_spill] sm:$0xff] }
 0x8f5   :  { %5077 = vmatpush1.bf16.msra.mxu0 %v7838_v63  ;;  %5141 = vmatpush1.bf16.msra.mxu1 %v7839_v21  ;;  %v8192_v63 = vld [vmem:[#allocation139_spill] sm:$0xff]  ;;  %v8193_v21 = vld [vmem:[#allocation140_spill] sm:$0xff] }
 0x8f6   :  { %5079 = vmatprep.subr.bf16.mxu0 %v7840_v24  ;;  %5143 = vmatprep.subr.bf16.mxu1 %v7754_v13  ;;  %v8185_v13 = vld [vmem:[#allocation132_spill] sm:$0xff]  ;;  %v8194_v24 = vld [vmem:[#allocation141_spill] sm:$0xff] }
 0x8f9   :  { %5081 = vmatpush1.bf16.msra.mxu0 %v7755_v12  ;;  %5145 = vmatpush1.bf16.msra.mxu1 %v8176_v19  ;;  %v8186_v12 = vld [vmem:[#allocation133_spill] sm:$0xff]  ;;  %v8234_v19 = vld [vmem:[#allocation48_spill] sm:$0xff] }
 0x8fa   :  { %5083 = vmatprep.subr.bf16.mxu0 %v8177_v17  ;;  %5147 = vmatprep.subr.bf16.mxu1 %v8178_v0  ;;  %v8235_v17 = vld [vmem:[#allocation49_spill] sm:$0xff]  ;;  %v8236_v0 = vld [vmem:[#allocation50_spill] sm:$0xff] }
 0x8fd   :  { %5085 = vmatpush1.bf16.msra.mxu0 %v8179_v61  ;;  %5149 = vmatpush1.bf16.msra.mxu1 %v8180_v29  ;;  %v8237_v61 = vld [vmem:[#allocation51_spill] sm:$0xff]  ;;  %v8238_v29 = vld [vmem:[#allocation52_spill] sm:$0xff] }
 0x8fe   :  { %5087 = vmatprep.subr.bf16.mxu0 %v8181_v28  ;;  %5151 = vmatprep.subr.bf16.mxu1 %v8182_v9  ;;  %v8239_v28 = vld [vmem:[#allocation53_spill] sm:$0xff]  ;;  %v8240_v9 = vld [vmem:[#allocation54_spill] sm:$0xff] }
 0x901   :  { %5089 = vmatpush1.bf16.msra.mxu0 %v8183_v26  ;;  %5153 = vmatpush1.bf16.msra.mxu1 %v8184_v20  ;;  %v8241_v26 = vld [vmem:[#allocation55_spill] sm:$0xff]  ;;  %v8242_v20 = vld [vmem:[#allocation56_spill] sm:$0xff] }
 0x902   :  { %5091 = vmatprep.subr.bf16.mxu0 %v8185_v13  ;;  %5155 = vmatprep.subr.bf16.mxu1 %v8186_v12  ;;  %v8243_v13 = vld [vmem:[#allocation57_spill] sm:$0xff]  ;;  %v8244_v12 = vld [vmem:[#allocation58_spill] sm:$0xff] }
 0x905   :  { %5093 = vmatpush1.bf16.msra.mxu0 %v8187_v7  ;;  %5157 = vmatpush1.bf16.msra.mxu1 %v8188_v43  ;;  %v8245_v7 = vld [vmem:[#allocation59_spill] sm:$0xff]  ;;  %v8246_v43 = vld [vmem:[#allocation60_spill] sm:$0xff] }
 0x906   :  { %5095 = vmatprep.subr.bf16.mxu0 %v8189_v38  ;;  %5159 = vmatprep.subr.bf16.mxu1 %v8190_v56  ;;  %v8247_v38 = vld [vmem:[#allocation61_spill] sm:$0xff]  ;;  %v8248_v56 = vld [vmem:[#allocation62_spill] sm:$0xff] }
 0x909   :  { %5097 = vmatpush1.bf16.msra.mxu0 %v8191_v55  ;;  %5161 = vmatpush1.bf16.msra.mxu1 %v8192_v63  ;;  %v8249_v55 = vld [vmem:[#allocation63_spill] sm:$0xff]  ;;  %v8250_v63 = vld [vmem:[#allocation64_spill] sm:$0xff] }
 0x90a   :  { %5099 = vmatprep.subr.bf16.mxu0 %v8193_v21  ;;  %5163 = vmatprep.subr.bf16.mxu1 %v8194_v24  ;;  %v8251_v21 = vld [vmem:[#allocation65_spill] sm:$0xff]  ;;  %v8252_v24 = vld [vmem:[#allocation66_spill] sm:$0xff] }
 0x90d   :  { %5101 = vmatpush1.bf16.msra.mxu0 %v8195_v60  ;;  %5165 = vmatpush1.bf16.msra.mxu1 %v8196_v3  ;;  %v8253_v60 = vld [vmem:[#allocation67_spill] sm:$0xff]  ;;  %v8254_v3 = vld [vmem:[#allocation68_spill] sm:$0xff] }
 0x90e   :  { %5167 = vmatprep.subr.bf16.mxu0 %v8197_v39  ;;  %5231 = vmatprep.subr.bf16.mxu1 %v8198_v15  ;;  %v8255_v39 = vld [vmem:[#allocation69_spill] sm:$0xff]  ;;  %v8256_v15 = vld [vmem:[#allocation70_spill] sm:$0xff] }
 0x910   :  { %2967 = vmatmul.mubr.f32.vlgmr.msra.gmra.mrb[14].mxu0 %v7083_v25  ;;  %3038 = vmatmul.mubr.f32.vlgmr.msra.gmra.mrb[14].mxu1 %v7083_v25  ;;  %v8233_v25 = vld [vmem:[#allocation47_spill] sm:$0xff] }
 0x911   :  { %5169 = vmatpush1.bf16.msra.mxu0 %v8199_v10  ;;  %5233 = vmatpush1.bf16.msra.mxu1 %v8200_v6  ;;  %v8257_v10 = vld [vmem:[#allocation71_spill] sm:$0xff]  ;;  %v8258_v6 = vld [vmem:[#allocation72_spill] sm:$0xff] }
 0x912   :  { %5171 = vmatprep.subr.bf16.mxu0 %v8201_v54  ;;  %5235 = vmatprep.subr.bf16.mxu1 %v8202_v44  ;;  %v8259_v54 = vld [vmem:[#allocation73_spill] sm:$0xff]  ;;  %v8260_v44 = vld [vmem:[#allocation74_spill] sm:$0xff] }
 0x915   :  { %5173 = vmatpush1.bf16.msra.mxu0 %v8203_v1  ;;  %5237 = vmatpush1.bf16.msra.mxu1 %v8204_v30 }
 0x916   :  { %5175 = vmatprep.subr.bf16.mxu0 %v8205_v32  ;;  %5239 = vmatprep.subr.bf16.mxu1 %v8206_v27  ;;  %v8261_v32 = vld [vmem:[#allocation77_spill] sm:$0xff] }
 0x919   :  { %5177 = vmatpush1.bf16.msra.mxu0 %v8207_v40  ;;  %5241 = vmatpush1.bf16.msra.mxu1 %v8208_v47 }
 0x91a   :  { %5179 = vmatprep.subr.bf16.mxu0 %v8209_v57  ;;  %5243 = vmatprep.subr.bf16.mxu1 %v8210_v5  ;;  %v8262_v57 = vld [vmem:[#allocation144_spill] sm:$0xff] }
 0x91d   :  { %5181 = vmatpush1.bf16.msra.mxu0 %v8211_v14  ;;  %5245 = vmatpush1.bf16.msra.mxu1 %v8212_v22 }
 0x91e   :  { %5183 = vmatprep.subr.bf16.mxu0 %v8213_v31  ;;  %5247 = vmatprep.subr.bf16.mxu1 %v8214_v23 }
 0x921   :  { %5185 = vmatpush1.bf16.msra.mxu0 %v8215_v18  ;;  %5249 = vmatpush1.bf16.msra.mxu1 %v8216_v51 }
 0x922   :  { %5187 = vmatprep.subr.bf16.mxu0 %v8217_v34  ;;  %5251 = vmatprep.subr.bf16.mxu1 %v8218_v59 }
 0x925   :  { %5189 = vmatpush1.bf16.msra.mxu0 %v8219_v37  ;;  %5253 = vmatpush1.bf16.msra.mxu1 %v8220_v58 }
 0x926   :  { %5191 = vmatprep.subr.bf16.mxu0 %v8221_v53  ;;  %5255 = vmatprep.subr.bf16.mxu1 %v8222_v41 }
 0x929   :  { %5193 = vmatpush1.bf16.msra.mxu0 %v8223_v33  ;;  %5257 = vmatpush1.bf16.msra.mxu1 %v8224_v45 }
 0x92a   :  { %5195 = vmatprep.subr.bf16.mxu0 %v8225_v48  ;;  %5259 = vmatprep.subr.bf16.mxu1 %v8226_v16  ;;  %v8263_v16 = vld [vmem:[#allocation84_spill] sm:$0xff] }
 0x92d   :  { %5197 = vmatpush1.bf16.msra.mxu0 %v8227_v4  ;;  %5261 = vmatpush1.bf16.msra.mxu1 %v8228_v2 }
 0x92e   :  { %5199 = vmatprep.subr.bf16.mxu0 %v8229_v62  ;;  %5263 = vmatprep.subr.bf16.mxu1 %v8230_v42 }
 0x931   :  { %5201 = vmatpush1.bf16.msra.mxu0 %v8231_v35  ;;  %5265 = vmatpush1.bf16.msra.mxu1 %v8232_v46 }
 0x932   :  { %5203 = vmatprep.subr.bf16.mxu0 %v8233_v25  ;;  %5267 = vmatprep.subr.bf16.mxu1 %v8234_v19  ;;  %v8264_v19 = vld [vmem:[#allocation78_spill] sm:$0xff] }
 0x935   :  { %5205 = vmatpush1.bf16.msra.mxu0 %v8235_v17  ;;  %5269 = vmatpush1.bf16.msra.mxu1 %v8236_v0 }
 0x936   :  { %5207 = vmatprep.subr.bf16.mxu0 %v8237_v61  ;;  %5271 = vmatprep.subr.bf16.mxu1 %v8238_v29 }
 0x939   :  { %5209 = vmatpush1.bf16.msra.mxu0 %v8239_v28  ;;  %5273 = vmatpush1.bf16.msra.mxu1 %v8240_v9 }
 0x93a   :  { %5211 = vmatprep.subr.bf16.mxu0 %v8241_v26  ;;  %5275 = vmatprep.subr.bf16.mxu1 %v8242_v20 }
 0x93d   :  { %5213 = vmatpush1.bf16.msra.mxu0 %v8243_v13  ;;  %5277 = vmatpush1.bf16.msra.mxu1 %v8244_v12 }
 0x93e   :  { %5215 = vmatprep.subr.bf16.mxu0 %v8245_v7  ;;  %5279 = vmatprep.subr.bf16.mxu1 %v8246_v43 }
 0x941   :  { %5217 = vmatpush1.bf16.msra.mxu0 %v8247_v38  ;;  %5281 = vmatpush1.bf16.msra.mxu1 %v8248_v56 }
 0x942   :  { %5219 = vmatprep.subr.bf16.mxu0 %v8249_v55  ;;  %5283 = vmatprep.subr.bf16.mxu1 %v8250_v63 }
 0x945   :  { %5221 = vmatpush1.bf16.msra.mxu0 %v8251_v21  ;;  %5285 = vmatpush1.bf16.msra.mxu1 %v8252_v24 }
 0x946   :  { %5223 = vmatprep.subr.bf16.mxu0 %v8253_v60  ;;  %5287 = vmatprep.subr.bf16.mxu1 %v8254_v3 }
 0x949   :  { %5225 = vmatpush1.bf16.msra.mxu0 %v8255_v39  ;;  %5289 = vmatpush1.bf16.msra.mxu1 %v8256_v15 }
 0x94a   :  { %5227 = vmatprep.subr.bf16.mxu0 %v8257_v10  ;;  %5291 = vmatprep.subr.bf16.mxu1 %v8258_v6 }
 0x94d   :  { %5229 = vmatpush1.bf16.msra.mxu0 %v8259_v54  ;;  %5293 = vmatpush1.bf16.msra.mxu1 %v8260_v44 }
 0x9a3   :  { %v2826_v1 = vpop.f32.mrb[28].mxu0  ;;  %v2897_v30 = vpop.f32.mrb[28].mxu1 }
 0x9a4   :  { %v3044_v27 = vadd.f32 %v2826_v1, %v8261_v32  ;;  %v2828_v40 = vpop.f32.mrb[29].mxu0  ;;  %v2899_v47 = vpop.f32.mrb[29].mxu1  ;;  %v3046_v31 = vadd.f32 %v2897_v30, %v7802_v49 }
 0x9a5   :  { %v3045_v5 = vadd.f32 %v2828_v40, %v8262_v57  ;;  %v3047_v23 = vadd.f32 %v2899_v47, %v7896_v36 }
 0x9a6   :  { %v3355_v14 = vmul.f32 -1.442695, %v3044_v27  ;;  %v3357_v18 = vmul.f32 -1.442695, %v3046_v31 }
 0x9a7   :  { %v3356_v22 = vmul.f32 -1.442695, %v3045_v5 }
 0x9a8   :  { %5568 = vpow2.f32 %v3355_v14 }
 0x9a9   :  { %5570 = vpow2.f32 %v3356_v22 }
 0x9aa   :  { %5572 = vtanh.f32 %v3047_v23 }
 0x9ab   :  { %5574 = vpow2.f32 %v3357_v18 }
 0x9b2   :  { %v5569_v51 = vpop.eup %5568 }
 0x9b3   :  { %v3057_v34 = vadd.f32 1.0, %v5569_v51  ;;  %v5571_v59 = vpop.eup %5570 }
 0x9b4   :  { %v3058_v37 = vadd.f32 1.0, %v5571_v59  ;;  %v5573_v58 = vpop.eup %5572 }
 0x9b5   :  { %5576 = vrcp.f32 %v3057_v34  ;;  %v5575_v53 = vpop.eup %5574 }
 0x9b6   :  { %5578 = vrcp.f32 %v3058_v37  ;;  %v3059_v48 = vadd.f32 1.0, %v5575_v53 }
 0x9b8   :  { %5580 = vrcp.f32 %v3059_v48 }
 0x9bf   :  { %v5577_v41 = vpop.eup %5576 }
 0x9c0   :  { %v3068_v33 = vmul.f32 %v5577_v41, %v5573_v58  ;;  %v5579_v45 = vpop.eup %5578  ;;  %v3364_v58 = vld [vmem:[%s7244_s5] ss:$0 sm:$0xff] }
 0x9c1   :  { %v3067_v4 = vmul.f32 %v5579_v45, %v8263_v16 }
 0x9c2   :  { %v5581_v62 = vpop.eup %5580 }
 0x9c3   :  { %v7220_v2 = vadd.f32 %v3068_v33, %v3067_v4  ;;  %v3365_v33 = vld [vmem:[#allocation3] ss:$0 sm:$0xff] }
 0x9c5   :  { %5582 = vtanh.f32 %v7220_v2 }
 0x9cf   :  { %v5583_v42 = vpop.eup %5582 }
 0x9d0   :  { %v3071_v35 = vmul.f32 %v5583_v42, %v5581_v62 }
 0x9d2   :  { %3168 = vmatprep.mubr.f32.mxu0 %v3071_v35  ;;  %3239 = vmatprep.mubr.f32.mxu1 %v3071_v35 }
 0x9e3   :  { %v2968_v46 = vpop.f32.mrb[14].mxu0  ;;  %v3039_v25 = vpop.f32.mrb[14].mxu1 }
 0x9e4   :  { %v5306_v17 = vadd.f32 %v2968_v46, %v8264_v19  ;;  %v2970_v0 = vpop.f32.mrb[15].mxu0  ;;  %v3041_v61 = vpop.f32.mrb[15].mxu1  ;;  %v5320_v26 = vadd.f32 %v3039_v25, %v7713_v8 }
 0x9e5   :  { %v5307_v29 = vadd.f32 %v2970_v0, %v7807_v11  ;;  %v5321_v20 = vadd.f32 %v3041_v61, %v7714_v52 }
 0x9e6   :  { %v3358_v28 = vmul.f32 -1.442695, %v5306_v17  ;;  %v3360_v13 = vmul.f32 -1.442695, %v5320_v26 }
 0x9e7   :  { %v3359_v9 = vmul.f32 -1.442695, %v5307_v29 }
 0x9e8   :  { %5584 = vpow2.f32 %v3358_v28 }
 0x9e9   :  { %5586 = vpow2.f32 %v3359_v9 }
 0x9ea   :  { %5588 = vtanh.f32 %v5321_v20 }
 0x9eb   :  { %5590 = vpow2.f32 %v3360_v13 }
 0x9f2   :  { %v5585_v12 = vpop.eup %5584 }
 0x9f3   :  { %v3089_v7 = vadd.f32 1.0, %v5585_v12  ;;  %v5587_v43 = vpop.eup %5586 }
 0x9f4   :  { %v3090_v38 = vadd.f32 1.0, %v5587_v43  ;;  %v5589_v56 = vpop.eup %5588 }
 0x9f5   :  { %5592 = vrcp.f32 %v3089_v7  ;;  %v5591_v55 = vpop.eup %5590 }
 0x9f6   :  { %5594 = vrcp.f32 %v3090_v38  ;;  %v3091_v24 = vadd.f32 1.0, %v5591_v55 }
 0x9f8   :  { %5596 = vrcp.f32 %v3091_v24 }
 0x9ff   :  { %v5593_v11 = vpop.eup %5592 }
 0xa00   :  { %v3100_v63 = vmul.f32 %v5593_v11, %v5589_v56  ;;  %v5595_v21 = vpop.eup %5594 }
 0xa01   :  { %v3099_v60 = vmul.f32 %v5595_v21, %v7080_v50 }
 0xa02   :  { %v5597_v52 = vpop.eup %5596 }
 0xa03   :  { %v3101_v8 = vadd.f32 %v3100_v63, %v3099_v60 }
 0xa05   :  { %5598 = vtanh.f32 %v3101_v8 }
 0xa0f   :  { %v5599_v3 = vpop.eup %5598 }
 0xa10   :  { %v3103_v39 = vmul.f32 %v5599_v3, %v5597_v52 }
 0xa12   :  { %3169 = vmatmul.mubr.f32.vlgmr.msra.gmra.mrb[30].mxu0 %v3103_v39  ;;  %3240 = vmatmul.mubr.f32.vlgmr.msra.gmra.mrb[30].mxu1 %v3103_v39 }
 0xae5   :  { %v3170_v15 = vpop.f32.mrb[30].mxu0  ;;  %v3241_v10 = vpop.f32.mrb[30].mxu1 }
 0xae6   :  { %v3246_v6 = vadd.f32 %v3170_v15, %v8261_v32  ;;  %v3172_v54 = vpop.f32.mrb[31].mxu0  ;;  %v3243_v44 = vpop.f32.mrb[31].mxu1  ;;  %v3248_v50 = vadd.f32 %v3241_v10, %v7802_v49 }
 0xae7   :  { %v3247_v1 = vadd.f32 %v3172_v54, %v8262_v57  ;;  %v3249_v40 = vadd.f32 %v3243_v44, %v7896_v36 }
 0xae8   :  { %v3361_v30 = vmul.f32 -1.442695, %v3246_v6  ;;  %v3363_v47 = vmul.f32 -1.442695, %v3248_v50 }
 0xae9   :  { %v3362_v27 = vmul.f32 -1.442695, %v3247_v1 }
 0xaea   :  { %5600 = vpow2.f32 %v3361_v30 }
 0xaeb   :  { %5602 = vpow2.f32 %v3362_v27 }
 0xaec   :  { %5604 = vtanh.f32 %v3249_v40 }
 0xaed   :  { %5606 = vpow2.f32 %v3363_v47 }
 0xaf4   :  { %v5601_v5 = vpop.eup %5600 }
 0xaf5   :  { %v3259_v14 = vadd.f32 1.0, %v5601_v5  ;;  %v5603_v22 = vpop.eup %5602 }
 0xaf6   :  { %v3260_v32 = vadd.f32 1.0, %v5603_v22  ;;  %v5605_v31 = vpop.eup %5604 }
 0xaf7   :  { %5608 = vrcp.f32 %v3259_v14  ;;  %v5607_v23 = vpop.eup %5606 }
 0xaf8   :  { %5610 = vrcp.f32 %v3260_v32  ;;  %v3261_v34 = vadd.f32 1.0, %v5607_v23 }
 0xafa   :  { %5612 = vrcp.f32 %v3261_v34 }
 0xb01   :  { %v5609_v57 = vpop.eup %5608 }
 0xb02   :  { %v3270_v18 = vmul.f32 %v5609_v57, %v5605_v31  ;;  %v5611_v51 = vpop.eup %5610 }
 0xb03   :  { %v3269_v59 = vmul.f32 %v5611_v51, %v7220_v2 }
 0xb04   :  { %v5613_v36 = vpop.eup %5612 }
 0xb05   :  { %v3271_v49 = vadd.f32 %v3270_v18, %v3269_v59 }
 0xb07   :  { %5614 = vtanh.f32 %v3271_v49 }
 0xb11   :  { %v5615_v37 = vpop.eup %5614 }
 0xb12   :  { %v3273_v53 = vmul.f32 %v5615_v37, %v5613_v36 }
 0xb14   :  { %v3281_v41 = vmul.f32 %v3364_v58, %v3273_v53 }
 0xb16   :  { %3282 = vadd.xlane.f32.xlu0 %v3281_v41 }
 0xba3   :  { %v3283_v45 = vpop.xlane.xlu0 %3282 }
 0xba4   :  { %v3291_v48 = vadd.f32 %v3365_v33, %v3283_v45 }
 0xba6   :  { %3293 = vst.msk [vmem:[%s7246_s7] sm:$0xff] %vm3292_vm1, %v3291_v48 }
 0xba7   :  { %3298 = vsyncpa [#allocation5], 1 }
 0xba8   :  { %3299 = vsyncpa [#allocation7], 1 }

</bundles_post_ra>
